<compile_context>
chip_gen: v7x
topology: tpu7x:2x2x1
jax: 0.10.0
libtpu: 0.0.40
codegen_flags: <defaults>
</compile_context>

<pallas_src>
import functools

import jax
import jax.numpy as jnp
from jax import lax
from jax.experimental import pallas as pl
from jax.experimental.pallas import tpu as pltpu

# Defaults sized for the real IR-50 stem (64x112x112) and head (flat=25088),
# within every generation's VMEM budget (incl. v7x's 64 MiB physical).
CONV_TM = 2048    # target spatial tile (-> tm=1792 rows*W for 112x112)
FEAT_TK = 8192    # K tile for the feature head (4 MiB bf16 weight tile)
FEAT_TF = 256     # Fd tile (2 tiles over 512 -> v7x megacore-splittable)
FC_TC = 2048      # class tile for fc_layer


def _round_up(x, m):
    return ((x + m - 1) // m) * m


def _pick_rows_per_tile(H, W, target):
    """Largest th with th|H, (th*W)%128==0 and th*W<=target; fallback th=H."""
    best = H
    for th in range(1, H + 1):
        if H % th == 0 and (th * W) % 128 == 0 and th * W <= target:
            best = th
    return best


# ----------------------------------------------------------------------------
# One-time (host-side) weight preparation — hoisted out of the forward.
# ----------------------------------------------------------------------------
def prepare_params(p, *, tk=FEAT_TK, tc=FC_TC):
    conv_w = p["conv_w"]
    Cout, Cin, _, _ = conv_w.shape
    K = 9 * Cin
    Kp = _round_up(K, 8)
    # Fold BN2d scale into the conv weight; rows ordered (kh, kw, cin) to match
    # the in-kernel tap construction.
    wmat = (conv_w * p["bn1_scale"][:, None, None, None]).transpose(2, 3, 1, 0)
    wmat = wmat.reshape(K, Cout)
    wmat = jnp.pad(wmat, ((0, Kp - K), (0, 0))).T.astype(jnp.bfloat16)  # (Cout,Kp)

    Fd, Kf = p["w1"].shape
    tk_e = min(tk, _round_up(Kf, 128))
    Kfp = _round_up(Kf, tk_e)
    w1t = jnp.pad(p["w1"].T, ((0, Kfp - Kf), (0, 0))).astype(jnp.bfloat16)  # (Kfp,Fd)

    C = p["wfc"].shape[0]
    tc_e = min(tc, _round_up(C, 128))
    Cp = _round_up(C, tc_e)
    wfct = jnp.pad(p["wfc"].T, ((0, 0), (0, Cp - C))).astype(jnp.bfloat16)  # (Fd,Cp)
    bfc = jnp.pad(p["bfc"], (0, Cp - C)).reshape(1, Cp)

    return dict(
        conv_w=wmat,
        conv_shift=p["bn1_shift"].reshape(Cout, 1),
        prelu_a=p["prelu_a"].reshape(Cout, 1),
        w1t=w1t,
        bnf_scale=p["bnf_scale"].reshape(1, Fd),
        bnf_shift=p["bnf_shift"].reshape(1, Fd),
        wfct=wfct,
        bfc=bfc,
    )


# ----------------------------------------------------------------------------
# Kernel 1: conv3x3 (in-kernel im2col) + folded BN2d + PReLU, bf16 output
# ----------------------------------------------------------------------------
def conv_bn_prelu_kernel(x_ref, w_ref, shift_ref, alpha_ref, o_ref,
                         *, width, tile, halo, lane_mult, kpad):
    # x_ref: (Cin, (H+2)*W + 2) f32 — H-padded, flattened image (VMEM-resident
    # per batch element).  One 128-aligned dynamic window load per tile, then
    # 9 static in-register shifts form the im2col patch matrix.
    m = pl.program_id(1)
    start = m * tile
    if lane_mult > 1:
        start = pl.multiple_of(start, lane_mult)
    win = x_ref[:, pl.ds(start, halo)]                       # (Cin, tile+2W+2)
    col = lax.broadcasted_iota(jnp.int32, (1, tile), 1) % width
    taps = []
    for kh in range(3):
        for d in (-1, 0, 1):                                  # kw = d + 1
            off = kh * width + d + 1
            s = win[:, off:off + tile]
            if d == -1:
                s = jnp.where(col == 0, 0.0, s)               # left border
            elif d == 1:
                s = jnp.where(col == width - 1, 0.0, s)       # right border
            taps.append(s)
    if kpad:
        taps.append(jnp.zeros((kpad, tile), win.dtype))
    patches = jnp.concatenate(taps, axis=0).astype(jnp.bfloat16)   # (Kp, tile)

    z = jnp.dot(w_ref[...], patches, preferred_element_type=jnp.float32)
    z = z + shift_ref[...]                                    # BN scale folded into W
    o_ref[...] = jnp.where(z > 0.0, z, alpha_ref[...] * z).astype(o_ref.dtype)


def conv_bn_prelu(x, wmat, shift, alpha, *, target_tm=CONV_TM):
    N, Cin, H, W = x.shape
    Cout, Kp = wmat.shape
    HW = H * W
    th = _pick_rows_per_tile(H, W, target_tm)
    tm = th * W
    gm = H // th

    # Per-forward activation prep only (tiny): pad one zero row above/below,
    # flatten spatial, and add a one-element guard at each end so the halo
    # window never reads out of bounds.
    xfl = jnp.pad(x, ((0, 0), (0, 0), (1, 1), (0, 0))).reshape(N, Cin, (H + 2) * W)
    xfl = jnp.pad(xfl, ((0, 0), (0, 0), (1, 1)))
    Lp = (H + 2) * W + 2
    halo = tm + 2 * W + 2

    kernel = functools.partial(
        conv_bn_prelu_kernel, width=W, tile=tm, halo=halo,
        lane_mult=128 if tm % 128 == 0 else 1, kpad=Kp - 9 * Cin)

    out = pl.pallas_call(
        kernel,
        out_shape=jax.ShapeDtypeStruct((N, Cout, HW), jnp.bfloat16),
        grid_spec=pltpu.PrefetchScalarGridSpec(
            num_scalar_prefetch=0,
            grid=(N, gm),
            in_specs=[
                pl.BlockSpec((None, Cin, Lp), lambda n, m: (n, 0, 0)),
                pl.BlockSpec((Cout, Kp), lambda n, m: (0, 0)),
                pl.BlockSpec((Cout, 1), lambda n, m: (0, 0)),
                pl.BlockSpec((Cout, 1), lambda n, m: (0, 0)),
            ],
            out_specs=pl.BlockSpec((None, Cout, tm), lambda n, m: (n, 0, m)),
        ),
        compiler_params=pltpu.CompilerParams(
            dimension_semantics=("parallel", "parallel")),
    )(xfl, wmat, shift, alpha)
    # (N, Cout, H*W) flattens directly in PyTorch NCHW order: free reshape.
    return out.reshape(N, Cout * HW)


# ----------------------------------------------------------------------------
# Kernel 2: feature head — Fd-parallel, K-tiled Linear(flat->512) + folded BN1d
# ----------------------------------------------------------------------------
def feat_bn_kernel(x_ref, w_ref, s_ref, b_ref, feat_ref, acc_ref):
    k = pl.program_id(1)

    @pl.when(k == 0)
    def _():
        acc_ref[...] = jnp.zeros_like(acc_ref)

    acc_ref[...] += jnp.dot(x_ref[...], w_ref[...],      # x is already bf16
                            preferred_element_type=jnp.float32)

    @pl.when(k == pl.num_programs(1) - 1)
    def _():
        feat_ref[...] = acc_ref[...] * s_ref[...] + b_ref[...]   # folded BN1d


def feat_head(xf, w1t, bn_s, bn_b, *, tk=FEAT_TK, tf=FEAT_TF):
    N, Kf = xf.shape
    Kfp, Fd = w1t.shape
    if Kf < Kfp:                                  # match the weight's K padding
        xf = jnp.pad(xf, ((0, 0), (0, Kfp - Kf)))
    tk = min(tk, Kfp)
    gk = Kfp // tk
    tf = min(tf, Fd)
    if Fd % tf:
        tf = Fd
    gf = Fd // tf

    return pl.pallas_call(
        feat_bn_kernel,
        out_shape=jax.ShapeDtypeStruct((N, Fd), jnp.float32),
        grid_spec=pltpu.PrefetchScalarGridSpec(
            num_scalar_prefetch=0,
            grid=(gf, gk),                        # Fd parallel (v7x megacore), K last
            in_specs=[
                pl.BlockSpec((N, tk), lambda f, k: (0, k)),
                pl.BlockSpec((tk, tf), lambda f, k: (k, f)),
                pl.BlockSpec((1, tf), lambda f, k: (0, f)),
                pl.BlockSpec((1, tf), lambda f, k: (0, f)),
            ],
            out_specs=pl.BlockSpec((N, tf), lambda f, k: (0, f)),
            scratch_shapes=[pltpu.VMEM((N, tf), jnp.float32)],
        ),
        compiler_params=pltpu.CompilerParams(
            dimension_semantics=("parallel", "arbitrary")),
    )(xf, w1t, bn_s, bn_b)


# ----------------------------------------------------------------------------
# Kernel 3: FaceNet.fc_layer — class-tiled Linear(512 -> num_classes)
# ----------------------------------------------------------------------------
def fc_kernel(f_ref, w_ref, b_ref, o_ref):
    o_ref[...] = (jnp.dot(f_ref[...].astype(jnp.bfloat16), w_ref[...],
                          preferred_element_type=jnp.float32) + b_ref[...])


def fc_layer(feat, wfct, bfc, *, tc=FC_TC, num_classes=None):
    N, Fd = feat.shape
    Cp = wfct.shape[1]
    tc = min(tc, Cp)
    gc = Cp // tc

    out = pl.pallas_call(
        fc_kernel,
        out_shape=jax.ShapeDtypeStruct((N, Cp), jnp.float32),
        grid_spec=pltpu.PrefetchScalarGridSpec(
            num_scalar_prefetch=0,
            grid=(gc,),
            in_specs=[
                pl.BlockSpec((N, Fd), lambda j: (0, 0)),
                pl.BlockSpec((Fd, tc), lambda j: (0, j)),
                pl.BlockSpec((1, tc), lambda j: (0, j)),
            ],
            out_specs=pl.BlockSpec((N, tc), lambda j: (0, j)),
        ),
        compiler_params=pltpu.CompilerParams(
            dimension_semantics=("parallel",)),
    )(feat, wfct, bfc)
    if num_classes is not None and num_classes != Cp:
        out = out[:, :num_classes]
    return out


def facenet_forward(x, p, *, target_tm=CONV_TM, tk=FEAT_TK, tf=FEAT_TF,
                    tc=FC_TC, num_classes=None):
    xf = conv_bn_prelu(x, p["conv_w"], p["conv_shift"], p["prelu_a"],
                       target_tm=target_tm)
    feat = feat_head(xf, p["w1t"], p["bnf_scale"], p["bnf_shift"], tk=tk, tf=tf)
    out = fc_layer(feat, p["wfct"], p["bfc"], tc=tc, num_classes=num_classes)
    return [feat, out]


if __name__ == "__main__":
    # Small shapes consistent with the module: RGB NCHW image in, 512-d feat,
    # 1000-way classifier out.
    N, Cin, H, W = 2, 3, 16, 16
    Cout = 32
    feat_dim = 512            # FaceNet.feat_dim
    num_classes = 1000        # FaceNet default num_classes
    flat = Cout * H * W

    key = jax.random.PRNGKey(0)
    ks = jax.random.split(key, 9)
    x = jax.random.normal(ks[0], (N, Cin, H, W), jnp.float32)

    raw = dict(
        conv_w=0.1 * jax.random.normal(ks[1], (Cout, Cin, 3, 3), jnp.float32),
        bn1_scale=1.0 + 0.05 * jax.random.normal(ks[2], (Cout,), jnp.float32),
        bn1_shift=0.05 * jax.random.normal(ks[3], (Cout,), jnp.float32),
        prelu_a=jnp.full((Cout,), 0.25, jnp.float32),
        w1=0.02 * jax.random.normal(ks[4], (feat_dim, flat), jnp.float32),
        bnf_scale=1.0 + 0.05 * jax.random.normal(ks[5], (feat_dim,), jnp.float32),
        bnf_shift=0.05 * jax.random.normal(ks[6], (feat_dim,), jnp.float32),
        wfc=0.02 * jax.random.normal(ks[7], (num_classes, feat_dim), jnp.float32),
        bfc=0.01 * jax.random.normal(ks[8], (num_classes,), jnp.float32),
    )

    # Small tiles here purely to exercise the multi-step grids at toy shapes
    # (conv: 2 spatial tiles; head: 2 Fd x 2 K tiles; fc: 2 class tiles).
    # Production defaults (CONV_TM / FEAT_TK / FEAT_TF / FC_TC) are sized for
    # the real 64x112x112 stem and flat=25088 head on v5e/v6e/v7x.
    tk, tf, tc, target_tm = 4096, 256, 512, 128
    params = prepare_params(raw, tk=tk, tc=tc)       # one-time prep, outside jit
    fwd = jax.jit(functools.partial(facenet_forward, target_tm=target_tm,
                                    tk=tk, tf=tf, tc=tc,
                                    num_classes=num_classes))
    feat, out = fwd(x, params)
    jax.block_until_ready((feat, out))
    assert feat.shape == (N, feat_dim) and out.shape == (N, num_classes)

    # Pure-JAX f32 reference check.
    zr = lax.conv_general_dilated(x, raw["conv_w"], (1, 1), "SAME",
                                  dimension_numbers=("NCHW", "OIHW", "NCHW"))
    zr = zr * raw["bn1_scale"][None, :, None, None] + \
         raw["bn1_shift"][None, :, None, None]
    zr = jnp.where(zr > 0, zr, raw["prelu_a"][None, :, None, None] * zr)
    xfr = zr.reshape(N, -1)
    feat_ref = (xfr @ raw["w1"].T) * raw["bnf_scale"] + raw["bnf_shift"]
    out_ref = feat_ref @ raw["wfc"].T + raw["bfc"]
    assert jnp.allclose(feat, feat_ref, rtol=5e-2, atol=5e-2)
    assert jnp.allclose(out, out_ref, rtol=5e-2, atol=5e-2)

    print("KERNEL_OK")
</pallas_src>

<mosaic_0001>
module attributes {stable_mosaic.version = 11 : i64} {
  func.func @feat_bn_kernel(%arg0: i32, %arg1: i32, %arg2: memref<2x4096xbf16, #tpu.memory_space<vmem>>, %arg3: memref<4096x256xbf16, #tpu.memory_space<vmem>>, %arg4: memref<1x256xf32, #tpu.memory_space<vmem>>, %arg5: memref<1x256xf32, #tpu.memory_space<vmem>>, %arg6: memref<2x256xf32, #tpu.memory_space<vmem>>, %arg7: memref<2x256xf32, #tpu.memory_space<vmem>>) attributes {dimension_semantics = [#tpu.dimension_semantics<parallel>, #tpu.dimension_semantics<arbitrary>], iteration_bounds = array<i64: 2, 2>, scalar_prefetch = 0 : i64, scratch_operands = 1 : i64, tpu.core_type = #tpu.core_type<tc>, window_params = [{transform_indices = @transform_0, window_bounds = array<i64: 2, 4096>}, {transform_indices = @transform_1, window_bounds = array<i64: 4096, 256>}, {transform_indices = @transform_2, window_bounds = array<i64: 1, 256>}, {transform_indices = @transform_3, window_bounds = array<i64: 1, 256>}, {transform_indices = @transform_4, window_bounds = array<i64: 2, 256>}]} {
    %c0_i32 = arith.constant 0 : i32
    %0 = arith.cmpi eq, %arg1, %c0_i32 : i32
    %1 = arith.extui %0 : i1 to i32
    %c0_i32_0 = arith.constant 0 : i32
    %2 = arith.cmpi ne, %1, %c0_i32_0 : i32
    scf.if %2 {
      %cst_9 = arith.constant 0.000000e+00 : f32
      %12 = vector.broadcast %cst_9 : f32 to vector<2x256xf32>
      %c0_10 = arith.constant 0 : index
      %c0_11 = arith.constant 0 : index
      %13 = vector.load %arg7[%c0_10, %c0_11] : memref<2x256xf32, #tpu.memory_space<vmem>>, vector<2x256xf32>
      tpu.vector_store %arg7[%c0_10, %c0_11], %12 {strides = array<i32>} : memref<2x256xf32, #tpu.memory_space<vmem>>, vector<2x256xf32>,
    } else {
    }
    %c0 = arith.constant 0 : index
    %c0_1 = arith.constant 0 : index
    %3 = vector.load %arg7[%c0, %c0_1] : memref<2x256xf32, #tpu.memory_space<vmem>>, vector<2x256xf32>
    %c0_2 = arith.constant 0 : index
    %c0_3 = arith.constant 0 : index
    %4 = vector.load %arg2[%c0_2, %c0_3] : memref<2x4096xbf16, #tpu.memory_space<vmem>>, vector<2x4096xbf16>
    %c0_4 = arith.constant 0 : index
    %c0_5 = arith.constant 0 : index
    %5 = vector.load %arg3[%c0_4, %c0_5] : memref<4096x256xbf16, #tpu.memory_space<vmem>>, vector<4096x256xbf16>
    %cst = arith.constant dense<0.000000e+00> : vector<2x256xf32>
    %6 = tpu.matmul %4, %5, %cst {dimension_numbers = #tpu.dot_dimension_numbers<[1], [0], [0], [1], [0, 0, 1, 1], [], []>} : vector<2x4096xbf16>, vector<4096x256xbf16>, vector<2x256xf32> -> vector<2x256xf32>
    %7 = arith.addf %3, %6 : vector<2x256xf32>
    %c0_6 = arith.constant 0 : index
    %c0_7 = arith.constant 0 : index
    %8 = vector.load %arg7[%c0_6, %c0_7] : memref<2x256xf32, #tpu.memory_space<vmem>>, vector<2x256xf32>
    tpu.vector_store %arg7[%c0_6, %c0_7], %7 {strides = array<i32>} : memref<2x256xf32, #tpu.memory_space<vmem>>, vector<2x256xf32>,
    %c1_i32 = arith.constant 1 : i32
    %9 = arith.cmpi eq, %arg1, %c1_i32 : i32
    %10 = arith.extui %9 : i1 to i32
    %c0_i32_8 = arith.constant 0 : i32
    %11 = arith.cmpi ne, %10, %c0_i32_8 : i32
    scf.if %11 {
      %c0_9 = arith.constant 0 : index
      %c0_10 = arith.constant 0 : index
      %12 = vector.load %arg7[%c0_9, %c0_10] : memref<2x256xf32, #tpu.memory_space<vmem>>, vector<2x256xf32>
      %c0_11 = arith.constant 0 : index
      %c0_12 = arith.constant 0 : index
      %13 = vector.load %arg4[%c0_11, %c0_12] : memref<1x256xf32, #tpu.memory_space<vmem>>, vector<1x256xf32>
      %14 = vector.broadcast %13 : vector<1x256xf32> to vector<2x256xf32>
      %15 = arith.mulf %12, %14 : vector<2x256xf32>
      %c0_13 = arith.constant 0 : index
      %c0_14 = arith.constant 0 : index
      %16 = vector.load %arg5[%c0_13, %c0_14] : memref<1x256xf32, #tpu.memory_space<vmem>>, vector<1x256xf32>
      %17 = vector.broadcast %16 : vector<1x256xf32> to vector<2x256xf32>
      %18 = arith.addf %15, %17 : vector<2x256xf32>
      %c0_15 = arith.constant 0 : index
      %c0_16 = arith.constant 0 : index
      %19 = vector.load %arg6[%c0_15, %c0_16] : memref<2x256xf32, #tpu.memory_space<vmem>>, vector<2x256xf32>
      tpu.vector_store %arg6[%c0_15, %c0_16], %18 {strides = array<i32>} : memref<2x256xf32, #tpu.memory_space<vmem>>, vector<2x256xf32>,
    } else {
    }
    return
  }
  func.func @transform_0(%arg0: i32, %arg1: i32) -> (i32, i32) {
    %c0_i32 = arith.constant 0 : i32
    %c0_i32_0 = arith.constant 0 : i32
    return %c0_i32, %arg1 : i32, i32
  }
  func.func @transform_1(%arg0: i32, %arg1: i32) -> (i32, i32) {
    %c0_i32 = arith.constant 0 : i32
    return %arg1, %arg0 : i32, i32
  }
  func.func @transform_2(%arg0: i32, %arg1: i32) -> (i32, i32) {
    %c0_i32 = arith.constant 0 : i32
    %c0_i32_0 = arith.constant 0 : i32
    return %c0_i32, %arg0 : i32, i32
  }
  func.func @transform_3(%arg0: i32, %arg1: i32) -> (i32, i32) {
    %c0_i32 = arith.constant 0 : i32
    %c0_i32_0 = arith.constant 0 : i32
    return %c0_i32, %arg0 : i32, i32
  }
  func.func @transform_4(%arg0: i32, %arg1: i32) -> (i32, i32) {
    %c0_i32 = arith.constant 0 : i32
    %c0_i32_0 = arith.constant 0 : i32
    return %c0_i32, %arg0 : i32, i32
  }
}

module attributes {stable_mosaic.version = 11 : i64} {
  func.func @fc_kernel(%arg0: i32, %arg1: memref<2x512xf32, #tpu.memory_space<vmem>>, %arg2: memref<512x512xbf16, #tpu.memory_space<vmem>>, %arg3: memref<1x512xf32, #tpu.memory_space<vmem>>, %arg4: memref<2x512xf32, #tpu.memory_space<vmem>>) attributes {dimension_semantics = [#tpu.dimension_semantics<parallel>], iteration_bounds = array<i64: 2>, scalar_prefetch = 0 : i64, scratch_operands = 0 : i64, tpu.core_type = #tpu.core_type<tc>, window_params = [{pipeline_mode = #tpu.pipeline_mode<synchronous>, transform_indices = @transform_0, window_bounds = array<i64: 2, 512>}, {transform_indices = @transform_1, window_bounds = array<i64: 512, 512>}, {transform_indices = @transform_2, window_bounds = array<i64: 1, 512>}, {transform_indices = @transform_3, window_bounds = array<i64: 2, 512>}]} {
    %c0 = arith.constant 0 : index
    %c0_0 = arith.constant 0 : index
    %0 = vector.load %arg1[%c0, %c0_0] : memref<2x512xf32, #tpu.memory_space<vmem>>, vector<2x512xf32>
    %1 = arith.truncf %0 : vector<2x512xf32> to vector<2x512xbf16>
    %c0_1 = arith.constant 0 : index
    %c0_2 = arith.constant 0 : index
    %2 = vector.load %arg2[%c0_1, %c0_2] : memref<512x512xbf16, #tpu.memory_space<vmem>>, vector<512x512xbf16>
    %cst = arith.constant dense<0.000000e+00> : vector<2x512xf32>
    %3 = tpu.matmul %1, %2, %cst {dimension_numbers = #tpu.dot_dimension_numbers<[1], [0], [0], [1], [0, 0, 1, 1], [], []>} : vector<2x512xbf16>, vector<512x512xbf16>, vector<2x512xf32> -> vector<2x512xf32>
    %c0_3 = arith.constant 0 : index
    %c0_4 = arith.constant 0 : index
    %4 = vector.load %arg3[%c0_3, %c0_4] : memref<1x512xf32, #tpu.memory_space<vmem>>, vector<1x512xf32>
    %5 = vector.broadcast %4 : vector<1x512xf32> to vector<2x512xf32>
    %6 = arith.addf %3, %5 : vector<2x512xf32>
    %c0_5 = arith.constant 0 : index
    %c0_6 = arith.constant 0 : index
    %7 = vector.load %arg4[%c0_5, %c0_6] : memref<2x512xf32, #tpu.memory_space<vmem>>, vector<2x512xf32>
    tpu.vector_store %arg4[%c0_5, %c0_6], %6 {strides = array<i32>} : memref<2x512xf32, #tpu.memory_space<vmem>>, vector<2x512xf32>,
    return
  }
  func.func @transform_0(%arg0: i32) -> (i32, i32) {
    %c0_i32 = arith.constant 0 : i32
    %c0_i32_0 = arith.constant 0 : i32
    %c0_i32_1 = arith.constant 0 : i32
    return %c0_i32, %c0_i32_0 : i32, i32
  }
  func.func @transform_1(%arg0: i32) -> (i32, i32) {
    %c0_i32 = arith.constant 0 : i32
    %c0_i32_0 = arith.constant 0 : i32
    return %c0_i32, %arg0 : i32, i32
  }
  func.func @transform_2(%arg0: i32) -> (i32, i32) {
    %c0_i32 = arith.constant 0 : i32
    %c0_i32_0 = arith.constant 0 : i32
    return %c0_i32, %arg0 : i32, i32
  }
  func.func @transform_3(%arg0: i32) -> (i32, i32) {
    %c0_i32 = arith.constant 0 : i32
    %c0_i32_0 = arith.constant 0 : i32
    return %c0_i32, %arg0 : i32, i32
  }
}

module attributes {stable_mosaic.version = 11 : i64} {
  func.func @conv_bn_prelu_kernel(%arg0: i32, %arg1: i32, %arg2: memref<1x3x290xf32, #tpu.memory_space<vmem>>, %arg3: memref<32x32xbf16, #tpu.memory_space<vmem>>, %arg4: memref<32x1xf32, #tpu.memory_space<vmem>>, %arg5: memref<32x1xf32, #tpu.memory_space<vmem>>, %arg6: memref<1x32x128xbf16, #tpu.memory_space<vmem>>) attributes {dimension_semantics = [#tpu.dimension_semantics<parallel>, #tpu.dimension_semantics<parallel>], iteration_bounds = array<i64: 2, 2>, scalar_prefetch = 0 : i64, scratch_operands = 0 : i64, tpu.core_type = #tpu.core_type<tc>, window_params = [{transform_indices = @transform_0, window_bounds = array<i64: 1, 3, 290>}, {pipeline_mode = #tpu.pipeline_mode<synchronous>, transform_indices = @transform_1, window_bounds = array<i64: 32, 32>}, {pipeline_mode = #tpu.pipeline_mode<synchronous>, transform_indices = @transform_2, window_bounds = array<i64: 32, 1>}, {pipeline_mode = #tpu.pipeline_mode<synchronous>, transform_indices = @transform_3, window_bounds = array<i64: 32, 1>}, {transform_indices = @transform_4, window_bounds = array<i64: 1, 32, 128>}]} {
    %c128_i32 = arith.constant 128 : i32
    %0 = arith.muli %arg1, %c128_i32 : i32
    %1 = tpu.assume_multiple %0, 128 : i32
    %c0 = arith.constant 0 : index
    %c0_0 = arith.constant 0 : index
    %2 = arith.index_cast %1 : i32 to index
    %3 = vector.load %arg2[%c0, %c0_0, %2] : memref<1x3x290xf32, #tpu.memory_space<vmem>>, vector<1x3x162xf32>
    %4 = vector.shape_cast %3 : vector<1x3x162xf32> to vector<3x162xf32>
    %5 = tpu.iota {dimensions = array<i32: 1>} : vector<1x128xi32>
    %c16_i32 = arith.constant 16 : i32
    %c0_i32 = arith.constant 0 : i32
    %6 = arith.cmpi eq, %c16_i32, %c0_i32 : i32
    %c1_i32 = arith.constant 1 : i32
    %7 = arith.select %6, %c1_i32, %c16_i32 : i32
    %8 = vector.broadcast %7 : i32 to vector<1x128xi32>
    %9 = arith.remsi %5, %8 : vector<1x128xi32>
    %c0_i32_1 = arith.constant 0 : i32
    %10 = vector.broadcast %c0_i32_1 : i32 to vector<1x128xi32>
    %11 = arith.cmpi ne, %9, %10 : vector<1x128xi32>
    %c0_i32_2 = arith.constant 0 : i32
    %12 = vector.broadcast %c0_i32_2 : i32 to vector<1x128xi32>
    %13 = arith.cmpi slt, %9, %12 : vector<1x128xi32>
    %c0_i32_3 = arith.constant 0 : i32
    %14 = arith.cmpi slt, %7, %c0_i32_3 : i32
    %15 = vector.broadcast %14 : i1 to vector<1x128xi1>
    %16 = vector.broadcast %15 : vector<1x128xi1> to vector<1x128xi1>
    %17 = arith.xori %13, %16 : vector<1x128xi1>
    %18 = arith.andi %17, %11 : vector<1x128xi1>
    %19 = vector.broadcast %7 : i32 to vector<1x128xi32>
    %20 = arith.addi %9, %19 : vector<1x128xi32>
    %21 = arith.select %18, %20, %9 : vector<1x128xi1>, vector<1x128xi32>
    %22 = vector.extract_strided_slice %4 {offsets = [0, 0], sizes = [3, 128], strides = [1, 1]} : vector<3x162xf32> to vector<3x128xf32>
    %c0_i32_4 = arith.constant 0 : i32
    %23 = vector.broadcast %c0_i32_4 : i32 to vector<1x128xi32>
    %24 = arith.cmpi eq, %21, %23 : vector<1x128xi32>
    %cst = arith.constant 0.000000e+00 : f32
    %25 = vector.shape_cast %24 : vector<1x128xi1> to vector<1x128xi1>
    %26 = vector.broadcast %25 : vector<1x128xi1> to vector<3x128xi1>
    %27 = vector.broadcast %cst : f32 to vector<3x128xf32>
    %28 = arith.select %26, %27, %22 : vector<3x128xi1>, vector<3x128xf32>
    %29 = vector.extract_strided_slice %4 {offsets = [0, 1], sizes = [3, 128], strides = [1, 1]} : vector<3x162xf32> to vector<3x128xf32>
    %30 = vector.extract_strided_slice %4 {offsets = [0, 2], sizes = [3, 128], strides = [1, 1]} : vector<3x162xf32> to vector<3x128xf32>
    %c15_i32 = arith.constant 15 : i32
    %31 = vector.broadcast %c15_i32 : i32 to vector<1x128xi32>
    %32 = arith.cmpi eq, %21, %31 : vector<1x128xi32>
    %cst_5 = arith.constant 0.000000e+00 : f32
    %33 = vector.shape_cast %32 : vector<1x128xi1> to vector<1x128xi1>
    %34 = vector.broadcast %33 : vector<1x128xi1> to vector<3x128xi1>
    %35 = vector.broadcast %cst_5 : f32 to vector<3x128xf32>
    %36 = arith.select %34, %35, %30 : vector<3x128xi1>, vector<3x128xf32>
    %37 = vector.extract_strided_slice %4 {offsets = [0, 16], sizes = [3, 128], strides = [1, 1]} : vector<3x162xf32> to vector<3x128xf32>
    %c0_i32_6 = arith.constant 0 : i32
    %38 = vector.broadcast %c0_i32_6 : i32 to vector<1x128xi32>
    %39 = arith.cmpi eq, %21, %38 : vector<1x128xi32>
    %cst_7 = arith.constant 0.000000e+00 : f32
    %40 = vector.shape_cast %39 : vector<1x128xi1> to vector<1x128xi1>
    %41 = vector.broadcast %40 : vector<1x128xi1> to vector<3x128xi1>
    %42 = vector.broadcast %cst_7 : f32 to vector<3x128xf32>
    %43 = arith.select %41, %42, %37 : vector<3x128xi1>, vector<3x128xf32>
    %44 = vector.extract_strided_slice %4 {offsets = [0, 17], sizes = [3, 128], strides = [1, 1]} : vector<3x162xf32> to vector<3x128xf32>
    %45 = vector.extract_strided_slice %4 {offsets = [0, 18], sizes = [3, 128], strides = [1, 1]} : vector<3x162xf32> to vector<3x128xf32>
    %c15_i32_8 = arith.constant 15 : i32
    %46 = vector.broadcast %c15_i32_8 : i32 to vector<1x128xi32>
    %47 = arith.cmpi eq, %21, %46 : vector<1x128xi32>
    %cst_9 = arith.constant 0.000000e+00 : f32
    %48 = vector.shape_cast %47 : vector<1x128xi1> to vector<1x128xi1>
    %49 = vector.broadcast %48 : vector<1x128xi1> to vector<3x128xi1>
    %50 = vector.broadcast %cst_9 : f32 to vector<3x128xf32>
    %51 = arith.select %49, %50, %45 : vector<3x128xi1>, vector<3x128xf32>
    %52 = vector.extract_strided_slice %4 {offsets = [0, 32], sizes = [3, 128], strides = [1, 1]} : vector<3x162xf32> to vector<3x128xf32>
    %c0_i32_10 = arith.constant 0 : i32
    %53 = vector.broadcast %c0_i32_10 : i32 to vector<1x128xi32>
    %54 = arith.cmpi eq, %21, %53 : vector<1x128xi32>
    %cst_11 = arith.constant 0.000000e+00 : f32
    %55 = vector.shape_cast %54 : vector<1x128xi1> to vector<1x128xi1>
    %56 = vector.broadcast %55 : vector<1x128xi1> to vector<3x128xi1>
    %57 = vector.broadcast %cst_11 : f32 to vector<3x128xf32>
    %58 = arith.select %56, %57, %52 : vector<3x128xi1>, vector<3x128xf32>
    %59 = vector.extract_strided_slice %4 {offsets = [0, 33], sizes = [3, 128], strides = [1, 1]} : vector<3x162xf32> to vector<3x128xf32>
    %60 = vector.extract_strided_slice %4 {offsets = [0, 34], sizes = [3, 128], strides = [1, 1]} : vector<3x162xf32> to vector<3x128xf32>
    %c15_i32_12 = arith.constant 15 : i32
    %61 = vector.broadcast %c15_i32_12 : i32 to vector<1x128xi32>
    %62 = arith.cmpi eq, %21, %61 : vector<1x128xi32>
    %cst_13 = arith.constant 0.000000e+00 : f32
    %63 = vector.shape_cast %62 : vector<1x128xi1> to vector<1x128xi1>
    %64 = vector.broadcast %63 : vector<1x128xi1> to vector<3x128xi1>
    %65 = vector.broadcast %cst_13 : f32 to vector<3x128xf32>
    %66 = arith.select %64, %65, %60 : vector<3x128xi1>, vector<3x128xf32>
    %cst_14 = arith.constant 0.000000e+00 : f32
    %67 = vector.broadcast %cst_14 : f32 to vector<5x128xf32>
    %68 = tpu.concatenate %28, %29, %36, %43, %44, %51, %58, %59, %66, %67 in 0 : vector<3x128xf32>, vector<3x128xf32>, vector<3x128xf32>, vector<3x128xf32>, vector<3x128xf32>, vector<3x128xf32>, vector<3x128xf32>, vector<3x128xf32>, vector<3x128xf32>, vector<5x128xf32> -> vector<32x128xf32>
    %69 = arith.truncf %68 : vector<32x128xf32> to vector<32x128xbf16>
    %c0_15 = arith.constant 0 : index
    %c0_16 = arith.constant 0 : index
    %70 = vector.load %arg3[%c0_15, %c0_16] : memref<32x32xbf16, #tpu.memory_space<vmem>>, vector<32x32xbf16>
    %cst_17 = arith.constant dense<0.000000e+00> : vector<32x128xf32>
    %71 = tpu.matmul %70, %69, %cst_17 {dimension_numbers = #tpu.dot_dimension_numbers<[1], [0], [0], [1], [0, 0, 1, 1], [], []>} : vector<32x32xbf16>, vector<32x128xbf16>, vector<32x128xf32> -> vector<32x128xf32>
    %c0_18 = arith.constant 0 : index
    %c0_19 = arith.constant 0 : index
    %72 = vector.load %arg4[%c0_18, %c0_19] : memref<32x1xf32, #tpu.memory_space<vmem>>, vector<32x1xf32>
    %73 = vector.broadcast %72 : vector<32x1xf32> to vector<32x128xf32>
    %74 = arith.addf %71, %73 : vector<32x128xf32>
    %cst_20 = arith.constant 0.000000e+00 : f32
    %75 = vector.broadcast %cst_20 : f32 to vector<32x128xf32>
    %76 = arith.cmpf ogt, %74, %75 : vector<32x128xf32>
    %c0_21 = arith.constant 0 : index
    %c0_22 = arith.constant 0 : index
    %77 = vector.load %arg5[%c0_21, %c0_22] : memref<32x1xf32, #tpu.memory_space<vmem>>, vector<32x1xf32>
    %78 = vector.broadcast %77 : vector<32x1xf32> to vector<32x128xf32>
    %79 = arith.mulf %78, %74 : vector<32x128xf32>
    %80 = arith.select %76, %74, %79 : vector<32x128xi1>, vector<32x128xf32>
    %81 = arith.truncf %80 : vector<32x128xf32> to vector<32x128xbf16>
    %c0_23 = arith.constant 0 : index
    %c0_24 = arith.constant 0 : index
    %c0_25 = arith.constant 0 : index
    %82 = vector.load %arg6[%c0_23, %c0_24, %c0_25] : memref<1x32x128xbf16, #tpu.memory_space<vmem>>, vector<1x32x128xbf16>
    %83 = vector.shape_cast %82 : vector<1x32x128xbf16> to vector<32x128xbf16>
    %84 = vector.shape_cast %81 : vector<32x128xbf16> to vector<1x32x128xbf16>
    tpu.vector_store %arg6[%c0_23, %c0_24, %c0_25], %84 {strides = array<i32>} : memref<1x32x128xbf16, #tpu.memory_space<vmem>>, vector<1x32x128xbf16>,
    return
  }
  func.func @transform_0(%arg0: i32, %arg1: i32) -> (i32, i32, i32) {
    %c0_i32 = arith.constant 0 : i32
    %c0_i32_0 = arith.constant 0 : i32
    %c0_i32_1 = arith.constant 0 : i32
    return %arg0, %c0_i32, %c0_i32_0 : i32, i32, i32
  }
  func.func @transform_1(%arg0: i32, %arg1: i32) -> (i32, i32) {
    %c0_i32 = arith.constant 0 : i32
    %c0_i32_0 = arith.constant 0 : i32
    %c0_i32_1 = arith.constant 0 : i32
    return %c0_i32, %c0_i32_0 : i32, i32
  }
  func.func @transform_2(%arg0: i32, %arg1: i32) -> (i32, i32) {
    %c0_i32 = arith.constant 0 : i32
    %c0_i32_0 = arith.constant 0 : i32
    %c0_i32_1 = arith.constant 0 : i32
    return %c0_i32, %c0_i32_0 : i32, i32
  }
  func.func @transform_3(%arg0: i32, %arg1: i32) -> (i32, i32) {
    %c0_i32 = arith.constant 0 : i32
    %c0_i32_0 = arith.constant 0 : i32
    %c0_i32_1 = arith.constant 0 : i32
    return %c0_i32, %c0_i32_0 : i32, i32
  }
  func.func @transform_4(%arg0: i32, %arg1: i32) -> (i32, i32, i32) {
    %c0_i32 = arith.constant 0 : i32
    %c0_i32_0 = arith.constant 0 : i32
    return %arg0, %c0_i32, %arg1 : i32, i32, i32
  }
}

</mosaic_0001>

<bundles_post_ra>
// kernel: facenet_forward.3
= control target key start
LH: loop header
LB: loop body
LE: loop exit
PB: predicated region body
PF: predicated region fallthrough
CT: control target
= control target key end

     0   :  { %9 = vsyncpa [#allocation3], 0  ;;  %s942_s15 = smov 0   ;;  %s944_s16 = smov 0   ;;  %s1144_s0 = inlined_call_operand.vmem [shape: f32[2,3,290], index: 0, kind: input, shape index: {}]   ;;  %s1145_s1 = inlined_call_operand.hbm [shape: bf16[32,32], index: 1, kind: input, shape index: {}]   ;;  %s1146_s2 = inlined_call_operand.vmem [shape: f32[32,1], index: 2, kind: input, shape index: {}]   ;;  %s1147_s3 = inlined_call_operand.vmem [shape: f32[32,1], index: 3, kind: input, shape index: {}]   ;;  %s1148_s4 = inlined_call_operand.vmem [shape: bf16[2,32,256], index: 4, kind: output, shape index: {}]  }
   0x1   :  { %s946_s17 = smov 0   ;;  %s948_s18 = smov 0  }
   0x2   :  { %s950_s19 = smov 0   ;;  %s952_s20 = smov 0  }
   0x3   :  { %s954_s21 = smov 0  }
   0x4 LB: > { %s636_s22 = sadd.s32 4294967295, %s902_s21   ;;  %s24_s23 = sadd.s32 1, %s894_s19  ;;  %s902_s21 = sphi %s954_s21, %s15_s21   ;;  %s898_s20 = sphi %s952_s20, %s1168_s20   ;;  %s894_s19 = sphi %s950_s19, %s1167_s19   ;;  %s890_s18 = sphi %s948_s18, %s1166_s18   ;;  %s886_s17 = sphi %s946_s17, %s1165_s17   ;;  %s882_s16 = sphi %s944_s16, %s1164_s16   ;;  %s878_s15 = sphi %s942_s15, %s1163_s15  }
   0x5   : > { %p25_p0 = scmp.ge.s32.totalorder %s24_s23, 2  ;;  %s27_s24 = sadd.s32 1, %s898_s20 }
   0x6   : > { %s125_s25 = sadd.s32 1, %s882_s16  ;;  %p135_p1 = scmp.ne.s32.totalorder %s882_s16, %s878_s15 }
   0x7   : > { %s1170_s23 = smov (%p25_p0, %s24_s23), 0  ;;  %s1172_s24 = smov (!%p25_p0, %s27_s24), %s898_s20 }
   0x8   : > { %s121_s26 = ssub.s32 %s894_s19, %s1170_s23  ;;  %p136_p2 = scmp.eq.s32.totalorder %s636_s22, 3 }
   0x9   : > { %p29_p3 = scmp.ge.s32.totalorder %s1172_s24, 2  ;;  %p638_p4 = scmp.ge.s32.totalorder %s902_s21, 1 }
   0xa   : > { %p989_p5 = por %p136_p2, %p135_p1  ;;  %p149_p6 = scmp.lt.s32.totalorder %s902_s21, 5 }
   0xb   : > { %s1174_s24 = smov (%p29_p3, %s1172_s24), 0  ;;  %p1002_p8 = scmp.eq.s32.totalorder %s636_s22, 0 }
   0xc   : > { %s1152_s27 = scalar_select %p989_p5, 1, 0 }
   0xd   : > { %p996_p7 = pnand %p638_p4, %p149_p6  ;;  %s120_s29 = ssub.s32 %s898_s20, %s1174_s24 }
   0xe   : > { %s1154_s30 = scalar_select %p1002_p8, 1, 0 }
   0xf   : > { %s1153_s28 = scalar_select %p996_p7, 1, 0 }
  0x10   : > { %s122_s5 = sor.u32 %s121_s26, %s120_s29  ;;  %p695_p9 = pneg %p996_p7 }
  0x11   : > { %p123_p10 = scmp.eq.s32.totalorder %s122_s5, 0  ;;  %s904_s6 = smov [#allocation2]  }
  0x12   : > { %s161_s7 = sshll.u32 %s904_s6, 4  ;;  %p1010_p11 = pnand %p1002_p8, %p695_p9  ;;  %s162_s7 = int_to_ptr.vmem [resolvable:$true] %s161_s7 }
  0x13   : > { %s1015_s9 = scalar_select %p123_p10, %s882_s16, %s125_s25  }
  0x14   : > { %s816_s12 = scalar_lea.hbm %s1145_s1, 256  ;;  %p818_p13 = pneg %p1010_p11 }
  0x15   : > { %p817_p12 = scmp.ne.s32.totalorder %s1145_s1, %s816_s12  ;;  %p823_p2 = scmp.lt.u32.totalorder %s816_s12, %s1145_s1 }
  0x17   : > { %p819_p0 = pnand %p818_p13, %p817_p12 }
  0x19   : > { %p820_p1 = pneg %p819_p0 }
  0x1b   : > { %p825_p3 = pnand %p823_p2, %p820_p1 }
  0x1d   : > { %828 = shalt.err (!%p825_p3)
}
  0x1e   : > { %s829_s25 = scalar_lea.vmem %s162_s7, 256  ;;  %p837_p10 = scmp.lt.s32.totalorder %s162_s7, %s162_s7 }
  0x1f   : > { %p830_p4 = scmp.ne.s32.totalorder %s162_s7, %s829_s25  ;;  %p838_p5 = scmp.lt.s32.totalorder %s829_s25, %s829_s25 }
  0x21   : > { %p832_p6 = pnand %p830_p4, %p818_p13  ;;  %p839_p8 = por %p838_p5, %p837_p10 }
  0x23   : > { %p833_p9 = pneg %p832_p6 }
  0x25   : > { %p840_p7 = pnand %p839_p8, %p833_p9 }
  0x27   : > { %843 = shalt.err (!%p840_p7)
}
  0x28   : > { %s905_s29 = smov 64   ;;  %s906_s5 = smov 4  }
  0x29   : > { %698 = dma.hbm_to_vmem [thread:$0]  (!%p1010_p11), %s1145_s1, 256, %s162_s7, [#allocation3], %s905_s29, %s905_s29, %s906_s5  }
  0x2a   : > { %p1156_p12 = scmp.ne.s32.totalorder %s1153_s28, 0 }
  0x2b   : > { %p1157_p0 = scmp.ne.s32.totalorder (!%p1156_p12), %s1154_s30, 0 }
  0x2c   : > { %191 = sbr.rel (%p1156_p12) target bundleno = 436 (0x1b4), region = 36 }
  0x33   : > { %873 = dma.done.wait (%p1157_p0), [#allocation3], 256  }
  0x34   : > { %875 = vsyncadd (%p1157_p0), [#allocation3], 4294967040  ;;  %p216_p5 = scmp.lt.s32.totalorder %s890_s18, 1  ;;  %s645_s11 = sshll.u32 %s886_s17, 7  ;;  %v814_v11 = vld [vmem:[#allocation2] sm:$0xff]   ;;  %vm384_vm0 = vcmask 261120   ;;  %v228_v21 = vlaneseq }
  0x35   : > { %s223_s12 = sshra.s32 %s645_s11, 7  ;;  %s907_s30 = smov 110   ;;  %686 = vmatprep.mubr.msk.bf16.mxu0 %vm384_vm0, %v814_v11  ;;  %v915_v12 = vmov 0   ;;  %v350_v13 = vld [vmem:[%s1146_s2] sm:$0xff]  ;;  %v351_v14 = vld [vmem:[%s1146_s2 + $0x8] sm:$0xff]  ;;  %v353_v15 = vld [vmem:[%s1146_s2 + $0x18] sm:$0xff] }
  0x36   : > { %s217_s8 = scalar_select %p216_p5, %s890_s18, 1  ;;  %811 = vset.pattern.permute.xlu1 %v915_v12  ;;  %810 = vset.pattern.permute.xlu0 %v915_v12  ;;  %v352_v16 = vld [vmem:[%s1146_s2 + $0x10] sm:$0xff]  ;;  %v445_v17 = vld [vmem:[%s1147_s3 + $0x8] sm:$0xff]  ;;  %v444_v18 = vld [vmem:[%s1147_s3] sm:$0xff]  ;;  %v229_v22 = vand.u32 127, %v228_v21  ;;  %vm271_vm1 = vcmask 900096  }
  0x37   : > { %s646_s14 = sshll.u32 %s223_s12, 2  ;;  %s908_s25 = smov 126   ;;  %v447_v19 = vld [vmem:[%s1147_s3 + $0x18] sm:$0xff]  ;;  %v446_v20 = vld [vmem:[%s1147_s3 + $0x10] sm:$0xff]  ;;  %vm255_vm2 = vcmask 1031168   ;;  %vm263_vm5 = vcmask 916480  }
  0x38   : > { %s690_s13 = smul.u32 12, %s217_s8  ;;  %s909_s29 = smov 112   ;;  %v234_v23 = vand.u32 15, %v229_v22  ;;  %vm297_vm6 = vcmask 1039360   ;;  %vm329_vm7 = vcmask 1042432   ;;  %vm311_vm8 = vcmask 908288  }
  0x39   : > { %s910_s5 = smov 127   ;;  %s911_s6 = smov 111   ;;  %vm279_vm9 = vcmask 785408   ;;  %vm331_vm10 = vcmask 1045504   ;;  %vm287_vm11 = vcmask 769024   ;;  %vm333_vm12 = vcmask 1040384  }
  0x3a   : > { %s220_s28 = scalar_lea.vmem %s1144_s0, %s690_s13  ;;  %s912_s10 = smov 96   ;;  %vm1080_vm3 = vcmp.eq.s32.totalorder %v234_v23, 15  ;;  %vm1084_vm4 = vcmp.eq.s32.totalorder %v234_v23, 0  ;;  %vm335_vm13 = vcmask 1043456   ;;  %vm326_vm14 = vcmask 777216  }
  0x3b   : > { %s226_s26 = scalar_lea.vmem %s220_s28, %s646_s14  ;;  %s913_s11 = smov 94   ;;  %vm337_vm15 = vcmask 1046528  }
  0x3c   : > { %v1045_v0 = vld [vmem:[%s226_s26] sm:$0x77]  ;;  %s914_s12 = smov 95   ;;  %s213_s13 = sand.u32 1, %s878_s15  }
  0x3d   : > { %v250_v1 = vcombine.high %v1045_v0, %v1045_v0  ;;  %v291_v2 = vrot.slane %v1045_v0, 5  ;;  %v306_v6 = vcombine.low %v1045_v0, %v1045_v0  ;;  %v320_v8 = vrot.slane %v1045_v0, 3  ;;  %s643_s14 = sshll.u32 %s213_s13, 4  ;;  %p1162_p7 = scmp.ne.s32.totalorder %s1152_s27, 0 }
  0x3e   : > { %v245_v41 = vsel %vm1084_vm4, 0.0, %v1045_v0  ;;  %s215_s15 = scalar_lea.vmem [#allocation4], %s643_s14  ;;  %s659_s22 = sshll.u32 (%p1162_p7), %s890_s18, 3 }
  0x3f   : > { %v780_v3 = vpack.i.bf16 %v250_v1, %v1045_v0  ;;  %v292_v4 = vrot.slane %v250_v1, 5  ;;  %v785_v7 = vpack.i.bf16 %v1045_v0, %v306_v6  ;;  %v321_v9 = vrot.slane %v250_v1, 3  ;;  %s504_s7 = sadd.s32 (%p1162_p7), %s886_s17, %s659_s22 }
  0x40   : > { %s660_s28 = sshll.u32 (%p1162_p7), %s504_s7, 2 }
  0x41   : > { %781 = vrot.lane.b32.xlu1 %v780_v3, %s907_s30  ;;  %771 = vrot.lane.b32.xlu0 %v780_v3, %s908_s25  ;;  %v790_v5 = vpack.i.bf16 %v292_v4, %v291_v2  ;;  %v805_v10 = vpack.i.bf16 %v321_v9, %v320_v8  ;;  %s506_s25 = scalar_lea.vmem (%p1162_p7), %s1148_s4, %s660_s28 }
  0x45   : > { %776 = vrot.lane.b32.xlu0 %v780_v3, %s909_s29  ;;  %791 = vrot.lane.b32.xlu1 %v790_v5, %s910_s5 }
  0x49   : > { %786 = vrot.lane.b32.xlu0 %v785_v7, %s911_s6  ;;  %796 = vrot.lane.b32.xlu1 %v780_v3, %s912_s10 }
  0x4d   : > { %801 = vrot.lane.b32.xlu0 %v780_v3, %s913_s11  ;;  %806 = vrot.lane.b32.xlu1 %v805_v10, %s914_s12 }
  0x51   : > { %356 = vperm.xlu0 %810, %v350_v13   ;;  %361 = vperm.xlu1 %811, %v351_v14   ;;  %v815_v13 = vld [vmem:[#allocation2 + $0x8] sm:$0xff]  }
  0x55   : > { %371 = vperm.xlu0 %810, %v353_v15   ;;  %366 = vperm.xlu1 %811, %v352_v16  }
  0x59   : > { %455 = vperm.xlu0 %810, %v445_v17   ;;  %450 = vperm.xlu1 %811, %v444_v18  }
  0x5d   : > { %465 = vperm.xlu0 %810, %v447_v19   ;;  %460 = vperm.xlu1 %811, %v446_v20  }
  0xb3   : > { %v782_v24 = vpop.permute.xlu1 %781  ;;  %v772_v25 = vpop.permute.xlu0 %771 }
  0xb4   : > { %v784_v27 = vunpack.i.h.bf16 %v782_v24  ;;  %v783_v28 = vunpack.i.l.bf16 %v782_v24  ;;  %v774_v29 = vunpack.i.h.bf16 %v772_v25  ;;  %v773_v30 = vunpack.i.l.bf16 %v772_v25 }
  0xb6   : > { %v256_v31 = vsel %vm255_vm2, %v773_v30, %v774_v29  ;;  %v272_v33 = vsel %vm271_vm1, %v783_v28, %v784_v27  ;;  %vm339_vm1 = vcmask 1041408   ;;  %vm341_vm2 = vcmask 1044480  }
  0xb7   : > { %v777_v34 = vpop.permute.xlu0 %776  ;;  %v792_v35 = vpop.permute.xlu1 %791  ;;  %v258_v36 = vsel %vm1080_vm3, 0.0, %v256_v31  ;;  %v274_v47 = vsel %vm1080_vm3, 0.0, %v272_v33 }
  0xb8   : > { %v779_v37 = vunpack.i.h.bf16 %v777_v34  ;;  %v778_v38 = vunpack.i.l.bf16 %v777_v34  ;;  %v794_v39 = vunpack.i.h.bf16 %v792_v35  ;;  %v793_v40 = vunpack.i.l.bf16 %v792_v35 }
  0xb9   : > { %v301_v48 = vrot.slane %v258_v36, 2  ;;  %v315_v60 = vrot.slane %v274_v47, 1 }
  0xba   : > { %v264_v42 = vsel %vm263_vm5, %v778_v38, %v779_v37  ;;  %v298_v44 = vsel %vm297_vm6, %v793_v40, %v794_v39 }
  0xbb   : > { %v266_v43 = vsel %vm1084_vm4, 0.0, %v264_v42  ;;  %v787_v45 = vpop.permute.xlu0 %786  ;;  %v797_v46 = vpop.permute.xlu1 %796  ;;  %v330_v55 = vsel %vm329_vm7, %v245_v41, %v298_v44 }
  0xbc   : > { %v304_v49 = vrot.slane %v266_v43, 7  ;;  %v789_v50 = vunpack.i.h.bf16 %v787_v45  ;;  %v788_v51 = vunpack.i.l.bf16 %v787_v45  ;;  %v799_v52 = vunpack.i.h.bf16 %v797_v46 }
  0xbd   : > { %v798_v53 = vunpack.i.l.bf16 %v797_v46  ;;  %v332_v4 = vsel %vm331_vm10, %v330_v55, %v301_v48 }
  0xbe   : > { %v312_v54 = vsel %vm311_vm8, %v788_v51, %v789_v50  ;;  %v334_v56 = vsel %vm333_vm12, %v301_v48, %v304_v49 }
  0xbf   : > { %v280_v57 = vsel %vm279_vm9, %v798_v53, %v799_v52  ;;  %v802_v58 = vpop.permute.xlu0 %801  ;;  %v807_v59 = vpop.permute.xlu1 %806  ;;  %v336_v61 = vsel %vm335_vm13, %v334_v56, %v312_v54 }
  0xc0   : > { %v282_v62 = vsel %vm1084_vm4, 0.0, %v280_v57  ;;  %v804_v63 = vunpack.i.h.bf16 %v802_v58  ;;  %v803_v0 = vunpack.i.l.bf16 %v802_v58  ;;  %v809_v1 = vunpack.i.h.bf16 %v807_v59 }
  0xc1   : > { %v318_v2 = vrot.slane %v282_v62, 6  ;;  %v808_v3 = vunpack.i.l.bf16 %v807_v59  ;;  %v338_v5 = vsel %vm337_vm15, %v336_v61, %v315_v60  ;;  %vm916_vm4 = vmmov 1  }
  0xc2   : > { %v288_v6 = vsel %vm287_vm11, %v803_v0, %v804_v63  ;;  %v344_v7 = vpack.c.bf16 %v338_v5, %v332_v4  ;;  %vm649_vm5 = vmpackc.low %vm329_vm7, %vm916_vm4 }
  0xc3   : > { %v290_v8 = vsel %vm1080_vm3, 0.0, %v288_v6  ;;  %v327_v9 = vsel %vm326_vm14, %v808_v3, %v809_v1  ;;  %v340_v10 = vsel %vm339_vm1, %v315_v60, %v318_v2 }
  0xc4   : > { %682 = vmatprep.subr.bf16.mxu0 %v344_v7  ;;  %v342_v11 = vsel %vm341_vm2, %v340_v10, %v327_v9 }
  0xc5   : > { %683 = vmatpush3.bf16.msra.mxu0 %v344_v7  ;;  %v650_v12 = vpack.c.bf16 %v290_v8, %v342_v11 }
  0xc7   : > { %684 = vmatprep.subr.msk.bf16.mxu0 %vm649_vm5, %v650_v12 }
  0xc9   : > { %685 = vmatpush3.bf16.msk.msra.mxu0 %vm649_vm5, %v650_v12 }
  0xcc   : > { %687 = vmatmul.mubr.msk.bf16.vlgmr.msra.gmra.mrb[0].mxu0 %vm384_vm0, %v815_v13 }
  0xd0   : > { %v362_v14 = vpop.permute.xlu1 %361  ;;  %v357_v15 = vpop.permute.xlu0 %356 }
  0xd4   : > { %v367_v16 = vpop.permute.xlu1 %366  ;;  %v372_v17 = vpop.permute.xlu0 %371 }
  0xd8   : > { %v451_v18 = vpop.permute.xlu1 %450  ;;  %v456_v19 = vpop.permute.xlu0 %455 }
  0xdc   : > { %v461_v23 = vpop.permute.xlu1 %460  ;;  %v466_v29 = vpop.permute.xlu0 %465 }
 0x19f   : > { %v688_v20 = vpop.f32.mrb[0].mxu0 }
 0x1a0   : > { %v434_v21 = vadd.f32 %v688_v20, %v367_v16  ;;  %v425_v22 = vpop.f32.mrb[1].mxu0 }
 0x1a1   : > { %v426_v24 = vadd.f32 %v425_v22, %v357_v15  ;;  %v689_v25 = vpop.f32.mrb[2].mxu0 }
 0x1a2   : > { %v470_v26 = vmul.f32 %v461_v23, %v434_v21  ;;  %v437_v27 = vadd.f32 %v689_v25, %v372_v17  ;;  %v428_v28 = vpop.f32.mrb[3].mxu0  ;;  %vm442_vm3 = vcmp.gt.f32.partialorder %v434_v21, 0.0 }
 0x1a3   : > { %v468_v30 = vmul.f32 %v451_v18, %v426_v24  ;;  %v429_v31 = vadd.f32 %v428_v28, %v362_v14  ;;  %vm440_vm0 = vcmp.gt.f32.partialorder %v426_v24, 0.0 }
 0x1a4   : > { %vm443_vm6 = vcmp.gt.f32.partialorder %v437_v27, 0.0  ;;  %v471_v32 = vmul.f32 %v466_v29, %v437_v27  ;;  %v474_v34 = vsel %vm442_vm3, %v434_v21, %v470_v26  ;;  %502 = sbr.rel (!%p1162_p7) target bundleno = 436 (0x1b4), region = 44 }
 0x1a5   : > { %vm441_vm7 = vcmp.gt.f32.partialorder %v429_v31, 0.0  ;;  %v469_v33 = vmul.f32 %v456_v19, %v429_v31  ;;  %v472_v36 = vsel %vm440_vm0, %v426_v24, %v468_v30 }
 0x1a6   : > { %v475_v35 = vsel %vm443_vm6, %v437_v27, %v471_v32 }
 0x1a7   : > { %v675_v37 = vpack.c.bf16 %v475_v35, %v474_v34  ;;  %v473_v38 = vsel %vm441_vm7, %v429_v31, %v469_v33 }
 0x1a8   : > { %v670_v39 = vpack.c.bf16 %v473_v38, %v472_v36 }
 0x1a9   : > { %677 = vst [vmem:[%s215_s15 + $0x8] sm:$0xff] %v675_v37  }
 0x1aa   : > { %671 = vst [vmem:[%s215_s15] sm:$0xff] %v670_v39  }
 0x1b0   : > { %v526_v42 = vld [vmem:[%s215_s15 + $0x8] sm:$0xf]  ;;  %v528_v43 = vld [vmem:[%s215_s15 + $0xc] sm:$0xf] }
 0x1b1   : > { %v522_v40 = vld [vmem:[%s215_s15] sm:$0xf]  ;;  %v524_v41 = vld [vmem:[%s215_s15 + $0x4] sm:$0xf]  ;;  %527 = vst [vmem:[%s506_s25 + $0x10] sm:$0xf] %v526_v42 }
 0x1b2   : > { %523 = vst [vmem:[%s506_s25] sm:$0xf] %v522_v40  ;;  %525 = vst [vmem:[%s506_s25 + $0x8] sm:$0xf] %v524_v41 }
 0x1b3   : > { %529 = vst [vmem:[%s506_s25 + $0x18] sm:$0xf] %v528_v43 }
 0x1b4 PF: > { %s15_s21 = sadd.s32 1, %s902_s21   ;;  %s1163_s15 = smov %s882_s16 }
 0x1b5   : > { %p12_p8 = scmp.ge.s32.totalorder %s15_s21, 6   ;;  %s1164_s16 = smov %s1015_s9 }
 0x1b6   : > { %s1165_s17 = smov %s894_s19  ;;  %s1166_s18 = smov %s898_s20 }
 0x1b7   : > { %s1167_s19 = smov %s1170_s23  ;;  %s1168_s20 = smov %s1174_s24 }
 0x1b8   :  { %14 = sbr.rel (!%p12_p8) target bundleno = 4 (0x4), region = 113 }
 0x1bf   :  { %570 = vsyncpa [#allocation3], 1 }
 0x1c0   :  { %572 = vsyncpa [#allocation3 + $0x1], 1 }

// kernel: facenet_forward.5
= control target key start
LH: loop header
LB: loop body
LE: loop exit
PB: predicated region body
PF: predicated region fallthrough
CT: control target
= control target key end

     0   :  { %8 = vsyncpa [#allocation4], 0  ;;  %s2570_s0 = inlined_call_operand.vmem [shape: f32[2,512], index: 0, kind: input, shape index: {}]   ;;  %s2571_s1 = inlined_call_operand.vmem [shape: bf16[512,1024], index: 1, kind: input, shape index: {}]   ;;  %s2572_s2 = inlined_call_operand.vmem [shape: f32[1,1024], index: 2, kind: input, shape index: {}]   ;;  %s2573_s3 = inlined_call_operand.hbm [shape: f32[2,1024], index: 3, kind: output, shape index: {}]  }
   0x1   :  { %10 = vsyncpa [#allocation4 + $0x1], 0  ;;  %s2033_s12 = smov 0   ;;  %s2035_s13 = smov 0  }
   0x2   :  { %s2037_s14 = smov 0   ;;  %s2039_s15 = smov 0  }
   0x3 LB: > { %s2054_s16 = sadd.s32 4294967295, %s2009_s15   ;;  %s1557_s17 = sadd.s32 4294967294, %s2009_s15   ;;  %s2009_s15 = sphi %s2039_s15, %s2579_s15   ;;  %s2005_s14 = sphi %s2037_s14, %s2578_s14   ;;  %s2001_s13 = sphi %s2035_s13, %s2577_s13   ;;  %s1997_s12 = sphi %s2033_s12, %s2576_s12  }
   0x4   : > { %s2058_s18 = sadd.s32 1, %s2009_s15   ;;  %s44_s19 = sadd.s32 1, %s2005_s14 }
   0x5   : > { %s41_s20 = ssub.s32 %s2009_s15, %s2058_s18  ;;  %p51_p0 = scmp.ne.s32.totalorder %s2005_s14, %s2001_s13 }
   0x6   : > { %p42_p1 = scmp.eq.s32.totalorder %s41_s20, 0  ;;  %p52_p2 = scmp.eq.s32.totalorder %s2009_s15, 0 }
   0x7   : > { %p107_p3 = scmp.eq.s32.totalorder %s2054_s16, 1  ;;  %p112_p4 = scmp.ne.s32.totalorder %s2001_s13, %s1997_s12 }
   0x8   : > { %s2070_s21 = scalar_select %p42_p1, %s2005_s14, %s44_s19  }
   0x9   : > { %p53_p5 = por %p52_p2, %p51_p0  ;;  %p2072_p6 = por %p107_p3, %p51_p0 }
   0xa   : > { %p113_p7 = scmp.eq.s32.totalorder %s1557_s17, 1  ;;  %p1559_p9 = scmp.ge.s32.totalorder %s2009_s15, 2 }
   0xc   : > { %p2076_p8 = por %p113_p7, %p112_p4  ;;  %132 = sbr.rel (%p1559_p9) target bundleno = 87 (0x57), region = 20 }
  0x13   : > { %135 = sbr.rel (!%p53_p5) target bundleno = 87 (0x57), region = 24  ;;  %s137_s24 = sand.u32 (%p53_p5), 1, %s2005_s14  }
  0x14   : > { %s1700_s25 = sshll.u32 (%p53_p5), %s2009_s15, 4  ;;  %s1560_s26 = sshll.u32 (%p53_p5), %s137_s24, 10 }
  0x15   : > { %s2088_s29 = scalar_lea.vmem (%p53_p5), %s2571_s1, %s1700_s25  ;;  %s2093_s30 = scalar_lea.vmem (%p53_p5), [#allocation2], %s1560_s26 }
  0x16   : > { %v155_v0 = vld [vmem:[%s2088_s29] sm:$0xff] (%p53_p5)  ;;  %v157_v1 = vld [vmem:[%s2088_s29 + $0x8] sm:$0xff] (%p53_p5) }
  0x17   : > { %v159_v2 = vld [vmem:[%s2088_s29 + $0x20] sm:$0xff] (%p53_p5)  ;;  %156 = vst [vmem:[%s2093_s30] sm:$0xff] (%p53_p5), %v155_v0  ;;  %158 = vst [vmem:[%s2093_s30 + $0x8] sm:$0xff] (%p53_p5), %v157_v1  ;;  %v161_v3 = vld [vmem:[%s2088_s29 + $0x28] sm:$0xff] (%p53_p5) }
  0x18   : > { %160 = vst [vmem:[%s2093_s30 + $0x10] sm:$0xff] (%p53_p5), %v159_v2  ;;  %v163_v4 = vld [vmem:[%s2088_s29 + $0x40] sm:$0xff] (%p53_p5)  ;;  %v165_v5 = vld [vmem:[%s2088_s29 + $0x48] sm:$0xff] (%p53_p5)  ;;  %162 = vst [vmem:[%s2093_s30 + $0x18] sm:$0xff] (%p53_p5), %v161_v3 }
  0x19   : > { %164 = vst [vmem:[%s2093_s30 + $0x20] sm:$0xff] (%p53_p5), %v163_v4  ;;  %166 = vst [vmem:[%s2093_s30 + $0x28] sm:$0xff] (%p53_p5), %v165_v5  ;;  %v167_v6 = vld [vmem:[%s2088_s29 + $0x60] sm:$0xff] (%p53_p5)  ;;  %v169_v7 = vld [vmem:[%s2088_s29 + $0x68] sm:$0xff] (%p53_p5) }
  0x1a   : > { %v171_v8 = vld [vmem:[%s2088_s29 + $0x80] sm:$0xff]  ;;  %168 = vst [vmem:[%s2093_s30 + $0x30] sm:$0xff] %v167_v6  ;;  %170 = vst [vmem:[%s2093_s30 + $0x38] sm:$0xff] %v169_v7  ;;  %v173_v9 = vld [vmem:[%s2088_s29 + $0x88] sm:$0xff] }
  0x1b   : > { %172 = vst [vmem:[%s2093_s30 + $0x40] sm:$0xff] %v171_v8  ;;  %v175_v10 = vld [vmem:[%s2088_s29 + $0xa0] sm:$0xff]  ;;  %v177_v11 = vld [vmem:[%s2088_s29 + $0xa8] sm:$0xff]  ;;  %174 = vst [vmem:[%s2093_s30 + $0x48] sm:$0xff] %v173_v9 }
  0x1c   : > { %176 = vst [vmem:[%s2093_s30 + $0x50] sm:$0xff] %v175_v10  ;;  %178 = vst [vmem:[%s2093_s30 + $0x58] sm:$0xff] %v177_v11  ;;  %v179_v12 = vld [vmem:[%s2088_s29 + $0xc0] sm:$0xff]  ;;  %v181_v13 = vld [vmem:[%s2088_s29 + $0xc8] sm:$0xff] }
  0x1d   : > { %v183_v14 = vld [vmem:[%s2088_s29 + $0xe0] sm:$0xff]  ;;  %180 = vst [vmem:[%s2093_s30 + $0x60] sm:$0xff] %v179_v12  ;;  %182 = vst [vmem:[%s2093_s30 + $0x68] sm:$0xff] %v181_v13  ;;  %v185_v15 = vld [vmem:[%s2088_s29 + $0xe8] sm:$0xff] }
  0x1e   : > { %184 = vst [vmem:[%s2093_s30 + $0x70] sm:$0xff] %v183_v14  ;;  %v187_v16 = vld [vmem:[%s2088_s29 + $0x100] sm:$0xff]  ;;  %v189_v17 = vld [vmem:[%s2088_s29 + $0x108] sm:$0xff]  ;;  %186 = vst [vmem:[%s2093_s30 + $0x78] sm:$0xff] %v185_v15 }
  0x1f   : > { %188 = vst [vmem:[%s2093_s30 + $0x80] sm:$0xff] %v187_v16  ;;  %190 = vst [vmem:[%s2093_s30 + $0x88] sm:$0xff] %v189_v17  ;;  %v191_v18 = vld [vmem:[%s2088_s29 + $0x120] sm:$0xff]  ;;  %v193_v19 = vld [vmem:[%s2088_s29 + $0x128] sm:$0xff] }
  0x20   : > { %v195_v20 = vld [vmem:[%s2088_s29 + $0x140] sm:$0xff]  ;;  %192 = vst [vmem:[%s2093_s30 + $0x90] sm:$0xff] %v191_v18  ;;  %194 = vst [vmem:[%s2093_s30 + $0x98] sm:$0xff] %v193_v19  ;;  %v197_v21 = vld [vmem:[%s2088_s29 + $0x148] sm:$0xff] }
  0x21   : > { %196 = vst [vmem:[%s2093_s30 + $0xa0] sm:$0xff] %v195_v20  ;;  %v199_v22 = vld [vmem:[%s2088_s29 + $0x160] sm:$0xff]  ;;  %v201_v23 = vld [vmem:[%s2088_s29 + $0x168] sm:$0xff]  ;;  %198 = vst [vmem:[%s2093_s30 + $0xa8] sm:$0xff] %v197_v21 }
  0x22   : > { %200 = vst [vmem:[%s2093_s30 + $0xb0] sm:$0xff] %v199_v22  ;;  %202 = vst [vmem:[%s2093_s30 + $0xb8] sm:$0xff] %v201_v23  ;;  %v203_v24 = vld [vmem:[%s2088_s29 + $0x180] sm:$0xff]  ;;  %v205_v25 = vld [vmem:[%s2088_s29 + $0x188] sm:$0xff] }
  0x23   : > { %v207_v26 = vld [vmem:[%s2088_s29 + $0x1a0] sm:$0xff]  ;;  %204 = vst [vmem:[%s2093_s30 + $0xc0] sm:$0xff] %v203_v24  ;;  %206 = vst [vmem:[%s2093_s30 + $0xc8] sm:$0xff] %v205_v25  ;;  %v209_v27 = vld [vmem:[%s2088_s29 + $0x1a8] sm:$0xff] }
  0x24   : > { %208 = vst [vmem:[%s2093_s30 + $0xd0] sm:$0xff] %v207_v26  ;;  %v211_v28 = vld [vmem:[%s2088_s29 + $0x1c0] sm:$0xff]  ;;  %v213_v29 = vld [vmem:[%s2088_s29 + $0x1c8] sm:$0xff]  ;;  %210 = vst [vmem:[%s2093_s30 + $0xd8] sm:$0xff] %v209_v27 }
  0x25   : > { %212 = vst [vmem:[%s2093_s30 + $0xe0] sm:$0xff] %v211_v28  ;;  %214 = vst [vmem:[%s2093_s30 + $0xe8] sm:$0xff] %v213_v29  ;;  %v215_v30 = vld [vmem:[%s2088_s29 + $0x1e0] sm:$0xff]  ;;  %v217_v31 = vld [vmem:[%s2088_s29 + $0x1e8] sm:$0xff] }
  0x26   : > { %v219_v32 = vld [vmem:[%s2088_s29 + $0x200] sm:$0xff]  ;;  %216 = vst [vmem:[%s2093_s30 + $0xf0] sm:$0xff] %v215_v30  ;;  %218 = vst [vmem:[%s2093_s30 + $0xf8] sm:$0xff] %v217_v31  ;;  %v221_v33 = vld [vmem:[%s2088_s29 + $0x208] sm:$0xff] }
  0x27   : > { %220 = vst [vmem:[%s2093_s30 + $0x100] sm:$0xff] %v219_v32  ;;  %v223_v34 = vld [vmem:[%s2088_s29 + $0x220] sm:$0xff]  ;;  %v225_v35 = vld [vmem:[%s2088_s29 + $0x228] sm:$0xff]  ;;  %222 = vst [vmem:[%s2093_s30 + $0x108] sm:$0xff] %v221_v33 }
  0x28   : > { %224 = vst [vmem:[%s2093_s30 + $0x110] sm:$0xff] %v223_v34  ;;  %226 = vst [vmem:[%s2093_s30 + $0x118] sm:$0xff] %v225_v35  ;;  %v227_v36 = vld [vmem:[%s2088_s29 + $0x240] sm:$0xff]  ;;  %v229_v37 = vld [vmem:[%s2088_s29 + $0x248] sm:$0xff] }
  0x29   : > { %v231_v38 = vld [vmem:[%s2088_s29 + $0x260] sm:$0xff]  ;;  %228 = vst [vmem:[%s2093_s30 + $0x120] sm:$0xff] %v227_v36  ;;  %230 = vst [vmem:[%s2093_s30 + $0x128] sm:$0xff] %v229_v37  ;;  %v233_v39 = vld [vmem:[%s2088_s29 + $0x268] sm:$0xff] }
  0x2a   : > { %232 = vst [vmem:[%s2093_s30 + $0x130] sm:$0xff] %v231_v38  ;;  %v235_v40 = vld [vmem:[%s2088_s29 + $0x280] sm:$0xff]  ;;  %v237_v41 = vld [vmem:[%s2088_s29 + $0x288] sm:$0xff]  ;;  %234 = vst [vmem:[%s2093_s30 + $0x138] sm:$0xff] %v233_v39 }
  0x2b   : > { %236 = vst [vmem:[%s2093_s30 + $0x140] sm:$0xff] %v235_v40  ;;  %238 = vst [vmem:[%s2093_s30 + $0x148] sm:$0xff] %v237_v41  ;;  %v239_v42 = vld [vmem:[%s2088_s29 + $0x2a0] sm:$0xff]  ;;  %v241_v43 = vld [vmem:[%s2088_s29 + $0x2a8] sm:$0xff] }
  0x2c   : > { %v243_v44 = vld [vmem:[%s2088_s29 + $0x2c0] sm:$0xff]  ;;  %240 = vst [vmem:[%s2093_s30 + $0x150] sm:$0xff] %v239_v42  ;;  %242 = vst [vmem:[%s2093_s30 + $0x158] sm:$0xff] %v241_v43  ;;  %v245_v45 = vld [vmem:[%s2088_s29 + $0x2c8] sm:$0xff] }
  0x2d   : > { %244 = vst [vmem:[%s2093_s30 + $0x160] sm:$0xff] %v243_v44  ;;  %v247_v46 = vld [vmem:[%s2088_s29 + $0x2e0] sm:$0xff]  ;;  %v249_v47 = vld [vmem:[%s2088_s29 + $0x2e8] sm:$0xff]  ;;  %246 = vst [vmem:[%s2093_s30 + $0x168] sm:$0xff] %v245_v45 }
  0x2e   : > { %248 = vst [vmem:[%s2093_s30 + $0x170] sm:$0xff] %v247_v46  ;;  %250 = vst [vmem:[%s2093_s30 + $0x178] sm:$0xff] %v249_v47  ;;  %v251_v48 = vld [vmem:[%s2088_s29 + $0x300] sm:$0xff]  ;;  %v253_v49 = vld [vmem:[%s2088_s29 + $0x308] sm:$0xff] }
  0x2f   : > { %v255_v50 = vld [vmem:[%s2088_s29 + $0x320] sm:$0xff]  ;;  %252 = vst [vmem:[%s2093_s30 + $0x180] sm:$0xff] %v251_v48  ;;  %254 = vst [vmem:[%s2093_s30 + $0x188] sm:$0xff] %v253_v49  ;;  %v257_v51 = vld [vmem:[%s2088_s29 + $0x328] sm:$0xff] }
  0x30   : > { %256 = vst [vmem:[%s2093_s30 + $0x190] sm:$0xff] %v255_v50  ;;  %v259_v52 = vld [vmem:[%s2088_s29 + $0x340] sm:$0xff]  ;;  %v261_v53 = vld [vmem:[%s2088_s29 + $0x348] sm:$0xff]  ;;  %258 = vst [vmem:[%s2093_s30 + $0x198] sm:$0xff] %v257_v51 }
  0x31   : > { %260 = vst [vmem:[%s2093_s30 + $0x1a0] sm:$0xff] %v259_v52  ;;  %262 = vst [vmem:[%s2093_s30 + $0x1a8] sm:$0xff] %v261_v53  ;;  %v263_v54 = vld [vmem:[%s2088_s29 + $0x360] sm:$0xff]  ;;  %v265_v55 = vld [vmem:[%s2088_s29 + $0x368] sm:$0xff] }
  0x32   : > { %v267_v56 = vld [vmem:[%s2088_s29 + $0x380] sm:$0xff]  ;;  %264 = vst [vmem:[%s2093_s30 + $0x1b0] sm:$0xff] %v263_v54  ;;  %266 = vst [vmem:[%s2093_s30 + $0x1b8] sm:$0xff] %v265_v55  ;;  %v269_v57 = vld [vmem:[%s2088_s29 + $0x388] sm:$0xff] }
  0x33   : > { %268 = vst [vmem:[%s2093_s30 + $0x1c0] sm:$0xff] %v267_v56  ;;  %v271_v58 = vld [vmem:[%s2088_s29 + $0x3a0] sm:$0xff]  ;;  %v273_v59 = vld [vmem:[%s2088_s29 + $0x3a8] sm:$0xff]  ;;  %270 = vst [vmem:[%s2093_s30 + $0x1c8] sm:$0xff] %v269_v57 }
  0x34   : > { %272 = vst [vmem:[%s2093_s30 + $0x1d0] sm:$0xff] %v271_v58  ;;  %274 = vst [vmem:[%s2093_s30 + $0x1d8] sm:$0xff] %v273_v59  ;;  %v275_v60 = vld [vmem:[%s2088_s29 + $0x3c0] sm:$0xff]  ;;  %v277_v61 = vld [vmem:[%s2088_s29 + $0x3c8] sm:$0xff] }
  0x35   : > { %v279_v62 = vld [vmem:[%s2088_s29 + $0x3e0] sm:$0xff]  ;;  %276 = vst [vmem:[%s2093_s30 + $0x1e0] sm:$0xff] %v275_v60  ;;  %278 = vst [vmem:[%s2093_s30 + $0x1e8] sm:$0xff] %v277_v61  ;;  %v281_v63 = vld [vmem:[%s2088_s29 + $0x3e8] sm:$0xff] }
  0x36   : > { %280 = vst [vmem:[%s2093_s30 + $0x1f0] sm:$0xff] %v279_v62  ;;  %v283_v0 = vld [vmem:[%s2088_s29 + $0x400] sm:$0xff]  ;;  %v285_v1 = vld [vmem:[%s2088_s29 + $0x408] sm:$0xff]  ;;  %282 = vst [vmem:[%s2093_s30 + $0x1f8] sm:$0xff] %v281_v63 }
  0x37   : > { %284 = vst [vmem:[%s2093_s30 + $0x200] sm:$0xff] %v283_v0  ;;  %286 = vst [vmem:[%s2093_s30 + $0x208] sm:$0xff] %v285_v1  ;;  %v287_v2 = vld [vmem:[%s2088_s29 + $0x420] sm:$0xff]  ;;  %v289_v3 = vld [vmem:[%s2088_s29 + $0x428] sm:$0xff] }
  0x38   : > { %v291_v4 = vld [vmem:[%s2088_s29 + $0x440] sm:$0xff]  ;;  %288 = vst [vmem:[%s2093_s30 + $0x210] sm:$0xff] %v287_v2  ;;  %290 = vst [vmem:[%s2093_s30 + $0x218] sm:$0xff] %v289_v3  ;;  %v293_v5 = vld [vmem:[%s2088_s29 + $0x448] sm:$0xff] }
  0x39   : > { %292 = vst [vmem:[%s2093_s30 + $0x220] sm:$0xff] %v291_v4  ;;  %v295_v6 = vld [vmem:[%s2088_s29 + $0x460] sm:$0xff]  ;;  %v297_v7 = vld [vmem:[%s2088_s29 + $0x468] sm:$0xff]  ;;  %294 = vst [vmem:[%s2093_s30 + $0x228] sm:$0xff] %v293_v5 }
  0x3a   : > { %296 = vst [vmem:[%s2093_s30 + $0x230] sm:$0xff] %v295_v6  ;;  %298 = vst [vmem:[%s2093_s30 + $0x238] sm:$0xff] %v297_v7  ;;  %v299_v8 = vld [vmem:[%s2088_s29 + $0x480] sm:$0xff]  ;;  %v301_v9 = vld [vmem:[%s2088_s29 + $0x488] sm:$0xff] }
  0x3b   : > { %v303_v10 = vld [vmem:[%s2088_s29 + $0x4a0] sm:$0xff]  ;;  %300 = vst [vmem:[%s2093_s30 + $0x240] sm:$0xff] %v299_v8  ;;  %302 = vst [vmem:[%s2093_s30 + $0x248] sm:$0xff] %v301_v9  ;;  %v305_v11 = vld [vmem:[%s2088_s29 + $0x4a8] sm:$0xff] }
  0x3c   : > { %304 = vst [vmem:[%s2093_s30 + $0x250] sm:$0xff] %v303_v10  ;;  %v307_v12 = vld [vmem:[%s2088_s29 + $0x4c0] sm:$0xff]  ;;  %v309_v13 = vld [vmem:[%s2088_s29 + $0x4c8] sm:$0xff]  ;;  %306 = vst [vmem:[%s2093_s30 + $0x258] sm:$0xff] %v305_v11 }
  0x3d   : > { %308 = vst [vmem:[%s2093_s30 + $0x260] sm:$0xff] %v307_v12  ;;  %310 = vst [vmem:[%s2093_s30 + $0x268] sm:$0xff] %v309_v13  ;;  %v311_v14 = vld [vmem:[%s2088_s29 + $0x4e0] sm:$0xff]  ;;  %v313_v15 = vld [vmem:[%s2088_s29 + $0x4e8] sm:$0xff] }
  0x3e   : > { %v315_v16 = vld [vmem:[%s2088_s29 + $0x500] sm:$0xff]  ;;  %312 = vst [vmem:[%s2093_s30 + $0x270] sm:$0xff] %v311_v14  ;;  %314 = vst [vmem:[%s2093_s30 + $0x278] sm:$0xff] %v313_v15  ;;  %v317_v17 = vld [vmem:[%s2088_s29 + $0x508] sm:$0xff] }
  0x3f   : > { %316 = vst [vmem:[%s2093_s30 + $0x280] sm:$0xff] %v315_v16  ;;  %v319_v18 = vld [vmem:[%s2088_s29 + $0x520] sm:$0xff]  ;;  %v321_v19 = vld [vmem:[%s2088_s29 + $0x528] sm:$0xff]  ;;  %318 = vst [vmem:[%s2093_s30 + $0x288] sm:$0xff] %v317_v17 }
  0x40   : > { %320 = vst [vmem:[%s2093_s30 + $0x290] sm:$0xff] %v319_v18  ;;  %322 = vst [vmem:[%s2093_s30 + $0x298] sm:$0xff] %v321_v19  ;;  %v323_v20 = vld [vmem:[%s2088_s29 + $0x540] sm:$0xff]  ;;  %v325_v21 = vld [vmem:[%s2088_s29 + $0x548] sm:$0xff] }
  0x41   : > { %v327_v22 = vld [vmem:[%s2088_s29 + $0x560] sm:$0xff]  ;;  %324 = vst [vmem:[%s2093_s30 + $0x2a0] sm:$0xff] %v323_v20  ;;  %326 = vst [vmem:[%s2093_s30 + $0x2a8] sm:$0xff] %v325_v21  ;;  %v329_v23 = vld [vmem:[%s2088_s29 + $0x568] sm:$0xff] }
  0x42   : > { %328 = vst [vmem:[%s2093_s30 + $0x2b0] sm:$0xff] %v327_v22  ;;  %v331_v24 = vld [vmem:[%s2088_s29 + $0x580] sm:$0xff]  ;;  %v333_v25 = vld [vmem:[%s2088_s29 + $0x588] sm:$0xff]  ;;  %330 = vst [vmem:[%s2093_s30 + $0x2b8] sm:$0xff] %v329_v23 }
  0x43   : > { %332 = vst [vmem:[%s2093_s30 + $0x2c0] sm:$0xff] %v331_v24  ;;  %334 = vst [vmem:[%s2093_s30 + $0x2c8] sm:$0xff] %v333_v25  ;;  %v335_v26 = vld [vmem:[%s2088_s29 + $0x5a0] sm:$0xff]  ;;  %v337_v27 = vld [vmem:[%s2088_s29 + $0x5a8] sm:$0xff] }
  0x44   : > { %v339_v28 = vld [vmem:[%s2088_s29 + $0x5c0] sm:$0xff]  ;;  %336 = vst [vmem:[%s2093_s30 + $0x2d0] sm:$0xff] %v335_v26  ;;  %338 = vst [vmem:[%s2093_s30 + $0x2d8] sm:$0xff] %v337_v27  ;;  %v341_v29 = vld [vmem:[%s2088_s29 + $0x5c8] sm:$0xff] }
  0x45   : > { %340 = vst [vmem:[%s2093_s30 + $0x2e0] sm:$0xff] %v339_v28  ;;  %v343_v30 = vld [vmem:[%s2088_s29 + $0x5e0] sm:$0xff]  ;;  %v345_v31 = vld [vmem:[%s2088_s29 + $0x5e8] sm:$0xff]  ;;  %342 = vst [vmem:[%s2093_s30 + $0x2e8] sm:$0xff] %v341_v29 }
  0x46   : > { %344 = vst [vmem:[%s2093_s30 + $0x2f0] sm:$0xff] %v343_v30  ;;  %346 = vst [vmem:[%s2093_s30 + $0x2f8] sm:$0xff] %v345_v31  ;;  %v347_v32 = vld [vmem:[%s2088_s29 + $0x600] sm:$0xff]  ;;  %v349_v33 = vld [vmem:[%s2088_s29 + $0x608] sm:$0xff] }
  0x47   : > { %v351_v34 = vld [vmem:[%s2088_s29 + $0x620] sm:$0xff]  ;;  %348 = vst [vmem:[%s2093_s30 + $0x300] sm:$0xff] %v347_v32  ;;  %350 = vst [vmem:[%s2093_s30 + $0x308] sm:$0xff] %v349_v33  ;;  %v353_v35 = vld [vmem:[%s2088_s29 + $0x628] sm:$0xff] }
  0x48   : > { %352 = vst [vmem:[%s2093_s30 + $0x310] sm:$0xff] %v351_v34  ;;  %v355_v36 = vld [vmem:[%s2088_s29 + $0x640] sm:$0xff]  ;;  %v357_v37 = vld [vmem:[%s2088_s29 + $0x648] sm:$0xff]  ;;  %354 = vst [vmem:[%s2093_s30 + $0x318] sm:$0xff] %v353_v35 }
  0x49   : > { %356 = vst [vmem:[%s2093_s30 + $0x320] sm:$0xff] %v355_v36  ;;  %358 = vst [vmem:[%s2093_s30 + $0x328] sm:$0xff] %v357_v37  ;;  %v359_v38 = vld [vmem:[%s2088_s29 + $0x660] sm:$0xff]  ;;  %v361_v39 = vld [vmem:[%s2088_s29 + $0x668] sm:$0xff] }
  0x4a   : > { %v363_v40 = vld [vmem:[%s2088_s29 + $0x680] sm:$0xff]  ;;  %360 = vst [vmem:[%s2093_s30 + $0x330] sm:$0xff] %v359_v38  ;;  %362 = vst [vmem:[%s2093_s30 + $0x338] sm:$0xff] %v361_v39  ;;  %v365_v41 = vld [vmem:[%s2088_s29 + $0x688] sm:$0xff] }
  0x4b   : > { %364 = vst [vmem:[%s2093_s30 + $0x340] sm:$0xff] %v363_v40  ;;  %v367_v42 = vld [vmem:[%s2088_s29 + $0x6a0] sm:$0xff]  ;;  %v369_v43 = vld [vmem:[%s2088_s29 + $0x6a8] sm:$0xff]  ;;  %366 = vst [vmem:[%s2093_s30 + $0x348] sm:$0xff] %v365_v41 }
  0x4c   : > { %368 = vst [vmem:[%s2093_s30 + $0x350] sm:$0xff] %v367_v42  ;;  %370 = vst [vmem:[%s2093_s30 + $0x358] sm:$0xff] %v369_v43  ;;  %v371_v44 = vld [vmem:[%s2088_s29 + $0x6c0] sm:$0xff]  ;;  %v373_v45 = vld [vmem:[%s2088_s29 + $0x6c8] sm:$0xff] }
  0x4d   : > { %v375_v46 = vld [vmem:[%s2088_s29 + $0x6e0] sm:$0xff]  ;;  %372 = vst [vmem:[%s2093_s30 + $0x360] sm:$0xff] %v371_v44  ;;  %374 = vst [vmem:[%s2093_s30 + $0x368] sm:$0xff] %v373_v45  ;;  %v377_v47 = vld [vmem:[%s2088_s29 + $0x6e8] sm:$0xff] }
  0x4e   : > { %376 = vst [vmem:[%s2093_s30 + $0x370] sm:$0xff] %v375_v46  ;;  %v379_v48 = vld [vmem:[%s2088_s29 + $0x700] sm:$0xff]  ;;  %v381_v49 = vld [vmem:[%s2088_s29 + $0x708] sm:$0xff]  ;;  %378 = vst [vmem:[%s2093_s30 + $0x378] sm:$0xff] %v377_v47 }
  0x4f   : > { %380 = vst [vmem:[%s2093_s30 + $0x380] sm:$0xff] %v379_v48  ;;  %382 = vst [vmem:[%s2093_s30 + $0x388] sm:$0xff] %v381_v49  ;;  %v383_v50 = vld [vmem:[%s2088_s29 + $0x720] sm:$0xff]  ;;  %v385_v51 = vld [vmem:[%s2088_s29 + $0x728] sm:$0xff] }
  0x50   : > { %v387_v52 = vld [vmem:[%s2088_s29 + $0x740] sm:$0xff]  ;;  %384 = vst [vmem:[%s2093_s30 + $0x390] sm:$0xff] %v383_v50  ;;  %386 = vst [vmem:[%s2093_s30 + $0x398] sm:$0xff] %v385_v51  ;;  %v389_v53 = vld [vmem:[%s2088_s29 + $0x748] sm:$0xff] }
  0x51   : > { %388 = vst [vmem:[%s2093_s30 + $0x3a0] sm:$0xff] %v387_v52  ;;  %v391_v54 = vld [vmem:[%s2088_s29 + $0x760] sm:$0xff]  ;;  %v393_v55 = vld [vmem:[%s2088_s29 + $0x768] sm:$0xff]  ;;  %390 = vst [vmem:[%s2093_s30 + $0x3a8] sm:$0xff] %v389_v53 }
  0x52   : > { %392 = vst [vmem:[%s2093_s30 + $0x3b0] sm:$0xff] %v391_v54  ;;  %394 = vst [vmem:[%s2093_s30 + $0x3b8] sm:$0xff] %v393_v55  ;;  %v395_v56 = vld [vmem:[%s2088_s29 + $0x780] sm:$0xff]  ;;  %v397_v57 = vld [vmem:[%s2088_s29 + $0x788] sm:$0xff] }
  0x53   : > { %v399_v58 = vld [vmem:[%s2088_s29 + $0x7a0] sm:$0xff]  ;;  %396 = vst [vmem:[%s2093_s30 + $0x3c0] sm:$0xff] %v395_v56  ;;  %398 = vst [vmem:[%s2093_s30 + $0x3c8] sm:$0xff] %v397_v57  ;;  %v401_v59 = vld [vmem:[%s2088_s29 + $0x7a8] sm:$0xff] }
  0x54   : > { %400 = vst [vmem:[%s2093_s30 + $0x3d0] sm:$0xff] %v399_v58  ;;  %v403_v60 = vld [vmem:[%s2088_s29 + $0x7c0] sm:$0xff]  ;;  %v405_v61 = vld [vmem:[%s2088_s29 + $0x7c8] sm:$0xff]  ;;  %402 = vst [vmem:[%s2093_s30 + $0x3d8] sm:$0xff] %v401_v59 }
  0x55   : > { %404 = vst [vmem:[%s2093_s30 + $0x3e0] sm:$0xff] %v403_v60  ;;  %406 = vst [vmem:[%s2093_s30 + $0x3e8] sm:$0xff] %v405_v61  ;;  %v407_v62 = vld [vmem:[%s2088_s29 + $0x7e0] sm:$0xff]  ;;  %v409_v63 = vld [vmem:[%s2088_s29 + $0x7e8] sm:$0xff] }
  0x56   : > { %408 = vst [vmem:[%s2093_s30 + $0x3f0] sm:$0xff] %v407_v62  ;;  %410 = vst [vmem:[%s2093_s30 + $0x3f8] sm:$0xff] %v409_v63 }
  0x57 PF: > { %p1563_p10 = scmp.ge.s32.totalorder %s2009_s15, 1  ;;  %p423_p11 = scmp.lt.s32.totalorder %s2009_s15, 3 }
  0x59   : > { %p424_p12 = pnand %p1563_p10, %p423_p11 }
  0x5a   : > { %s2351_s4 = sand.u32 (!%p424_p12), 1, %s2001_s13   ;;  %v470_v0 = vlaneseq (!%p424_p12)  ;;  %v2011_v1 = vmov (!%p424_p12), 1983009808   ;;  %v2357_v3 = vld [vmem:[%s2570_s0] sm:$0xff] (!%p424_p12)  ;;  %s1566_s9 = sshll.u32 (!%p424_p12), %s2054_s16, 2 }
  0x5b   : > { %427 = sbr.rel (%p424_p12) target bundleno = 458 (0x1ca), region = 51  ;;  %s1564_s5 = sshll.u32 (!%p424_p12), %s2351_s4, 10  ;;  %v468_v2 = vunpack.c.l.s4 (!%p424_p12), %v2011_v1 }
  0x5c   : > { %v2359_v4 = vshrl.u32 (!%p424_p12), %v470_v0, 7  ;;  %s2361_s8 = scalar_lea.vmem (!%p424_p12), [#allocation2], %s1564_s5  ;;  %p459_p13 = scmp.lt.s32.totalorder (!%p424_p12), %s1566_s9, 7 }
  0x5d   : > { %v1754_v5 = vld [vmem:[%s2361_s8 + $0x4] ss:$16 sps:$4 sm:$0xff] (!%p424_p12)   ;;  %v469_v6 = vunpack.c.0.s8 (!%p424_p12), %v468_v2  ;;  %v1756_v7 = vld [vmem:[%s2361_s8 + $0xc] ss:$16 sps:$4 sm:$0xff] (!%p424_p12)   ;;  %v1758_v8 = vld [vmem:[%s2361_s8] ss:$16 sps:$4 sm:$0xff] (!%p424_p12)  }
  0x5e   : > { %1281 = vmatprep.subr.bf16.mxu0 (!%p424_p12), %v1754_v5  ;;  %v1759_v9 = vld [vmem:[%s2361_s8 + $0x8] ss:$16 sps:$4 sm:$0xff] (!%p424_p12)   ;;  %1363 = vmatprep.subr.bf16.mxu1 (!%p424_p12), %v1756_v7  ;;  %v1760_v11 = vld [vmem:[%s2361_s8 + $0x24] ss:$16 sps:$4 sm:$0xff] (!%p424_p12)   ;;  %v1762_v12 = vld [vmem:[%s2361_s8 + $0x2c] ss:$16 sps:$4 sm:$0xff] (!%p424_p12)  }
  0x5f   : > { %v2368_v10 = vsub.s32 (!%p424_p12), %v469_v6, %v2359_v4  ;;  %1282 = vmatpush1.bf16.msra.mxu0 (!%p424_p12), %v1758_v8  ;;  %1364 = vmatpush1.bf16.msra.mxu1 (!%p424_p12), %v1759_v9  ;;  %v1764_v13 = vld [vmem:[%s2361_s8 + $0x20] ss:$16 sps:$4 sm:$0xff] (!%p424_p12)   ;;  %v1765_v15 = vld [vmem:[%s2361_s8 + $0x28] ss:$16 sps:$4 sm:$0xff] (!%p424_p12)   ;;  %v1766_v16 = vld [vmem:[%s2361_s8 + $0x44] ss:$16 sps:$4 sm:$0xff] (!%p424_p12)   ;;  %v466_v6 = vcombine.high (!%p424_p12), %v2357_v3, %v2357_v3 }
  0x60   : > { %1283 = vmatprep.subr.bf16.mxu0 (!%p424_p12), %v1760_v11  ;;  %1365 = vmatprep.subr.bf16.mxu1 (!%p424_p12), %v1762_v12  ;;  %v1768_v18 = vld [vmem:[%s2361_s8 + $0x4c] ss:$16 sps:$4 sm:$0xff] (!%p424_p12)   ;;  %v1770_v19 = vld [vmem:[%s2361_s8 + $0x40] ss:$16 sps:$4 sm:$0xff] (!%p424_p12)   ;;  %v1771_v20 = vld [vmem:[%s2361_s8 + $0x48] ss:$16 sps:$4 sm:$0xff] (!%p424_p12)  }
  0x61   : > { %v2375_v14 = vrot.slane (!%p424_p12), %v2357_v3, %v2368_v10  ;;  %v1772_v21 = vld [vmem:[%s2361_s8 + $0x64] ss:$16 sps:$4 sm:$0xff] (!%p424_p12)   ;;  %v1774_v23 = vld [vmem:[%s2361_s8 + $0x6c] ss:$16 sps:$4 sm:$0xff] (!%p424_p12)   ;;  %v1776_v24 = vld [vmem:[%s2361_s8 + $0x60] ss:$16 sps:$4 sm:$0xff] (!%p424_p12)   ;;  %v2437_v12 = vrot.slane (!%p424_p12), %v466_v6, %v2368_v10 }
  0x62   : > { %v1777_v25 = vld [vmem:[%s2361_s8 + $0x68] ss:$16 sps:$4 sm:$0xff]   ;;  %v1778_v26 = vld [vmem:[%s2361_s8 + $0x84] ss:$16 sps:$4 sm:$0xff]   ;;  %v1780_v27 = vld [vmem:[%s2361_s8 + $0x8c] ss:$16 sps:$4 sm:$0xff]  }
  0x63   : > { %v481_v17 = vcombine.high %v2375_v14, %v2375_v14  ;;  %1284 = vmatpush1.bf16.msra.mxu0 %v1764_v13  ;;  %1366 = vmatpush1.bf16.msra.mxu1 %v1765_v15  ;;  %v1782_v28 = vld [vmem:[%s2361_s8 + $0x80] ss:$16 sps:$4 sm:$0xff]   ;;  %v1783_v29 = vld [vmem:[%s2361_s8 + $0x88] ss:$16 sps:$4 sm:$0xff]   ;;  %v1784_v30 = vld [vmem:[%s2361_s8 + $0xa4] ss:$16 sps:$4 sm:$0xff]  }
  0x64   : > { %1285 = vmatprep.subr.bf16.mxu0 %v1766_v16  ;;  %1367 = vmatprep.subr.bf16.mxu1 %v1768_v18  ;;  %v1786_v31 = vld [vmem:[%s2361_s8 + $0xac] ss:$16 sps:$4 sm:$0xff]   ;;  %v1788_v32 = vld [vmem:[%s2361_s8 + $0xa0] ss:$16 sps:$4 sm:$0xff]   ;;  %v1789_v33 = vld [vmem:[%s2361_s8 + $0xa8] ss:$16 sps:$4 sm:$0xff]  }
  0x65   : > { %v488_v22 = vpack.c.bf16 %v481_v17, %v481_v17  ;;  %v1790_v34 = vld [vmem:[%s2361_s8 + $0xc4] ss:$16 sps:$4 sm:$0xff]   ;;  %v1792_v35 = vld [vmem:[%s2361_s8 + $0xcc] ss:$16 sps:$4 sm:$0xff]   ;;  %v1794_v36 = vld [vmem:[%s2361_s8 + $0xc0] ss:$16 sps:$4 sm:$0xff]   ;;  %v482_v17 = vcombine.high %v2437_v12, %v2437_v12 }
  0x66   : > { %v1795_v37 = vld [vmem:[%s2361_s8 + $0xc8] ss:$16 sps:$4 sm:$0xff]   ;;  %v1796_v38 = vld [vmem:[%s2361_s8 + $0xe4] ss:$16 sps:$4 sm:$0xff]   ;;  %v1798_v39 = vld [vmem:[%s2361_s8 + $0xec] ss:$16 sps:$4 sm:$0xff]  }
  0x67   : > { %1313 = vmatprep.mubr.bf16.mxu0 %v488_v22  ;;  %1395 = vmatprep.mubr.bf16.mxu1 %v488_v22  ;;  %v1800_v40 = vld [vmem:[%s2361_s8 + $0xe0] ss:$16 sps:$4 sm:$0xff]   ;;  %v1801_v41 = vld [vmem:[%s2361_s8 + $0xe8] ss:$16 sps:$4 sm:$0xff]   ;;  %v1802_v42 = vld [vmem:[%s2361_s8 + $0x104] ss:$16 sps:$4 sm:$0xff]  }
  0x68   : > { %1286 = vmatpush1.bf16.msra.mxu0 %v1770_v19  ;;  %1368 = vmatpush1.bf16.msra.mxu1 %v1771_v20  ;;  %v1804_v43 = vld [vmem:[%s2361_s8 + $0x10c] ss:$16 sps:$4 sm:$0xff]   ;;  %v1806_v44 = vld [vmem:[%s2361_s8 + $0x100] ss:$16 sps:$4 sm:$0xff]   ;;  %v1807_v45 = vld [vmem:[%s2361_s8 + $0x108] ss:$16 sps:$4 sm:$0xff]   ;;  %v487_v20 = vpack.c.bf16 %v2375_v14, %v2375_v14 }
  0x69   : > { %1287 = vmatprep.subr.bf16.mxu0 %v1772_v21  ;;  %1369 = vmatprep.subr.bf16.mxu1 %v1774_v23  ;;  %v1808_v46 = vld [vmem:[%s2361_s8 + $0x124] ss:$16 sps:$4 sm:$0xff]   ;;  %v1810_v47 = vld [vmem:[%s2361_s8 + $0x12c] ss:$16 sps:$4 sm:$0xff]   ;;  %v1812_v48 = vld [vmem:[%s2361_s8 + $0x120] ss:$16 sps:$4 sm:$0xff]   ;;  %v490_v23 = vpack.c.bf16 %v482_v17, %v482_v17 }
  0x6a   : > { %v1813_v49 = vld [vmem:[%s2361_s8 + $0x128] ss:$16 sps:$4 sm:$0xff]   ;;  %v1814_v50 = vld [vmem:[%s2361_s8 + $0x144] ss:$16 sps:$4 sm:$0xff]   ;;  %v1816_v51 = vld [vmem:[%s2361_s8 + $0x14c] ss:$16 sps:$4 sm:$0xff]  }
  0x6b   : > { %v1818_v52 = vld [vmem:[%s2361_s8 + $0x140] ss:$16 sps:$4 sm:$0xff]   ;;  %v1819_v53 = vld [vmem:[%s2361_s8 + $0x148] ss:$16 sps:$4 sm:$0xff]   ;;  %v1820_v54 = vld [vmem:[%s2361_s8 + $0x164] ss:$16 sps:$4 sm:$0xff]  }
  0x6c   : > { %1288 = vmatpush1.bf16.msra.mxu0 %v1776_v24  ;;  %1370 = vmatpush1.bf16.msra.mxu1 %v1777_v25  ;;  %v1822_v55 = vld [vmem:[%s2361_s8 + $0x16c] ss:$16 sps:$4 sm:$0xff]   ;;  %v1824_v56 = vld [vmem:[%s2361_s8 + $0x160] ss:$16 sps:$4 sm:$0xff]   ;;  %v1825_v57 = vld [vmem:[%s2361_s8 + $0x168] ss:$16 sps:$4 sm:$0xff]  }
  0x6d   : > { %1289 = vmatprep.subr.bf16.mxu0 %v1778_v26  ;;  %1371 = vmatprep.subr.bf16.mxu1 %v1780_v27  ;;  %v1826_v58 = vld [vmem:[%s2361_s8 + $0x184] ss:$16 sps:$4 sm:$0xff]   ;;  %v1828_v59 = vld [vmem:[%s2361_s8 + $0x18c] ss:$16 sps:$4 sm:$0xff]   ;;  %v1830_v60 = vld [vmem:[%s2361_s8 + $0x180] ss:$16 sps:$4 sm:$0xff]  }
  0x6e   : > { %v1831_v61 = vld [vmem:[%s2361_s8 + $0x188] ss:$16 sps:$4 sm:$0xff]   ;;  %v1832_v62 = vld [vmem:[%s2361_s8 + $0x1a4] ss:$16 sps:$4 sm:$0xff]   ;;  %v1834_v63 = vld [vmem:[%s2361_s8 + $0x1ac] ss:$16 sps:$4 sm:$0xff]  }
  0x6f   : > { %v1836_v0 = vld [vmem:[%s2361_s8 + $0x1a0] ss:$16 sps:$4 sm:$0xff]   ;;  %v1837_v1 = vld [vmem:[%s2361_s8 + $0x1a8] ss:$16 sps:$4 sm:$0xff]   ;;  %v1838_v2 = vld [vmem:[%s2361_s8 + $0x1c4] ss:$16 sps:$4 sm:$0xff]  }
  0x70   : > { %1290 = vmatpush1.bf16.msra.mxu0 %v1782_v28  ;;  %1372 = vmatpush1.bf16.msra.mxu1 %v1783_v29  ;;  %v1840_v5 = vld [vmem:[%s2361_s8 + $0x1cc] ss:$16 sps:$4 sm:$0xff]   ;;  %v1842_v7 = vld [vmem:[%s2361_s8 + $0x1c0] ss:$16 sps:$4 sm:$0xff]   ;;  %v1843_v8 = vld [vmem:[%s2361_s8 + $0x1c8] ss:$16 sps:$4 sm:$0xff]  }
  0x71   : > { %1291 = vmatprep.subr.bf16.mxu0 %v1784_v30  ;;  %1373 = vmatprep.subr.bf16.mxu1 %v1786_v31  ;;  %v1844_v9 = vld [vmem:[%s2361_s8 + $0x1e4] ss:$16 sps:$4 sm:$0xff]   ;;  %v1846_v11 = vld [vmem:[%s2361_s8 + $0x1ec] ss:$16 sps:$4 sm:$0xff]   ;;  %v1848_v13 = vld [vmem:[%s2361_s8 + $0x1e0] ss:$16 sps:$4 sm:$0xff]  }
  0x72   : > { %v1849_v15 = vld [vmem:[%s2361_s8 + $0x1e8] ss:$16 sps:$4 sm:$0xff]   ;;  %v1853_v3 = vld [vmem:[%s2361_s8 + $0x204] ss:$16 sps:$4 sm:$0xff]   ;;  %v1856_v16 = vld [vmem:[%s2361_s8 + $0x20c] ss:$16 sps:$4 sm:$0xff]  }
  0x73   : > { %v1851_v18 = vld [vmem:[%s2361_s8 + $0x200] ss:$16 sps:$4 sm:$0xff]   ;;  %v1854_v19 = vld [vmem:[%s2361_s8 + $0x208] ss:$16 sps:$4 sm:$0xff]   ;;  %v1859_v21 = vld [vmem:[%s2361_s8 + $0x224] ss:$16 sps:$4 sm:$0xff]  }
  0x74   : > { %1292 = vmatpush1.bf16.msra.mxu0 %v1788_v32  ;;  %1374 = vmatpush1.bf16.msra.mxu1 %v1789_v33  ;;  %v1862_v22 = vld [vmem:[%s2361_s8 + $0x22c] ss:$16 sps:$4 sm:$0xff]   ;;  %v1857_v24 = vld [vmem:[%s2361_s8 + $0x220] ss:$16 sps:$4 sm:$0xff]   ;;  %v1860_v25 = vld [vmem:[%s2361_s8 + $0x228] ss:$16 sps:$4 sm:$0xff]  }
  0x75   : > { %1293 = vmatprep.subr.bf16.mxu0 %v1790_v34  ;;  %1375 = vmatprep.subr.bf16.mxu1 %v1792_v35  ;;  %v1865_v14 = vld [vmem:[%s2361_s8 + $0x244] ss:$16 sps:$4 sm:$0xff]   ;;  %v1868_v26 = vld [vmem:[%s2361_s8 + $0x24c] ss:$16 sps:$4 sm:$0xff]   ;;  %v1863_v27 = vld [vmem:[%s2361_s8 + $0x240] ss:$16 sps:$4 sm:$0xff]  }
  0x76   : > { %v1866_v28 = vld [vmem:[%s2361_s8 + $0x248] ss:$16 sps:$4 sm:$0xff]   ;;  %v1871_v29 = vld [vmem:[%s2361_s8 + $0x264] ss:$16 sps:$4 sm:$0xff]   ;;  %v1874_v30 = vld [vmem:[%s2361_s8 + $0x26c] ss:$16 sps:$4 sm:$0xff]  }
  0x77   : > { %v1869_v31 = vld [vmem:[%s2361_s8 + $0x260] ss:$16 sps:$4 sm:$0xff]   ;;  %v1872_v32 = vld [vmem:[%s2361_s8 + $0x268] ss:$16 sps:$4 sm:$0xff]   ;;  %v1877_v33 = vld [vmem:[%s2361_s8 + $0x284] ss:$16 sps:$4 sm:$0xff]  }
  0x78   : > { %1294 = vmatpush1.bf16.msra.mxu0 %v1794_v36  ;;  %1376 = vmatpush1.bf16.msra.mxu1 %v1795_v37  ;;  %v1880_v34 = vld [vmem:[%s2361_s8 + $0x28c] ss:$16 sps:$4 sm:$0xff]   ;;  %v1875_v35 = vld [vmem:[%s2361_s8 + $0x280] ss:$16 sps:$4 sm:$0xff]   ;;  %v1878_v36 = vld [vmem:[%s2361_s8 + $0x288] ss:$16 sps:$4 sm:$0xff]  }
  0x79   : > { %1295 = vmatprep.subr.bf16.mxu0 %v1796_v38  ;;  %1377 = vmatprep.subr.bf16.mxu1 %v1798_v39  ;;  %v1883_v37 = vld [vmem:[%s2361_s8 + $0x2a4] ss:$16 sps:$4 sm:$0xff]   ;;  %v1886_v38 = vld [vmem:[%s2361_s8 + $0x2ac] ss:$16 sps:$4 sm:$0xff]   ;;  %v1881_v39 = vld [vmem:[%s2361_s8 + $0x2a0] ss:$16 sps:$4 sm:$0xff]  }
  0x7a   : > { %v1926_v6 = vld [vmem:[%s2361_s8 + $0x388] ss:$16 sps:$4 sm:$0xff]   ;;  %v1943_v17 = vld [vmem:[%s2361_s8 + $0x3e4] ss:$16 sps:$4 sm:$0xff]   ;;  %s2581_s9 = smov (!%p459_p13, %s1566_s9), 7  ;;  %s1565_s19 = sshll.u32 %s2351_s4, 3 }
  0x7b   : > { %s461_s17 = scalar_lea.vmem %s2572_s2, %s2581_s9  ;;  %s1701_s20 = sshll.u32 %s2054_s16, 7 }
  0x7c   : > { %1296 = vmatpush1.bf16.msra.mxu0 %v1800_v40  ;;  %1378 = vmatpush1.bf16.msra.mxu1 %v1801_v41  ;;  %v1884_v40 = vld [vmem:[%s2361_s8 + $0x2a8] ss:$16 sps:$4 sm:$0xff]   ;;  %v1889_v41 = vld [vmem:[%s2361_s8 + $0x2c4] ss:$16 sps:$4 sm:$0xff]   ;;  %s456_s24 = scalar_lea.vmem [#allocation3], %s1565_s19  ;;  %s2526_s28 = scalar_lea.hbm %s2573_s3, %s1701_s20 }
  0x7d   : > { %1297 = vmatprep.subr.bf16.mxu0 %v1802_v42  ;;  %1379 = vmatprep.subr.bf16.mxu1 %v1804_v43  ;;  %v1892_v42 = vld [vmem:[%s2361_s8 + $0x2cc] ss:$16 sps:$4 sm:$0xff]   ;;  %v1887_v43 = vld [vmem:[%s2361_s8 + $0x2c0] ss:$16 sps:$4 sm:$0xff]   ;;  %s1483_s25 = sshll.u32 %s456_s24, 4  ;;  %s1469_s29 = scalar_lea.sflag [#allocation4], %s2351_s4  ;;  %s2528_s25 = int_to_ptr.vmem [resolvable:$true] %s1483_s25 }
  0x7e   : > { %s1947_s16 = scalar_lea.vmem %s2528_s25, 128  ;;  %s2012_s30 = smov [#allocation3]  }
  0x7f   : > { %p1948_p0 = scmp.ne.s32.totalorder %s2528_s25, %s1947_s16  ;;  %s1951_s5 = sshll.u32 %s2012_s30, 4  ;;  %s1952_s5 = int_to_ptr.vmem [resolvable:$false] %s1951_s5 }
  0x80   : > { %1298 = vmatpush1.bf16.msra.mxu0 %v1806_v44  ;;  %1380 = vmatpush1.bf16.msra.mxu1 %v1807_v45  ;;  %v1890_v44 = vld [vmem:[%s2361_s8 + $0x2c8] ss:$16 sps:$4 sm:$0xff]   ;;  %v1895_v45 = vld [vmem:[%s2361_s8 + $0x2e4] ss:$16 sps:$4 sm:$0xff]   ;;  %s1953_s6 = scalar_lea.vmem %s1952_s5, 256  ;;  %p1954_p3 = scmp.lt.s32.totalorder %s2528_s25, %s1952_s5 }
  0x81   : > { %1299 = vmatprep.subr.bf16.mxu0 %v1808_v46  ;;  %1381 = vmatprep.subr.bf16.mxu1 %v1810_v47  ;;  %v1898_v46 = vld [vmem:[%s2361_s8 + $0x2ec] ss:$16 sps:$4 sm:$0xff]   ;;  %v1893_v47 = vld [vmem:[%s2361_s8 + $0x2e0] ss:$16 sps:$4 sm:$0xff]   ;;  %p1949_p1 = pnand %p1948_p0, %p2072_p6  ;;  %p1955_p4 = scmp.lt.s32.totalorder %s1953_s6, %s1947_s16 }
  0x83   : > { %p1950_p2 = pneg %p1949_p1  ;;  %p1956_p5 = por %p1955_p4, %p1954_p3 }
  0x84   : > { %1300 = vmatpush1.bf16.msra.mxu0 %v1812_v48  ;;  %1382 = vmatpush1.bf16.msra.mxu1 %v1813_v49  ;;  %v1896_v48 = vld [vmem:[%s2361_s8 + $0x2e8] ss:$16 sps:$4 sm:$0xff]   ;;  %v1901_v49 = vld [vmem:[%s2361_s8 + $0x304] ss:$16 sps:$4 sm:$0xff]  }
  0x85   : > { %1301 = vmatprep.subr.bf16.mxu0 %v1814_v50  ;;  %1383 = vmatprep.subr.bf16.mxu1 %v1816_v51  ;;  %v1904_v50 = vld [vmem:[%s2361_s8 + $0x30c] ss:$16 sps:$4 sm:$0xff]   ;;  %v1899_v51 = vld [vmem:[%s2361_s8 + $0x300] ss:$16 sps:$4 sm:$0xff]   ;;  %p1957_p7 = pnand %p1956_p5, %p1950_p2 }
  0x88   : > { %1302 = vmatpush1.bf16.msra.mxu0 %v1818_v52  ;;  %1384 = vmatpush1.bf16.msra.mxu1 %v1819_v53  ;;  %v1902_v52 = vld [vmem:[%s2361_s8 + $0x308] ss:$16 sps:$4 sm:$0xff]   ;;  %v1907_v53 = vld [vmem:[%s2361_s8 + $0x324] ss:$16 sps:$4 sm:$0xff]  }
  0x89   : > { %1303 = vmatprep.subr.bf16.mxu0 %v1820_v54  ;;  %1385 = vmatprep.subr.bf16.mxu1 %v1822_v55  ;;  %v1910_v54 = vld [vmem:[%s2361_s8 + $0x32c] ss:$16 sps:$4 sm:$0xff]   ;;  %v1905_v55 = vld [vmem:[%s2361_s8 + $0x320] ss:$16 sps:$4 sm:$0xff]  }
  0x8c   : > { %1304 = vmatpush1.bf16.msra.mxu0 %v1824_v56  ;;  %1386 = vmatpush1.bf16.msra.mxu1 %v1825_v57  ;;  %v1908_v56 = vld [vmem:[%s2361_s8 + $0x328] ss:$16 sps:$4 sm:$0xff]   ;;  %v1913_v57 = vld [vmem:[%s2361_s8 + $0x344] ss:$16 sps:$4 sm:$0xff]  }
  0x8d   : > { %1305 = vmatprep.subr.bf16.mxu0 %v1826_v58  ;;  %1387 = vmatprep.subr.bf16.mxu1 %v1828_v59  ;;  %v1916_v58 = vld [vmem:[%s2361_s8 + $0x34c] ss:$16 sps:$4 sm:$0xff]   ;;  %v1911_v59 = vld [vmem:[%s2361_s8 + $0x340] ss:$16 sps:$4 sm:$0xff]  }
  0x90   : > { %1306 = vmatpush1.bf16.msra.mxu0 %v1830_v60  ;;  %1388 = vmatpush1.bf16.msra.mxu1 %v1831_v61  ;;  %v1914_v60 = vld [vmem:[%s2361_s8 + $0x348] ss:$16 sps:$4 sm:$0xff]   ;;  %v1919_v61 = vld [vmem:[%s2361_s8 + $0x364] ss:$16 sps:$4 sm:$0xff]  }
  0x91   : > { %1307 = vmatprep.subr.bf16.mxu0 %v1832_v62  ;;  %1389 = vmatprep.subr.bf16.mxu1 %v1834_v63  ;;  %v1922_v62 = vld [vmem:[%s2361_s8 + $0x36c] ss:$16 sps:$4 sm:$0xff]   ;;  %v1917_v63 = vld [vmem:[%s2361_s8 + $0x360] ss:$16 sps:$4 sm:$0xff]  }
  0x94   : > { %1308 = vmatpush1.bf16.msra.mxu0 %v1836_v0  ;;  %1390 = vmatpush1.bf16.msra.mxu1 %v1837_v1  ;;  %v1920_v0 = vld [vmem:[%s2361_s8 + $0x368] ss:$16 sps:$4 sm:$0xff]   ;;  %v1925_v1 = vld [vmem:[%s2361_s8 + $0x384] ss:$16 sps:$4 sm:$0xff]  }
  0x95   : > { %1309 = vmatprep.subr.bf16.mxu0 %v1838_v2  ;;  %1391 = vmatprep.subr.bf16.mxu1 %v1840_v5  ;;  %v1928_v2 = vld [vmem:[%s2361_s8 + $0x38c] ss:$16 sps:$4 sm:$0xff]   ;;  %v1923_v5 = vld [vmem:[%s2361_s8 + $0x380] ss:$16 sps:$4 sm:$0xff]  }
  0x98   : > { %1310 = vmatpush1.bf16.msra.mxu0 %v1842_v7  ;;  %1392 = vmatpush1.bf16.msra.mxu1 %v1843_v8  ;;  %v1931_v7 = vld [vmem:[%s2361_s8 + $0x3a4] ss:$16 sps:$4 sm:$0xff]   ;;  %v1934_v8 = vld [vmem:[%s2361_s8 + $0x3ac] ss:$16 sps:$4 sm:$0xff]  }
  0x99   : > { %1311 = vmatprep.subr.bf16.mxu0 %v1844_v9  ;;  %1393 = vmatprep.subr.bf16.mxu1 %v1846_v11  ;;  %v1929_v9 = vld [vmem:[%s2361_s8 + $0x3a0] ss:$16 sps:$4 sm:$0xff]   ;;  %v1932_v11 = vld [vmem:[%s2361_s8 + $0x3a8] ss:$16 sps:$4 sm:$0xff]  }
  0x9c   : > { %1312 = vmatpush1.bf16.msra.mxu0 %v1848_v13  ;;  %1394 = vmatpush1.bf16.msra.mxu1 %v1849_v15  ;;  %v1937_v13 = vld [vmem:[%s2361_s8 + $0x3c4] ss:$16 sps:$4 sm:$0xff]   ;;  %v1940_v15 = vld [vmem:[%s2361_s8 + $0x3cc] ss:$16 sps:$4 sm:$0xff]  }
  0x9d   : > { %1322 = vmatprep.subr.bf16.mxu0 %v1853_v3  ;;  %1404 = vmatprep.subr.bf16.mxu1 %v1856_v16  ;;  %v1935_v3 = vld [vmem:[%s2361_s8 + $0x3c0] ss:$16 sps:$4 sm:$0xff]   ;;  %v1938_v16 = vld [vmem:[%s2361_s8 + $0x3c8] ss:$16 sps:$4 sm:$0xff]  }
  0x9f   : > { %1314 = vmatmul.mubr.bf16.vlgmr.msra.gmra.mrb[0].mxu0 %v487_v20  ;;  %1396 = vmatmul.mubr.bf16.vlgmr.msra.gmra.mrb[0].mxu1 %v487_v20  ;;  %v1944_v20 = vld [vmem:[%s2361_s8 + $0x3e8] ss:$16 sps:$4 sm:$0xff]  }
  0xa0   : > { %1323 = vmatpush1.bf16.msra.mxu0 %v1851_v18  ;;  %1405 = vmatpush1.bf16.msra.mxu1 %v1854_v19  ;;  %v1946_v18 = vld [vmem:[%s2361_s8 + $0x3ec] ss:$16 sps:$4 sm:$0xff]   ;;  %v1941_v19 = vld [vmem:[%s2361_s8 + $0x3e0] ss:$16 sps:$4 sm:$0xff]  }
  0xa1   : > { %1324 = vmatprep.subr.bf16.mxu0 %v1859_v21  ;;  %1406 = vmatprep.subr.bf16.mxu1 %v1862_v22  ;;  %v489_v21 = vpack.c.bf16 %v2437_v12, %v2437_v12  ;;  %v623_v22 = vsub.s32 0, %v2359_v4  ;;  %v635_v12 = vsub.s32 3, %v2359_v4 }
  0xa2   : > { %1354 = vmatprep.mubr.bf16.mxu0 %v490_v23  ;;  %1436 = vmatprep.mubr.bf16.mxu1 %v490_v23  ;;  %v631_v23 = vsub.s32 2, %v2359_v4 }
  0xa4   : > { %1325 = vmatpush1.bf16.msra.mxu0 %v1857_v24  ;;  %1407 = vmatpush1.bf16.msra.mxu1 %v1860_v25  ;;  %v619_v24 = vld [vmem:[%s461_s17] sm:$0xf]  ;;  %v627_v25 = vsub.s32 1, %v2359_v4 }
  0xa5   : > { %1326 = vmatprep.subr.bf16.mxu0 %v1865_v14  ;;  %1408 = vmatprep.subr.bf16.mxu1 %v1868_v26  ;;  %v624_v14 = vrot.slane %v619_v24, %v623_v22  ;;  %v632_v26 = vrot.slane %v619_v24, %v631_v23 }
  0xa8   : > { %1327 = vmatpush1.bf16.msra.mxu0 %v1863_v27  ;;  %1409 = vmatpush1.bf16.msra.mxu1 %v1866_v28  ;;  %v628_v27 = vrot.slane %v619_v24, %v627_v25  ;;  %v636_v28 = vrot.slane %v619_v24, %v635_v12 }
  0xa9   : > { %1328 = vmatprep.subr.bf16.mxu0 %v1871_v29  ;;  %1410 = vmatprep.subr.bf16.mxu1 %v1874_v30 }
  0xac   : > { %1329 = vmatpush1.bf16.msra.mxu0 %v1869_v31  ;;  %1411 = vmatpush1.bf16.msra.mxu1 %v1872_v32 }
  0xad   : > { %1330 = vmatprep.subr.bf16.mxu0 %v1877_v33  ;;  %1412 = vmatprep.subr.bf16.mxu1 %v1880_v34 }
  0xb0   : > { %1331 = vmatpush1.bf16.msra.mxu0 %v1875_v35  ;;  %1413 = vmatpush1.bf16.msra.mxu1 %v1878_v36 }
  0xb1   : > { %1332 = vmatprep.subr.bf16.mxu0 %v1883_v37  ;;  %1414 = vmatprep.subr.bf16.mxu1 %v1886_v38 }
  0xb4   : > { %1333 = vmatpush1.bf16.msra.mxu0 %v1881_v39  ;;  %1415 = vmatpush1.bf16.msra.mxu1 %v1884_v40 }
  0xb5   : > { %1334 = vmatprep.subr.bf16.mxu0 %v1889_v41  ;;  %1416 = vmatprep.subr.bf16.mxu1 %v1892_v42 }
  0xb8   : > { %1335 = vmatpush1.bf16.msra.mxu0 %v1887_v43  ;;  %1417 = vmatpush1.bf16.msra.mxu1 %v1890_v44 }
  0xb9   : > { %1336 = vmatprep.subr.bf16.mxu0 %v1895_v45  ;;  %1418 = vmatprep.subr.bf16.mxu1 %v1898_v46 }
  0xbc   : > { %1337 = vmatpush1.bf16.msra.mxu0 %v1893_v47  ;;  %1419 = vmatpush1.bf16.msra.mxu1 %v1896_v48 }
  0xbd   : > { %1338 = vmatprep.subr.bf16.mxu0 %v1901_v49  ;;  %1420 = vmatprep.subr.bf16.mxu1 %v1904_v50 }
  0xc0   : > { %1339 = vmatpush1.bf16.msra.mxu0 %v1899_v51  ;;  %1421 = vmatpush1.bf16.msra.mxu1 %v1902_v52 }
  0xc1   : > { %1340 = vmatprep.subr.bf16.mxu0 %v1907_v53  ;;  %1422 = vmatprep.subr.bf16.mxu1 %v1910_v54 }
  0xc4   : > { %1341 = vmatpush1.bf16.msra.mxu0 %v1905_v55  ;;  %1423 = vmatpush1.bf16.msra.mxu1 %v1908_v56 }
  0xc5   : > { %1342 = vmatprep.subr.bf16.mxu0 %v1913_v57  ;;  %1424 = vmatprep.subr.bf16.mxu1 %v1916_v58 }
  0xc8   : > { %1343 = vmatpush1.bf16.msra.mxu0 %v1911_v59  ;;  %1425 = vmatpush1.bf16.msra.mxu1 %v1914_v60 }
  0xc9   : > { %1344 = vmatprep.subr.bf16.mxu0 %v1919_v61  ;;  %1426 = vmatprep.subr.bf16.mxu1 %v1922_v62 }
  0xcc   : > { %1345 = vmatpush1.bf16.msra.mxu0 %v1917_v63  ;;  %1427 = vmatpush1.bf16.msra.mxu1 %v1920_v0 }
  0xcd   : > { %1346 = vmatprep.subr.bf16.mxu0 %v1925_v1  ;;  %1428 = vmatprep.subr.bf16.mxu1 %v1928_v2 }
  0xd0   : > { %1347 = vmatpush1.bf16.msra.mxu0 %v1923_v5  ;;  %1429 = vmatpush1.bf16.msra.mxu1 %v1926_v6 }
  0xd1   : > { %1348 = vmatprep.subr.bf16.mxu0 %v1931_v7  ;;  %1430 = vmatprep.subr.bf16.mxu1 %v1934_v8 }
  0xd4   : > { %1349 = vmatpush1.bf16.msra.mxu0 %v1929_v9  ;;  %1431 = vmatpush1.bf16.msra.mxu1 %v1932_v11 }
  0xd5   : > { %1350 = vmatprep.subr.bf16.mxu0 %v1937_v13  ;;  %1432 = vmatprep.subr.bf16.mxu1 %v1940_v15 }
  0xd8   : > { %1351 = vmatpush1.bf16.msra.mxu0 %v1935_v3  ;;  %1433 = vmatpush1.bf16.msra.mxu1 %v1938_v16 }
  0xd9   : > { %1352 = vmatprep.subr.bf16.mxu0 %v1943_v17  ;;  %1434 = vmatprep.subr.bf16.mxu1 %v1946_v18 }
  0xdc   : > { %1353 = vmatpush1.bf16.msra.mxu0 %v1941_v19  ;;  %1435 = vmatpush1.bf16.msra.mxu1 %v1944_v20 }
  0xdf   : > { %1355 = vmatmul.mubr.bf16.vlgmr.msra.gmra.mrb[0].mxu0 %v489_v21  ;;  %1437 = vmatmul.mubr.bf16.vlgmr.msra.gmra.mrb[0].mxu1 %v489_v21 }
 0x1b2   : > { %v1356_v29 = vpop.f32.mrb[0].mxu0  ;;  %v1438_v30 = vpop.f32.mrb[0].mxu1 }
 0x1b3   : > { %v1702_v31 = vadd.f32 %v1356_v29, %v624_v14  ;;  %v1704_v32 = vadd.f32 %v1438_v30, %v632_v26  ;;  %v1358_v33 = vpop.f32.mrb[1].mxu0  ;;  %v1440_v34 = vpop.f32.mrb[1].mxu1 }
 0x1b4   : > { %v1703_v35 = vadd.f32 %v1358_v33, %v628_v27  ;;  %v1705_v36 = vadd.f32 %v1440_v34, %v636_v28  ;;  %v1360_v37 = vpop.f32.mrb[2].mxu0  ;;  %v1442_v38 = vpop.f32.mrb[2].mxu1 }
 0x1b5   : > { %v1361_v39 = vpop.f32.mrb[3].mxu0  ;;  %v1443_v4 = vpop.f32.mrb[3].mxu1 }
 0x1b6   : > { %v1449_v40 = vcombine.low %v1702_v31, %v1703_v35  ;;  %v1450_v41 = vcombine.low %v1704_v32, %v1705_v36 }
 0x1b8   : > { %v1457_v42 = vrot.slane %v1449_v40, %v2368_v10  ;;  %v1464_v43 = vrot.slane %v1450_v41, %v2368_v10 }
 0x1ba   : > { %v1465_v44 = vcombine.low %v1457_v42, %v1464_v43 }
 0x1bc   : > { %1467 = vst [vmem:[%s456_s24] sm:$0xff] %v1465_v44 }
 0x1bd   : > { %1960 = shalt.err (!%p1957_p7)
}
 0x1be   : > { %s1961_s4 = scalar_lea.hbm %s2526_s28, 128  ;;  %s1965_s9 = scalar_lea.hbm %s2573_s3, 256 }
 0x1bf   : > { %p1962_p10 = scmp.ne.s32.totalorder %s2526_s28, %s1961_s4  ;;  %p1966_p13 = scmp.lt.u32.totalorder %s2526_s28, %s2573_s3 }
 0x1c0   : > { %p1967_p0 = scmp.lt.u32.totalorder %s1965_s9, %s1961_s4  ;;  %p1969_p2 = scmp.lt.u32.totalorder %s1961_s4, %s2526_s28 }
 0x1c1   : > { %p1963_p11 = pnand %p1962_p10, %p2072_p6 }
 0x1c2   : > { %p1968_p1 = por %p1967_p0, %p1966_p13 }
 0x1c3   : > { %p1964_p12 = pneg %p1963_p11 }
 0x1c4   : > { %p1970_p3 = por %p1969_p2, %p1968_p1 }
 0x1c6   : > { %p1971_p4 = pnand %p1970_p3, %p1964_p12 }
 0x1c8   : > { %1974 = shalt.err (!%p1971_p4)
}
 0x1c9   : > { %1714 = dma.vmem_to_hbm [thread:$0]  (%p2072_p6), %s2528_s25, 128, %s2526_s28, %s1469_s29  }
 0x1ca PF: > { %s1495_s17 = sand.u32 1, %s1997_s12   ;;  %p1717_p5 = pnand %p1559_p9, %p2076_p8 }
 0x1cb   : > { %s1496_s19 = scalar_lea.sflag [#allocation4], %s1495_s17 }
 0x1cc   : > { %1992 = dma.done.wait (!%p1717_p5), %s1496_s19, 128  }
 0x1cd   : > { %1994 = vsyncadd (!%p1717_p5), %s1496_s19, 4294967168  ;;  %p13_p7 = scmp.ge.s32.totalorder %s2058_s18, 4   ;;  %s2576_s12 = smov %s2001_s13 }
 0x1ce   : > { %s2577_s13 = smov %s2005_s14  ;;  %s2578_s14 = smov %s2070_s21 }
 0x1cf   : > { %s2579_s15 = smov %s2058_s18  ;;  %15 = sbr.rel (!%p13_p7) target bundleno = 3 (0x3), region = 98 }
 0x1d6   :  { %1501 = vsyncpa [#allocation4], 1 }
 0x1d7   :  { %1503 = vsyncpa [#allocation4 + $0x1], 1 }

// kernel: facenet_forward.4
= control target key start
LH: loop header
LB: loop body
LE: loop exit
PB: predicated region body
PF: predicated region fallthrough
CT: control target
= control target key end

     0   :  { %s7174_s0 = inlined_call_operand.vmem [shape: bf16[2,8192], index: 0, kind: input, shape index: {}]   ;;  %s7175_s1 = inlined_call_operand.hbm [shape: bf16[8192,512], index: 1, kind: input, shape index: {}]   ;;  %s7176_s2 = inlined_call_operand.hbm [shape: f32[1,512], index: 2, kind: input, shape index: {}]   ;;  %s7177_s3 = inlined_call_operand.hbm [shape: f32[1,512], index: 3, kind: input, shape index: {}]   ;;  %s7178_s4 = inlined_call_operand.vmem [shape: f32[2,512], index: 4, kind: output, shape index: {}]  }
   0x1   :  { %7187 = sst [smem:[#allocation16_spill]] %s7175_s1 }
   0x2   :  { %7188 = sst [smem:[#allocation17_spill]] %s7176_s2 }
   0x3   :  { %7189 = sst [smem:[#allocation18_spill]] %s7178_s4 }
   0x4   :  { %9 = vsyncpa [#allocation4], 0 }
   0x5   :  { %11 = vsyncpa [#allocation4 + $0x1], 0 }
   0x6   :  { %12 = vsyncpa [#allocation6], 0 }
   0x7   :  { %14 = vsyncpa [#allocation6 + $0x1], 0  ;;  %s6197_s15 = smov 0   ;;  %s6199_s16 = smov 0  }
   0x8   :  { %s6201_s17 = smov 0   ;;  %s6203_s18 = smov 0  }
   0x9   :  { %s6205_s19 = smov 0   ;;  %s6207_s20 = smov 0  }
   0xa   :  { %s6209_s21 = smov 0   ;;  %s6211_s22 = smov 0  }
   0xb   :  { %s6213_s23 = smov 0   ;;  %s6215_s24 = smov 0  }
   0xc   :  { %s6217_s25 = smov 0  }
   0xd LB: > { %7190 = sst [smem:[#allocation10_spill]] %s6129_s17  ;;  %s7179_s26 = sadd.s32 4294967295, %s6161_s25   ;;  %s6161_s25 = sphi %s6217_s25, %s20_s25   ;;  %s6157_s24 = sphi %s6215_s24, %s7219_s24   ;;  %s6153_s23 = sphi %s6213_s23, %s7227_s23   ;;  %s6149_s22 = sphi %s6211_s22, %s7226_s22   ;;  %s6145_s21 = sphi %s6209_s21, %s7225_s21   ;;  %s6141_s20 = sphi %s6207_s20, %s7224_s20   ;;  %s6137_s19 = sphi %s6205_s19, %s7223_s19   ;;  %s6133_s18 = sphi %s6203_s18, %s7222_s18   ;;  %s6129_s17 = sphi %s6201_s17, %s7215_s17   ;;  %s6125_s16 = sphi %s6199_s16, %s7221_s16   ;;  %s6121_s15 = sphi %s6197_s15, %s7220_s15  }
   0xe   : > { %7191 = sst [smem:[#allocation11_spill]] %s6157_s24  ;;  %s29_s27 = sadd.s32 1, %s6153_s23 }
   0xf   : > { %p30_p0 = scmp.ge.s32.totalorder %s29_s27, 2  ;;  %s32_s28 = sadd.s32 1, %s6157_s24 }
  0x10   : > { %s67_s29 = sadd.s32 1, %s6141_s20  ;;  %p74_p1 = scmp.ne.s32.totalorder %s6141_s20, %s6137_s19 }
  0x11   : > { %s7229_s27 = smov (%p30_p0, %s29_s27), 0  ;;  %s7231_s28 = smov (!%p30_p0, %s32_s28), %s6157_s24 }
  0x12   : > { %7192 = sst [smem:[#allocation12_spill]] %s7229_s27  ;;  %s62_s30 = ssub.s32 %s6153_s23, %s7229_s27 }
  0x13   : > { %p75_p2 = scmp.eq.s32.totalorder %s6161_s25, 0  ;;  %p34_p3 = scmp.ge.s32.totalorder %s7231_s28, 2 }
  0x14   : > { %p80_p4 = scmp.ne.s32.totalorder %s6137_s19, %s6133_s18  ;;  %p6271_p6 = scmp.eq.s32.totalorder %s7179_s26, 0 }
  0x15   : > { %p6265_p5 = por %p75_p2, %p74_p1  ;;  %s7233_s28 = smov (%p34_p3, %s7231_s28), 0 }
  0x16   : > { %7195 = sst [smem:[#allocation13_spill]] %s7233_s28  ;;  %p6279_p7 = por %p6271_p6, %p80_p4 }
  0x17   : > { %s93_s8 = sadd.s32 1, %s6129_s17  ;;  %s63_s9 = ssub.s32 %s6157_s24, %s7233_s28 }
  0x18   : > { %s7196_s7 = scalar_select %p6279_p7, 1, 0 }
  0x19   : > { %p100_p8 = scmp.ne.s32.totalorder %s6129_s17, %s6125_s16  ;;  %s64_s10 = sor.u32 %s63_s9, %s62_s30 }
  0x1a   : > { %p91_p9 = scmp.eq.s32.totalorder %s63_s9, 0  ;;  %p65_p10 = scmp.eq.s32.totalorder %s64_s10, 0 }
  0x1b   : > { %p6290_p11 = por %p100_p8, %p75_p2  ;;  %p106_p12 = scmp.ne.s32.totalorder %s6125_s16, %s6121_s15 }
  0x1c   : > { %s6295_s12 = scalar_select %p91_p9, %s6129_s17, %s93_s8  }
  0x1d   : > { %s6298_s13 = scalar_select %p65_p10, %s6141_s20, %s67_s29  }
  0x1e   : > { %7198 = sst [smem:[#allocation14_spill]] %s6295_s12  ;;  %p5110_p13 = scmp.lt.s32.totalorder %s6161_s25, 4 }
  0x1f   : > { %7199 = sst [smem:[#allocation15_spill]] %s6298_s13  ;;  %s214_s14 = sand.u32 1, %s6161_s25  }
  0x20   : > { %p6306_p0 = por %p106_p12, %p6271_p6  ;;  %p6312_p1 = pnand %p5110_p13, %p6265_p5 }
  0x21   : > { %s216_s9 = sand.u32 1, %s6129_s17   ;;  %s5034_s8 = sshll.u32 %s6157_s24, 5 }
  0x22   : > { %s7200_s18 = scalar_select %p6306_p0, 1, 0 }
  0x23   : > { %s6317_s10 = sshll.u32 %s216_s9, 1  ;;  %s7202_s2 = sld [smem:[#allocation17_spill]] }
  0x24   : > { %s218_s6 = scalar_lea.vmem [#allocation5], %s6317_s10  ;;  %p6330_p2 = pnand %p5110_p13, %p6290_p11 }
  0x25   : > { %s226_s5 = sshll.u32 %s218_s6, 4  ;;  %s6337_s26 = scalar_lea.hbm %s7177_s3, %s5034_s8  ;;  %s6326_s5 = int_to_ptr.vmem [resolvable:$true] %s226_s5 }
  0x26   : > { %s6340_s29 = scalar_lea.sflag [#allocation6], %s214_s14  ;;  %p7186_p5 = pneg %p6330_p2 }
  0x29   : > { %s6323_s15 = scalar_lea.hbm %s7202_s2, %s5034_s8  ;;  %s5982_s12 = scalar_lea.hbm %s7202_s2, 64 }
  0x2a   : > { %s5977_s13 = scalar_lea.hbm %s6323_s15, 32  ;;  %p5983_p9 = scmp.lt.u32.totalorder %s6323_s15, %s7202_s2 }
  0x2b   : > { %p5978_p4 = scmp.ne.s32.totalorder %s6323_s15, %s5977_s13  ;;  %p5984_p10 = scmp.lt.u32.totalorder %s5982_s12, %s5977_s13 }
  0x2c   : > { %p5986_p12 = scmp.lt.u32.totalorder %s5977_s13, %s6323_s15 }
  0x2d   : > { %p5980_p6 = pnand %p7186_p5, %p5978_p4  ;;  %p5985_p11 = por %p5984_p10, %p5983_p9 }
  0x2f   : > { %p5981_p8 = pneg %p5980_p6  ;;  %p5987_p13 = por %p5986_p12, %p5985_p11 }
  0x31   : > { %p5988_p3 = pnand %p5987_p13, %p5981_p8 }
  0x33   : > { %5991 = shalt.err (!%p5988_p3)
}
  0x34   : > { %s5992_s14 = scalar_lea.vmem %s6326_s5, 32  ;;  %s6163_s8 = smov [#allocation5]  }
  0x35   : > { %p5993_p4 = scmp.ne.s32.totalorder %s6326_s5, %s5992_s14  ;;  %s5997_s11 = sshll.u32 %s6163_s8, 4  ;;  %s5998_s11 = int_to_ptr.vmem [resolvable:$false] %s5997_s11 }
  0x36   : > { %s5999_s6 = scalar_lea.vmem %s5998_s11, 64  ;;  %p6000_p7 = scmp.lt.s32.totalorder %s6326_s5, %s5998_s11 }
  0x37   : > { %p5995_p6 = pnand %p5993_p4, %p7186_p5  ;;  %p6001_p9 = scmp.lt.s32.totalorder %s5999_s6, %s5992_s14 }
  0x39   : > { %p5996_p0 = pneg %p5995_p6  ;;  %p6002_p10 = por %p6001_p9, %p6000_p7 }
  0x3b   : > { %p6003_p11 = pnand %p6002_p10, %p5996_p0 }
  0x3d   : > { %6006 = shalt.err (!%p6003_p11)
}
  0x3e   : > { %5106 = dma.hbm_to_vmem [thread:$0]  (!%p6330_p2), %s6323_s15, 32, %s6326_s5, %s6340_s29  }
  0x3f   : > { %p250_p3 = scmp.lt.s32.totalorder %s6161_s25, 5  ;;  %p7204_p8 = scmp.ge.s32.totalorder %s6161_s25, 1 }
  0x40   : > { %s190_s13 = sand.u32 1, %s6141_s20   ;;  %s4501_s27 = sshll.u32 %s6157_s24, 1 }
  0x41   : > { %p6371_p12 = pnand %p7204_p8, %p250_p3  ;;  %s4499_s9 = sshll.u32 %s190_s13, 12 }
  0x42   : > { %s5033_s14 = sshll.u32 %s6153_s23, 11  ;;  %s194_s11 = scalar_lea.vmem [#allocation3], %s4499_s9 }
  0x43   : > { %s7205_s12 = scalar_select %p6371_p12, 1, 0 }
  0x44   : > { %s201_s8 = sadd.s32 %s5033_s14, %s4501_s27  ;;  %s204_s6 = sshll.u32 %s194_s11, 4  ;;  %s6378_s6 = int_to_ptr.vmem [resolvable:$true] %s204_s6 }
  0x45   : > { %s4503_s2 = sshll.u32 %s201_s8, 6  ;;  %s7206_s1 = sld [smem:[#allocation16_spill]] }
  0x46   : > { %s6385_s4 = scalar_lea.sflag [#allocation4], %s190_s13  ;;  %p6009_p0 = pneg %p6312_p1 }
  0x4b   : > { %s6383_s5 = scalar_lea.hbm %s7206_s1, %s4503_s2  ;;  %s6012_s17 = scalar_lea.hbm %s7206_s1, 262144 }
  0x4c   : > { %s6007_s24 = scalar_lea.hbm %s6383_s5, 65536  ;;  %p6013_p6 = scmp.lt.u32.totalorder %s6383_s5, %s7206_s1 }
  0x4d   : > { %p6008_p7 = scmp.ne.s32.totalorder %s6383_s5, %s6007_s24  ;;  %p6014_p9 = scmp.lt.u32.totalorder %s6012_s17, %s6007_s24 }
  0x4e   : > { %p6016_p11 = scmp.lt.u32.totalorder %s6007_s24, %s6383_s5 }
  0x4f   : > { %p6010_p13 = pnand %p6009_p0, %p6008_p7  ;;  %p6015_p10 = por %p6014_p9, %p6013_p6 }
  0x51   : > { %p6011_p4 = pneg %p6010_p13  ;;  %p6017_p3 = por %p6016_p11, %p6015_p10 }
  0x53   : > { %p6018_p8 = pnand %p6017_p3, %p6011_p4 }
  0x55   : > { %6021 = shalt.err (!%p6018_p8)
}
  0x56   : > { %s6022_s13 = scalar_lea.vmem %s6378_s6, 65536  ;;  %s6164_s8 = smov [#allocation3]  }
  0x57   : > { %p6023_p7 = scmp.ne.s32.totalorder %s6378_s6, %s6022_s13  ;;  %s6027_s11 = sshll.u32 %s6164_s8, 4  ;;  %s6028_s11 = int_to_ptr.vmem [resolvable:$false] %s6027_s11 }
  0x58   : > { %s6029_s15 = scalar_lea.vmem %s6028_s11, 131072  ;;  %p6030_p12 = scmp.lt.s32.totalorder %s6378_s6, %s6028_s11 }
  0x59   : > { %p6025_p13 = pnand %p6023_p7, %p6009_p0  ;;  %p6031_p6 = scmp.lt.s32.totalorder %s6029_s15, %s6022_s13 }
  0x5b   : > { %p6026_p5 = pneg %p6025_p13  ;;  %p6032_p9 = por %p6031_p6, %p6030_p12 }
  0x5d   : > { %p6033_p10 = pnand %p6032_p9, %p6026_p5 }
  0x5f   : > { %6036 = shalt.err (!%p6033_p10)
}
  0x60   : > { %s6165_s24 = smov 256   ;;  %s6166_s27 = smov 128  }
  0x61   : > { %s6167_s9 = smov 8   ;;  %s237_s17 = scalar_lea.vmem [#allocation7], %s6317_s10 }
  0x62   : > { %5103 = dma.hbm_to_vmem [thread:$0]  (!%p6312_p1), %s6383_s5, 65536, %s6378_s6, %s6385_s4, %s6165_s24, %s6166_s27, %s6167_s9  }
  0x63   : > { %s245_s2 = sshll.u32 %s237_s17, 4  ;;  %s6037_s14 = scalar_lea.hbm %s6337_s26, 32  ;;  %s246_s2 = int_to_ptr.vmem [resolvable:$true] %s245_s2 }
  0x64   : > { %p6038_p5 = scmp.ne.s32.totalorder %s6337_s26, %s6037_s14  ;;  %p7207_p12 = pneg %p6330_p2 }
  0x65   : > { %s6042_s11 = scalar_lea.hbm %s7177_s3, 64  ;;  %p6043_p11 = scmp.lt.u32.totalorder %s6337_s26, %s7177_s3 }
  0x66   : > { %p6040_p0 = pnand %p6038_p5, %p7207_p12  ;;  %p6044_p3 = scmp.lt.u32.totalorder %s6042_s11, %s6037_s14 }
  0x67   : > { %p6046_p1 = scmp.lt.u32.totalorder %s6037_s14, %s6337_s26 }
  0x68   : > { %p6041_p4 = pneg %p6040_p0  ;;  %p6045_p8 = por %p6044_p3, %p6043_p11 }
  0x6a   : > { %p6047_p7 = por %p6046_p1, %p6045_p8 }
  0x6c   : > { %p6048_p13 = pnand %p6047_p7, %p6041_p4 }
  0x6e   : > { %6051 = shalt.err (!%p6048_p13)
}
  0x6f   : > { %s6052_s4 = scalar_lea.vmem %s246_s2, 32  ;;  %p7208_p9 = pmov %p7207_p12 }
  0x70   : > { %p6053_p6 = scmp.ne.s32.totalorder %s246_s2, %s6052_s4  ;;  %s6168_s30 = smov [#allocation7]  }
  0x71   : > { %s6057_s10 = sshll.u32 %s6168_s30, 4  ;;  %s6058_s10 = int_to_ptr.vmem [resolvable:$false] %s6057_s10 }
  0x72   : > { %p6055_p10 = pnand %p6053_p6, %p7208_p9  ;;  %s6059_s6 = scalar_lea.vmem %s6058_s10, 64 }
  0x73   : > { %p6060_p12 = scmp.lt.s32.totalorder %s246_s2, %s6058_s10  ;;  %p6061_p0 = scmp.lt.s32.totalorder %s6059_s6, %s6052_s4 }
  0x74   : > { %p6056_p5 = pneg %p6055_p10 }
  0x75   : > { %p6062_p3 = por %p6061_p0, %p6060_p12 }
  0x77   : > { %p6063_p11 = pnand %p6062_p3, %p6056_p5 }
  0x79   : > { %6066 = shalt.err (!%p6063_p11)
}
  0x7a   : > { %5109 = dma.hbm_to_vmem [thread:$0]  (!%p6330_p2), %s6337_s26, 32, %s246_s2, %s6340_s29  }
  0x7b   : > { %p7209_p4 = scmp.ne.s32.totalorder %s7205_s12, 0 }
  0x7c   : > { %s256_s1 = sand.u32 (!%p7209_p4), 1, %s6137_s19   ;;  %p7210_p8 = scmp.ne.s32.totalorder (!%p7209_p4), %s7196_s7, 0 }
  0x7d   : > { %254 = sbr.rel (%p7209_p4) target bundleno = 901 (0x385), region = 36  ;;  %s4511_s5 = sshll.u32 (!%p7209_p4), %s256_s1, 12 }
  0x7e   : > { %s257_s24 = scalar_lea.sflag (!%p7209_p4), [#allocation4], %s256_s1  ;;  %s6437_s27 = scalar_lea.vmem (!%p7209_p4), [#allocation3], %s4511_s5 }
  0x84   : > { %6112 = dma.done.wait (%p7210_p8), %s257_s24, 65536  }
  0x85   : > { %6114 = vsyncadd (%p7210_p8), %s257_s24, 4294901760  ;;  %s7211_s28 = sadd.s32 4294967295, %s6161_s25   ;;  %s267_s29 = sand.u32 1, %s6125_s16  }
  0x86   : > { %s265_s26 = sand.u32 1, %s7211_s28   ;;  %s6446_s12 = sshll.u32 %s267_s29, 1 }
  0x87   : > { %s266_s9 = scalar_lea.sflag [#allocation6], %s265_s26  ;;  %s269_s17 = scalar_lea.vmem [#allocation5], %s6446_s12 }
  0x88   : > { %p7212_p2 = scmp.ne.s32.totalorder %s7200_s18, 0 }
  0x8a   : > { %6116 = dma.done.wait (%p7212_p2), %s266_s9, 64  }
  0x8b   : > { %6118 = vsyncadd (%p7212_p2), %s266_s9, 4294967232  ;;  %s4514_s7 = sshll.u32 %s6145_s21, 5  ;;  %s4515_s2 = sshll.u32 %s6149_s22, 1 }
  0x8c   : > { %p318_p1 = scmp.lt.s32.totalorder %s4514_s7, 63  ;;  %p327_p7 = scmp.lt.s32.totalorder %s4515_s2, 3 }
  0x8d   : > { %s7213_s30 = sld [smem:[#allocation18_spill]]  ;;  %s278_s10 = scalar_lea.vmem [#allocation7], %s6446_s12 }
  0x8e   : > { %s7235_s7 = smov (!%p318_p1, %s4514_s7), 63  ;;  %s7237_s2 = smov (!%p327_p7, %s4515_s2), 3 }
  0x8f   : > { %s6458_s8 = scalar_lea.vmem %s7174_s0, %s7235_s7  ;;  %s4516_s11 = sshll.u32 %s7237_s2, 1 }
  0x90   : > { %p4517_p13 = scmp.ne.s32.totalorder %s6145_s21, 0 }
  0x91   : > { %v6169_v0 = vmov (!%p4517_p13), 0.0  }
  0x92   : > { %335 = sbr.rel (%p4517_p13) target bundleno = 153 (0x99), region = 52  ;;  %336 = vst [vmem:[#allocation2] sm:$0xf] (!%p4517_p13), %v6169_v0 }
  0x93   : > { %s6463_s18 = scalar_lea.vmem %s7213_s30, %s4516_s11 }
  0x99 PF: > { %v5205_v1 = vld [vmem:[%s6437_s27 + $0x4] ss:$8 sps:$4 sm:$0xff]   ;;  %v5209_v3 = vld [vmem:[%s6437_s27] ss:$8 sps:$4 sm:$0xff]   ;;  %v5211_v5 = vld [vmem:[%s6437_s27 + $0x14] ss:$8 sps:$4 sm:$0xff]   ;;  %v862_v39 = vlaneseq }
  0x9a   : > { %v5207_v2 = vld [vmem:[%s6437_s27 + $0x804] ss:$8 sps:$4 sm:$0xff]   ;;  %3646 = vmatprep.subr.bf16.mxu1 %v5205_v1  ;;  %v5210_v4 = vld [vmem:[%s6437_s27 + $0x800] ss:$8 sps:$4 sm:$0xff]   ;;  %v5213_v6 = vld [vmem:[%s6437_s27 + $0x814] ss:$8 sps:$4 sm:$0xff]  }
  0x9b   : > { %3974 = vmatprep.subr.bf16.mxu0 %v5207_v2  ;;  %3647 = vmatpush1.bf16.msra.mxu1 %v5209_v3  ;;  %v5215_v7 = vld [vmem:[%s6437_s27 + $0x10] ss:$8 sps:$4 sm:$0xff]   ;;  %v5217_v9 = vld [vmem:[%s6437_s27 + $0x24] ss:$8 sps:$4 sm:$0xff]   ;;  %v5221_v11 = vld [vmem:[%s6437_s27 + $0x20] ss:$8 sps:$4 sm:$0xff]  }
  0x9c   : > { %3975 = vmatpush1.bf16.msra.mxu0 %v5210_v4  ;;  %3648 = vmatprep.subr.bf16.mxu1 %v5211_v5  ;;  %v5216_v8 = vld [vmem:[%s6437_s27 + $0x810] ss:$8 sps:$4 sm:$0xff]   ;;  %v5219_v10 = vld [vmem:[%s6437_s27 + $0x824] ss:$8 sps:$4 sm:$0xff]   ;;  %v5222_v12 = vld [vmem:[%s6437_s27 + $0x820] ss:$8 sps:$4 sm:$0xff]  }
  0x9d   : > { %3976 = vmatprep.subr.bf16.mxu0 %v5213_v6  ;;  %v5223_v13 = vld [vmem:[%s6437_s27 + $0x34] ss:$8 sps:$4 sm:$0xff]   ;;  %v5227_v15 = vld [vmem:[%s6437_s27 + $0x30] ss:$8 sps:$4 sm:$0xff]   ;;  %v5229_v17 = vld [vmem:[%s6437_s27 + $0x44] ss:$8 sps:$4 sm:$0xff]  }
  0x9e   : > { %v5225_v14 = vld [vmem:[%s6437_s27 + $0x834] ss:$8 sps:$4 sm:$0xff]   ;;  %v5228_v16 = vld [vmem:[%s6437_s27 + $0x830] ss:$8 sps:$4 sm:$0xff]   ;;  %v5231_v18 = vld [vmem:[%s6437_s27 + $0x844] ss:$8 sps:$4 sm:$0xff]  }
  0x9f   : > { %3649 = vmatpush1.bf16.msra.mxu1 %v5215_v7  ;;  %v5233_v19 = vld [vmem:[%s6437_s27 + $0x40] ss:$8 sps:$4 sm:$0xff]   ;;  %v5235_v21 = vld [vmem:[%s6437_s27 + $0x54] ss:$8 sps:$4 sm:$0xff]   ;;  %v5239_v23 = vld [vmem:[%s6437_s27 + $0x50] ss:$8 sps:$4 sm:$0xff]  }
  0xa0   : > { %3977 = vmatpush1.bf16.msra.mxu0 %v5216_v8  ;;  %3650 = vmatprep.subr.bf16.mxu1 %v5217_v9  ;;  %v5234_v20 = vld [vmem:[%s6437_s27 + $0x840] ss:$8 sps:$4 sm:$0xff]   ;;  %v5237_v22 = vld [vmem:[%s6437_s27 + $0x854] ss:$8 sps:$4 sm:$0xff]   ;;  %v5240_v24 = vld [vmem:[%s6437_s27 + $0x850] ss:$8 sps:$4 sm:$0xff]  }
  0xa1   : > { %3978 = vmatprep.subr.bf16.mxu0 %v5219_v10  ;;  %v5241_v25 = vld [vmem:[%s6437_s27 + $0x64] ss:$8 sps:$4 sm:$0xff]   ;;  %v5245_v27 = vld [vmem:[%s6437_s27 + $0x60] ss:$8 sps:$4 sm:$0xff]   ;;  %v5247_v29 = vld [vmem:[%s6437_s27 + $0x74] ss:$8 sps:$4 sm:$0xff]  }
  0xa2   : > { %v5243_v26 = vld [vmem:[%s6437_s27 + $0x864] ss:$8 sps:$4 sm:$0xff]   ;;  %v5246_v28 = vld [vmem:[%s6437_s27 + $0x860] ss:$8 sps:$4 sm:$0xff]   ;;  %v5249_v30 = vld [vmem:[%s6437_s27 + $0x874] ss:$8 sps:$4 sm:$0xff]  }
  0xa3   : > { %3651 = vmatpush1.bf16.msra.mxu1 %v5221_v11  ;;  %v5251_v31 = vld [vmem:[%s6437_s27 + $0x70] ss:$8 sps:$4 sm:$0xff]   ;;  %v5253_v33 = vld [vmem:[%s6437_s27 + $0x84] ss:$8 sps:$4 sm:$0xff]   ;;  %v5257_v35 = vld [vmem:[%s6437_s27 + $0x80] ss:$8 sps:$4 sm:$0xff]  }
  0xa4   : > { %3979 = vmatpush1.bf16.msra.mxu0 %v5222_v12  ;;  %3652 = vmatprep.subr.bf16.mxu1 %v5223_v13  ;;  %v5252_v32 = vld [vmem:[%s6437_s27 + $0x870] ss:$8 sps:$4 sm:$0xff]   ;;  %v5255_v34 = vld [vmem:[%s6437_s27 + $0x884] ss:$8 sps:$4 sm:$0xff]   ;;  %v5258_v36 = vld [vmem:[%s6437_s27 + $0x880] ss:$8 sps:$4 sm:$0xff]  }
  0xa5   : > { %3980 = vmatprep.subr.bf16.mxu0 %v5225_v14  ;;  %v6170_v37 = vmov 1966171168   ;;  %v5259_v40 = vld [vmem:[%s6437_s27 + $0x94] ss:$8 sps:$4 sm:$0xff]   ;;  %v5263_v42 = vld [vmem:[%s6437_s27 + $0x90] ss:$8 sps:$4 sm:$0xff]  }
  0xa6   : > { %v860_v38 = vunpack.c.l.s4 %v6170_v37  ;;  %v5261_v41 = vld [vmem:[%s6437_s27 + $0x894] ss:$8 sps:$4 sm:$0xff]   ;;  %v6506_v44 = vshrl.u32 %v862_v39, 7  ;;  %v5264_v45 = vld [vmem:[%s6437_s27 + $0x890] ss:$8 sps:$4 sm:$0xff]   ;;  %p5030_p6 = scmp.ne.s32.totalorder %s6145_s21, 1 }
  0xa7   : > { %3653 = vmatpush1.bf16.msra.mxu1 %v5227_v15  ;;  %v5265_v46 = vld [vmem:[%s6437_s27 + $0xa4] ss:$8 sps:$4 sm:$0xff]   ;;  %v5269_v48 = vld [vmem:[%s6437_s27 + $0xa0] ss:$8 sps:$4 sm:$0xff]   ;;  %v5271_v51 = vld [vmem:[%s6437_s27 + $0xb4] ss:$8 sps:$4 sm:$0xff]  }
  0xa8   : > { %3981 = vmatpush1.bf16.msra.mxu0 %v5228_v16  ;;  %3654 = vmatprep.subr.bf16.mxu1 %v5229_v17  ;;  %v861_v43 = vunpack.c.0.s8 %v860_v38  ;;  %v5267_v47 = vld [vmem:[%s6437_s27 + $0x8a4] ss:$8 sps:$4 sm:$0xff]   ;;  %v5270_v49 = vld [vmem:[%s6437_s27 + $0x8a0] ss:$8 sps:$4 sm:$0xff]   ;;  %v5273_v52 = vld [vmem:[%s6437_s27 + $0x8b4] ss:$8 sps:$4 sm:$0xff]  }
  0xa9   : > { %3982 = vmatprep.subr.bf16.mxu0 %v5231_v18  ;;  %v6519_v53 = vld [vmem:[%s6458_s8] sm:$0xff]  ;;  %v5275_v54 = vld [vmem:[%s6437_s27 + $0xb0] ss:$8 sps:$4 sm:$0xff]   ;;  %v5277_v58 = vld [vmem:[%s6437_s27 + $0xc4] ss:$8 sps:$4 sm:$0xff]  }
  0xaa   : > { %v6514_v50 = vsub.s32 %v861_v43, %v6506_v44  ;;  %v5276_v56 = vld [vmem:[%s6437_s27 + $0x8b0] ss:$8 sps:$4 sm:$0xff]   ;;  %v5279_v59 = vld [vmem:[%s6437_s27 + $0x8c4] ss:$8 sps:$4 sm:$0xff]   ;;  %v5281_v0 = vld [vmem:[%s6437_s27 + $0xc0] ss:$8 sps:$4 sm:$0xff]  }
  0xab   : > { %3655 = vmatpush1.bf16.msra.mxu1 %v5233_v19  ;;  %v6526_v57 = vld [vmem:[%s6458_s8 + $0x10] sm:$0xff]  ;;  %v5282_v1 = vld [vmem:[%s6437_s27 + $0x8c0] ss:$8 sps:$4 sm:$0xff]   ;;  %v5283_v2 = vld [vmem:[%s6437_s27 + $0xd4] ss:$8 sps:$4 sm:$0xff]  }
  0xac   : > { %3983 = vmatpush1.bf16.msra.mxu0 %v5234_v20  ;;  %3656 = vmatprep.subr.bf16.mxu1 %v5235_v21  ;;  %v865_v55 = vrot.slane %v6519_v53, %v6514_v50  ;;  %v963_v61 = vrot.slane %v6526_v57, %v6514_v50  ;;  %v5285_v3 = vld [vmem:[%s6437_s27 + $0x8d4] ss:$8 sps:$4 sm:$0xff]   ;;  %v5287_v5 = vld [vmem:[%s6437_s27 + $0xd0] ss:$8 sps:$4 sm:$0xff]   ;;  %v5289_v7 = vld [vmem:[%s6437_s27 + $0xe4] ss:$8 sps:$4 sm:$0xff]  }
  0xad   : > { %3984 = vmatprep.subr.bf16.mxu0 %v5237_v22  ;;  %v5288_v6 = vld [vmem:[%s6437_s27 + $0x8d0] ss:$8 sps:$4 sm:$0xff]   ;;  %v5291_v8 = vld [vmem:[%s6437_s27 + $0x8e4] ss:$8 sps:$4 sm:$0xff]   ;;  %v5293_v9 = vld [vmem:[%s6437_s27 + $0xe0] ss:$8 sps:$4 sm:$0xff]  }
  0xae   : > { %v873_v60 = vcombine.high %v865_v55, %v865_v55  ;;  %v971_v63 = vcombine.high %v963_v61, %v963_v61  ;;  %v5294_v10 = vld [vmem:[%s6437_s27 + $0x8e0] ss:$8 sps:$4 sm:$0xff]   ;;  %v5295_v11 = vld [vmem:[%s6437_s27 + $0xf4] ss:$8 sps:$4 sm:$0xff]   ;;  %v5299_v13 = vld [vmem:[%s6437_s27 + $0xf0] ss:$8 sps:$4 sm:$0xff]   ;;  %v6551_v17 = vrot.slane %v865_v55, %v6514_v50  ;;  %v6554_v18 = vrot.slane %v963_v61, %v6514_v50 }
  0xaf   : > { %3657 = vmatpush1.bf16.msra.mxu1 %v5239_v23  ;;  %v5297_v12 = vld [vmem:[%s6437_s27 + $0x8f4] ss:$8 sps:$4 sm:$0xff]   ;;  %v5300_v14 = vld [vmem:[%s6437_s27 + $0x8f0] ss:$8 sps:$4 sm:$0xff]   ;;  %v5304_v15 = vld [vmem:[%s6437_s27 + $0x104] ss:$8 sps:$4 sm:$0xff]  }
  0xb0   : > { %3985 = vmatpush1.bf16.msra.mxu0 %v5240_v24  ;;  %3658 = vmatprep.subr.bf16.mxu1 %v5241_v25  ;;  %v895_v62 = vrot.slane %v873_v60, %v6514_v50  ;;  %v993_v4 = vrot.slane %v971_v63, %v6514_v50  ;;  %v5308_v16 = vld [vmem:[%s6437_s27 + $0x904] ss:$8 sps:$4 sm:$0xff]   ;;  %v5302_v19 = vld [vmem:[%s6437_s27 + $0x100] ss:$8 sps:$4 sm:$0xff]   ;;  %v5311_v21 = vld [vmem:[%s6437_s27 + $0x114] ss:$8 sps:$4 sm:$0xff]  }
  0xb1   : > { %3986 = vmatprep.subr.bf16.mxu0 %v5243_v26  ;;  %v5306_v20 = vld [vmem:[%s6437_s27 + $0x900] ss:$8 sps:$4 sm:$0xff]   ;;  %v5314_v22 = vld [vmem:[%s6437_s27 + $0x914] ss:$8 sps:$4 sm:$0xff]   ;;  %v5309_v25 = vld [vmem:[%s6437_s27 + $0x110] ss:$8 sps:$4 sm:$0xff]  }
  0xb2   : > { %3678 = vmatprep.mubr.bf16.mxu1 %v895_v62  ;;  %4006 = vmatprep.mubr.bf16.mxu0 %v993_v4  ;;  %v905_v23 = vcombine.high %v895_v62, %v895_v62  ;;  %v1003_v24 = vcombine.high %v993_v4, %v993_v4  ;;  %v5312_v26 = vld [vmem:[%s6437_s27 + $0x910] ss:$8 sps:$4 sm:$0xff]   ;;  %v5327_v37 = vld [vmem:[%s6437_s27 + $0x140] ss:$8 sps:$4 sm:$0xff]   ;;  %v5335_v39 = vld [vmem:[%s6437_s27 + $0x154] ss:$8 sps:$4 sm:$0xff]  }
  0xb3   : > { %3659 = vmatpush1.bf16.msra.mxu1 %v5245_v27  ;;  %v5317_v27 = vld [vmem:[%s6437_s27 + $0x124] ss:$8 sps:$4 sm:$0xff]   ;;  %v5330_v38 = vld [vmem:[%s6437_s27 + $0x940] ss:$8 sps:$4 sm:$0xff]   ;;  %v5362_v60 = vld [vmem:[%s6437_s27 + $0x994] ss:$8 sps:$4 sm:$0xff]  }
  0xb4   : > { %3987 = vmatpush1.bf16.msra.mxu0 %v5246_v28  ;;  %3660 = vmatprep.subr.bf16.mxu1 %v5247_v29  ;;  %v5320_v28 = vld [vmem:[%s6437_s27 + $0x924] ss:$8 sps:$4 sm:$0xff]   ;;  %v5315_v29 = vld [vmem:[%s6437_s27 + $0x120] ss:$8 sps:$4 sm:$0xff]   ;;  %v5357_v61 = vld [vmem:[%s6437_s27 + $0x190] ss:$8 sps:$4 sm:$0xff]  }
  0xb5   : > { %3988 = vmatprep.subr.bf16.mxu0 %v5249_v30  ;;  %v5318_v30 = vld [vmem:[%s6437_s27 + $0x920] ss:$8 sps:$4 sm:$0xff]   ;;  %v5341_v43 = vld [vmem:[%s6437_s27 + $0x164] ss:$8 sps:$4 sm:$0xff]   ;;  %v5360_v62 = vld [vmem:[%s6437_s27 + $0x990] ss:$8 sps:$4 sm:$0xff]  }
  0xb6   : > { %v5356_v55 = vld [vmem:[%s6437_s27 + $0x984] ss:$8 sps:$4 sm:$0xff]   ;;  %v5374_v4 = vld [vmem:[%s6437_s27 + $0x9b4] ss:$8 sps:$4 sm:$0xff]  }
  0xb7   : > { %3661 = vmatpush1.bf16.msra.mxu1 %v5251_v31  ;;  %v5323_v31 = vld [vmem:[%s6437_s27 + $0x134] ss:$8 sps:$4 sm:$0xff]   ;;  %v5365_v63 = vld [vmem:[%s6437_s27 + $0x1a4] ss:$8 sps:$4 sm:$0xff]  }
  0xb8   : > { %3989 = vmatpush1.bf16.msra.mxu0 %v5252_v32  ;;  %3662 = vmatprep.subr.bf16.mxu1 %v5253_v33  ;;  %v5326_v32 = vld [vmem:[%s6437_s27 + $0x934] ss:$8 sps:$4 sm:$0xff]   ;;  %v5321_v33 = vld [vmem:[%s6437_s27 + $0x130] ss:$8 sps:$4 sm:$0xff]  }
  0xb9   : > { %3990 = vmatprep.subr.bf16.mxu0 %v5255_v34  ;;  %v5324_v34 = vld [vmem:[%s6437_s27 + $0x930] ss:$8 sps:$4 sm:$0xff]  }
  0xbb   : > { %3663 = vmatpush1.bf16.msra.mxu1 %v5257_v35  ;;  %v5329_v35 = vld [vmem:[%s6437_s27 + $0x144] ss:$8 sps:$4 sm:$0xff]  }
  0xbc   : > { %3991 = vmatpush1.bf16.msra.mxu0 %v5258_v36  ;;  %3664 = vmatprep.subr.bf16.mxu1 %v5259_v40  ;;  %v5332_v36 = vld [vmem:[%s6437_s27 + $0x944] ss:$8 sps:$4 sm:$0xff]   ;;  %v5338_v40 = vld [vmem:[%s6437_s27 + $0x954] ss:$8 sps:$4 sm:$0xff]  }
  0xbd   : > { %3992 = vmatprep.subr.bf16.mxu0 %v5261_v41  ;;  %v5333_v41 = vld [vmem:[%s6437_s27 + $0x150] ss:$8 sps:$4 sm:$0xff]  }
  0xbf   : > { %3665 = vmatpush1.bf16.msra.mxu1 %v5263_v42  ;;  %v5336_v42 = vld [vmem:[%s6437_s27 + $0x950] ss:$8 sps:$4 sm:$0xff]  }
  0xc0   : > { %3993 = vmatpush1.bf16.msra.mxu0 %v5264_v45  ;;  %3666 = vmatprep.subr.bf16.mxu1 %v5265_v46  ;;  %v5344_v45 = vld [vmem:[%s6437_s27 + $0x964] ss:$8 sps:$4 sm:$0xff]   ;;  %v5339_v46 = vld [vmem:[%s6437_s27 + $0x160] ss:$8 sps:$4 sm:$0xff]  }
  0xc1   : > { %3994 = vmatprep.subr.bf16.mxu0 %v5267_v47  ;;  %v5342_v47 = vld [vmem:[%s6437_s27 + $0x960] ss:$8 sps:$4 sm:$0xff]  }
  0xc3   : > { %3667 = vmatpush1.bf16.msra.mxu1 %v5269_v48  ;;  %v5347_v48 = vld [vmem:[%s6437_s27 + $0x174] ss:$8 sps:$4 sm:$0xff]  }
  0xc4   : > { %3995 = vmatpush1.bf16.msra.mxu0 %v5270_v49  ;;  %3668 = vmatprep.subr.bf16.mxu1 %v5271_v51  ;;  %v5350_v49 = vld [vmem:[%s6437_s27 + $0x974] ss:$8 sps:$4 sm:$0xff]   ;;  %v5345_v51 = vld [vmem:[%s6437_s27 + $0x170] ss:$8 sps:$4 sm:$0xff]  }
  0xc5   : > { %3996 = vmatprep.subr.bf16.mxu0 %v5273_v52  ;;  %v5348_v52 = vld [vmem:[%s6437_s27 + $0x970] ss:$8 sps:$4 sm:$0xff]  }
  0xc7   : > { %3669 = vmatpush1.bf16.msra.mxu1 %v5275_v54  ;;  %v5353_v54 = vld [vmem:[%s6437_s27 + $0x184] ss:$8 sps:$4 sm:$0xff]  }
  0xc8   : > { %3997 = vmatpush1.bf16.msra.mxu0 %v5276_v56  ;;  %3670 = vmatprep.subr.bf16.mxu1 %v5277_v58  ;;  %v5351_v56 = vld [vmem:[%s6437_s27 + $0x180] ss:$8 sps:$4 sm:$0xff]  }
  0xc9   : > { %3998 = vmatprep.subr.bf16.mxu0 %v5279_v59  ;;  %v5354_v58 = vld [vmem:[%s6437_s27 + $0x980] ss:$8 sps:$4 sm:$0xff]   ;;  %v5359_v59 = vld [vmem:[%s6437_s27 + $0x194] ss:$8 sps:$4 sm:$0xff]  }
  0xcb   : > { %3671 = vmatpush1.bf16.msra.mxu1 %v5281_v0  ;;  %v5368_v0 = vld [vmem:[%s6437_s27 + $0x9a4] ss:$8 sps:$4 sm:$0xff]  }
  0xcc   : > { %3999 = vmatpush1.bf16.msra.mxu0 %v5282_v1  ;;  %3672 = vmatprep.subr.bf16.mxu1 %v5283_v2  ;;  %v5363_v1 = vld [vmem:[%s6437_s27 + $0x1a0] ss:$8 sps:$4 sm:$0xff]  }
  0xcd   : > { %4000 = vmatprep.subr.bf16.mxu0 %v5285_v3  ;;  %v5366_v2 = vld [vmem:[%s6437_s27 + $0x9a0] ss:$8 sps:$4 sm:$0xff]   ;;  %v5371_v3 = vld [vmem:[%s6437_s27 + $0x1b4] ss:$8 sps:$4 sm:$0xff]  }
  0xcf   : > { %3673 = vmatpush1.bf16.msra.mxu1 %v5287_v5  ;;  %v5369_v5 = vld [vmem:[%s6437_s27 + $0x1b0] ss:$8 sps:$4 sm:$0xff]  }
  0xd0   : > { %4001 = vmatpush1.bf16.msra.mxu0 %v5288_v6  ;;  %3674 = vmatprep.subr.bf16.mxu1 %v5289_v7  ;;  %v5372_v6 = vld [vmem:[%s6437_s27 + $0x9b0] ss:$8 sps:$4 sm:$0xff]   ;;  %v5377_v7 = vld [vmem:[%s6437_s27 + $0x1c4] ss:$8 sps:$4 sm:$0xff]  }
  0xd1   : > { %4002 = vmatprep.subr.bf16.mxu0 %v5291_v8  ;;  %v5380_v8 = vld [vmem:[%s6437_s27 + $0x9c4] ss:$8 sps:$4 sm:$0xff]  }
  0xd3   : > { %3675 = vmatpush1.bf16.msra.mxu1 %v5293_v9  ;;  %v5375_v9 = vld [vmem:[%s6437_s27 + $0x1c0] ss:$8 sps:$4 sm:$0xff]  }
  0xd4   : > { %4003 = vmatpush1.bf16.msra.mxu0 %v5294_v10  ;;  %3676 = vmatprep.subr.bf16.mxu1 %v5295_v11  ;;  %v5378_v10 = vld [vmem:[%s6437_s27 + $0x9c0] ss:$8 sps:$4 sm:$0xff]   ;;  %v5383_v11 = vld [vmem:[%s6437_s27 + $0x1d4] ss:$8 sps:$4 sm:$0xff]  }
  0xd5   : > { %4004 = vmatprep.subr.bf16.mxu0 %v5297_v12  ;;  %v5386_v12 = vld [vmem:[%s6437_s27 + $0x9d4] ss:$8 sps:$4 sm:$0xff]  }
  0xd7   : > { %3677 = vmatpush1.bf16.msra.mxu1 %v5299_v13  ;;  %v5381_v13 = vld [vmem:[%s6437_s27 + $0x1d0] ss:$8 sps:$4 sm:$0xff]  }
  0xd8   : > { %4005 = vmatpush1.bf16.msra.mxu0 %v5300_v14  ;;  %3687 = vmatprep.subr.bf16.mxu1 %v5304_v15  ;;  %v5384_v14 = vld [vmem:[%s6437_s27 + $0x9d0] ss:$8 sps:$4 sm:$0xff]   ;;  %v5389_v15 = vld [vmem:[%s6437_s27 + $0x1e4] ss:$8 sps:$4 sm:$0xff]  }
  0xd9   : > { %4015 = vmatprep.subr.bf16.mxu0 %v5308_v16  ;;  %v5392_v16 = vld [vmem:[%s6437_s27 + $0x9e4] ss:$8 sps:$4 sm:$0xff]  }
  0xda   : > { %3679 = vmatmul.mubr.bf16.vlgmr.msra.gmra.mrb[0].mxu1 %v6551_v17 }
  0xdb   : > { %4007 = vmatmul.mubr.bf16.vlgmr.msra.gmra.mrb[0].mxu0 %v6554_v18  ;;  %3688 = vmatpush1.bf16.msra.mxu1 %v5302_v19  ;;  %v858_v19 = vcombine.high %v6519_v53, %v6519_v53  ;;  %v5393_v53 = vld [vmem:[%s6437_s27 + $0x1f0] ss:$8 sps:$4 sm:$0xff]  }
  0xdc   : > { %4016 = vmatpush1.bf16.msra.mxu0 %v5306_v20  ;;  %3689 = vmatprep.subr.bf16.mxu1 %v5311_v21  ;;  %v956_v20 = vcombine.high %v6526_v57, %v6526_v57  ;;  %v5387_v21 = vld [vmem:[%s6437_s27 + $0x1e0] ss:$8 sps:$4 sm:$0xff]   ;;  %v5396_v57 = vld [vmem:[%s6437_s27 + $0x9f0] ss:$8 sps:$4 sm:$0xff]  }
  0xdd   : > { %4017 = vmatprep.subr.bf16.mxu0 %v5314_v22  ;;  %3719 = vmatprep.mubr.bf16.mxu1 %v905_v23  ;;  %v5390_v22 = vld [vmem:[%s6437_s27 + $0x9e0] ss:$8 sps:$4 sm:$0xff]   ;;  %v5395_v23 = vld [vmem:[%s6437_s27 + $0x1f4] ss:$8 sps:$4 sm:$0xff]  }
  0xde   : > { %4047 = vmatprep.mubr.bf16.mxu0 %v1003_v24  ;;  %v5398_v24 = vld [vmem:[%s6437_s27 + $0x9f4] ss:$8 sps:$4 sm:$0xff]  }
  0xdf   : > { %3690 = vmatpush1.bf16.msra.mxu1 %v5309_v25  ;;  %v6623_v25 = vrot.slane %v858_v19, %v6514_v50  ;;  %v5465_v19 = vld [vmem:[%s6437_s27 + $0x2b0] ss:$8 sps:$4 sm:$0xff]  }
  0xe0   : > { %4018 = vmatpush1.bf16.msra.mxu0 %v5312_v26  ;;  %3691 = vmatprep.subr.bf16.mxu1 %v5317_v27  ;;  %v6626_v26 = vrot.slane %v956_v20, %v6514_v50  ;;  %v5401_v27 = vld [vmem:[%s6437_s27 + $0x204] ss:$8 sps:$4 sm:$0xff]   ;;  %v5468_v20 = vld [vmem:[%s6437_s27 + $0xab0] ss:$8 sps:$4 sm:$0xff]  }
  0xe1   : > { %4019 = vmatprep.subr.bf16.mxu0 %v5320_v28  ;;  %v5404_v28 = vld [vmem:[%s6437_s27 + $0xa04] ss:$8 sps:$4 sm:$0xff]  }
  0xe3   : > { %3692 = vmatpush1.bf16.msra.mxu1 %v5315_v29  ;;  %v874_v29 = vcombine.high %v6623_v25, %v6623_v25 }
  0xe4   : > { %4020 = vmatpush1.bf16.msra.mxu0 %v5318_v30  ;;  %3693 = vmatprep.subr.bf16.mxu1 %v5323_v31  ;;  %v972_v30 = vcombine.high %v6626_v26, %v6626_v26  ;;  %v903_v31 = vcombine.high %v6551_v17, %v6551_v17 }
  0xe5   : > { %4021 = vmatprep.subr.bf16.mxu0 %v5326_v32  ;;  %v1001_v32 = vcombine.high %v6554_v18, %v6554_v18  ;;  %v5405_v18 = vld [vmem:[%s6437_s27 + $0x210] ss:$8 sps:$4 sm:$0xff]  }
  0xe6   : > { %v6648_v17 = vrot.slane %v972_v30, %v6514_v50  ;;  %v5488_v30 = vld [vmem:[%s6437_s27 + $0xae4] ss:$8 sps:$4 sm:$0xff]  }
  0xe7   : > { %3694 = vmatpush1.bf16.msra.mxu1 %v5321_v33  ;;  %v5399_v33 = vld [vmem:[%s6437_s27 + $0x200] ss:$8 sps:$4 sm:$0xff]  }
  0xe8   : > { %4022 = vmatpush1.bf16.msra.mxu0 %v5324_v34  ;;  %3695 = vmatprep.subr.bf16.mxu1 %v5329_v35  ;;  %v5402_v34 = vld [vmem:[%s6437_s27 + $0xa00] ss:$8 sps:$4 sm:$0xff]   ;;  %v5407_v35 = vld [vmem:[%s6437_s27 + $0x214] ss:$8 sps:$4 sm:$0xff]  }
  0xe9   : > { %4023 = vmatprep.subr.bf16.mxu0 %v5332_v36  ;;  %v5410_v36 = vld [vmem:[%s6437_s27 + $0xa14] ss:$8 sps:$4 sm:$0xff]  }
  0xeb   : > { %3696 = vmatpush1.bf16.msra.mxu1 %v5327_v37  ;;  %v6645_v37 = vrot.slane %v874_v29, %v6514_v50  ;;  %v5485_v29 = vld [vmem:[%s6437_s27 + $0x2e4] ss:$8 sps:$4 sm:$0xff]  }
  0xec   : > { %4024 = vmatpush1.bf16.msra.mxu0 %v5330_v38  ;;  %3697 = vmatprep.subr.bf16.mxu1 %v5335_v39  ;;  %v5408_v38 = vld [vmem:[%s6437_s27 + $0xa10] ss:$8 sps:$4 sm:$0xff]   ;;  %v5413_v39 = vld [vmem:[%s6437_s27 + $0x224] ss:$8 sps:$4 sm:$0xff]  }
  0xed   : > { %4025 = vmatprep.subr.bf16.mxu0 %v5338_v40  ;;  %v5416_v40 = vld [vmem:[%s6437_s27 + $0xa24] ss:$8 sps:$4 sm:$0xff]  }
  0xef   : > { %3698 = vmatpush1.bf16.msra.mxu1 %v5333_v41  ;;  %v5411_v41 = vld [vmem:[%s6437_s27 + $0x220] ss:$8 sps:$4 sm:$0xff]  }
  0xf0   : > { %4026 = vmatpush1.bf16.msra.mxu0 %v5336_v42  ;;  %3699 = vmatprep.subr.bf16.mxu1 %v5341_v43  ;;  %v5414_v42 = vld [vmem:[%s6437_s27 + $0xa20] ss:$8 sps:$4 sm:$0xff]   ;;  %v5419_v43 = vld [vmem:[%s6437_s27 + $0x234] ss:$8 sps:$4 sm:$0xff]  }
  0xf1   : > { %4027 = vmatprep.subr.bf16.mxu0 %v5344_v45  ;;  %v5422_v45 = vld [vmem:[%s6437_s27 + $0xa34] ss:$8 sps:$4 sm:$0xff]  }
  0xf3   : > { %3700 = vmatpush1.bf16.msra.mxu1 %v5339_v46  ;;  %v5417_v46 = vld [vmem:[%s6437_s27 + $0x230] ss:$8 sps:$4 sm:$0xff]  }
  0xf4   : > { %4028 = vmatpush1.bf16.msra.mxu0 %v5342_v47  ;;  %3701 = vmatprep.subr.bf16.mxu1 %v5347_v48  ;;  %v5420_v47 = vld [vmem:[%s6437_s27 + $0xa30] ss:$8 sps:$4 sm:$0xff]   ;;  %v5425_v48 = vld [vmem:[%s6437_s27 + $0x244] ss:$8 sps:$4 sm:$0xff]  }
  0xf5   : > { %4029 = vmatprep.subr.bf16.mxu0 %v5350_v49  ;;  %v5428_v49 = vld [vmem:[%s6437_s27 + $0xa44] ss:$8 sps:$4 sm:$0xff]  }
  0xf7   : > { %3702 = vmatpush1.bf16.msra.mxu1 %v5345_v51  ;;  %v5423_v51 = vld [vmem:[%s6437_s27 + $0x240] ss:$8 sps:$4 sm:$0xff]  }
  0xf8   : > { %4030 = vmatpush1.bf16.msra.mxu0 %v5348_v52  ;;  %3703 = vmatprep.subr.bf16.mxu1 %v5353_v54  ;;  %v5426_v52 = vld [vmem:[%s6437_s27 + $0xa40] ss:$8 sps:$4 sm:$0xff]   ;;  %v5431_v54 = vld [vmem:[%s6437_s27 + $0x254] ss:$8 sps:$4 sm:$0xff]  }
  0xf9   : > { %4031 = vmatprep.subr.bf16.mxu0 %v5356_v55  ;;  %v5434_v55 = vld [vmem:[%s6437_s27 + $0xa54] ss:$8 sps:$4 sm:$0xff]  }
  0xfb   : > { %3704 = vmatpush1.bf16.msra.mxu1 %v5351_v56  ;;  %v5429_v56 = vld [vmem:[%s6437_s27 + $0x250] ss:$8 sps:$4 sm:$0xff]  }
  0xfc   : > { %4032 = vmatpush1.bf16.msra.mxu0 %v5354_v58  ;;  %3705 = vmatprep.subr.bf16.mxu1 %v5359_v59  ;;  %v5432_v58 = vld [vmem:[%s6437_s27 + $0xa50] ss:$8 sps:$4 sm:$0xff]   ;;  %v5437_v59 = vld [vmem:[%s6437_s27 + $0x264] ss:$8 sps:$4 sm:$0xff]  }
  0xfd   : > { %4033 = vmatprep.subr.bf16.mxu0 %v5362_v60  ;;  %v5440_v60 = vld [vmem:[%s6437_s27 + $0xa64] ss:$8 sps:$4 sm:$0xff]  }
  0xff   : > { %3706 = vmatpush1.bf16.msra.mxu1 %v5357_v61  ;;  %v5435_v61 = vld [vmem:[%s6437_s27 + $0x260] ss:$8 sps:$4 sm:$0xff]  }
 0x100   : > { %4034 = vmatpush1.bf16.msra.mxu0 %v5360_v62  ;;  %3707 = vmatprep.subr.bf16.mxu1 %v5365_v63  ;;  %v5438_v62 = vld [vmem:[%s6437_s27 + $0xa60] ss:$8 sps:$4 sm:$0xff]   ;;  %v5443_v63 = vld [vmem:[%s6437_s27 + $0x274] ss:$8 sps:$4 sm:$0xff]  }
 0x101   : > { %4035 = vmatprep.subr.bf16.mxu0 %v5368_v0  ;;  %v5446_v0 = vld [vmem:[%s6437_s27 + $0xa74] ss:$8 sps:$4 sm:$0xff]  }
 0x103   : > { %3708 = vmatpush1.bf16.msra.mxu1 %v5363_v1  ;;  %v5441_v1 = vld [vmem:[%s6437_s27 + $0x270] ss:$8 sps:$4 sm:$0xff]  }
 0x104   : > { %4036 = vmatpush1.bf16.msra.mxu0 %v5366_v2  ;;  %3709 = vmatprep.subr.bf16.mxu1 %v5371_v3  ;;  %v5444_v2 = vld [vmem:[%s6437_s27 + $0xa70] ss:$8 sps:$4 sm:$0xff]   ;;  %v5449_v3 = vld [vmem:[%s6437_s27 + $0x284] ss:$8 sps:$4 sm:$0xff]  }
 0x105   : > { %4037 = vmatprep.subr.bf16.mxu0 %v5374_v4  ;;  %v5452_v4 = vld [vmem:[%s6437_s27 + $0xa84] ss:$8 sps:$4 sm:$0xff]  }
 0x107   : > { %3710 = vmatpush1.bf16.msra.mxu1 %v5369_v5  ;;  %v5447_v5 = vld [vmem:[%s6437_s27 + $0x280] ss:$8 sps:$4 sm:$0xff]  }
 0x108   : > { %4038 = vmatpush1.bf16.msra.mxu0 %v5372_v6  ;;  %3711 = vmatprep.subr.bf16.mxu1 %v5377_v7  ;;  %v5450_v6 = vld [vmem:[%s6437_s27 + $0xa80] ss:$8 sps:$4 sm:$0xff]   ;;  %v5455_v7 = vld [vmem:[%s6437_s27 + $0x294] ss:$8 sps:$4 sm:$0xff]  }
 0x109   : > { %4039 = vmatprep.subr.bf16.mxu0 %v5380_v8  ;;  %v5458_v8 = vld [vmem:[%s6437_s27 + $0xa94] ss:$8 sps:$4 sm:$0xff]  }
 0x10b   : > { %3712 = vmatpush1.bf16.msra.mxu1 %v5375_v9  ;;  %v5453_v9 = vld [vmem:[%s6437_s27 + $0x290] ss:$8 sps:$4 sm:$0xff]  }
 0x10c   : > { %4040 = vmatpush1.bf16.msra.mxu0 %v5378_v10  ;;  %3713 = vmatprep.subr.bf16.mxu1 %v5383_v11  ;;  %v5456_v10 = vld [vmem:[%s6437_s27 + $0xa90] ss:$8 sps:$4 sm:$0xff]   ;;  %v5461_v11 = vld [vmem:[%s6437_s27 + $0x2a4] ss:$8 sps:$4 sm:$0xff]  }
 0x10d   : > { %4041 = vmatprep.subr.bf16.mxu0 %v5386_v12  ;;  %v5464_v12 = vld [vmem:[%s6437_s27 + $0xaa4] ss:$8 sps:$4 sm:$0xff]  }
 0x10f   : > { %3714 = vmatpush1.bf16.msra.mxu1 %v5381_v13  ;;  %v5459_v13 = vld [vmem:[%s6437_s27 + $0x2a0] ss:$8 sps:$4 sm:$0xff]  }
 0x110   : > { %4042 = vmatpush1.bf16.msra.mxu0 %v5384_v14  ;;  %3715 = vmatprep.subr.bf16.mxu1 %v5389_v15  ;;  %v5462_v14 = vld [vmem:[%s6437_s27 + $0xaa0] ss:$8 sps:$4 sm:$0xff]   ;;  %v5467_v15 = vld [vmem:[%s6437_s27 + $0x2b4] ss:$8 sps:$4 sm:$0xff]  }
 0x111   : > { %4043 = vmatprep.subr.bf16.mxu0 %v5392_v16  ;;  %v5470_v16 = vld [vmem:[%s6437_s27 + $0xab4] ss:$8 sps:$4 sm:$0xff]  }
 0x113   : > { %3716 = vmatpush1.bf16.msra.mxu1 %v5387_v21  ;;  %v5473_v21 = vld [vmem:[%s6437_s27 + $0x2c4] ss:$8 sps:$4 sm:$0xff]  }
 0x114   : > { %4044 = vmatpush1.bf16.msra.mxu0 %v5390_v22  ;;  %3717 = vmatprep.subr.bf16.mxu1 %v5395_v23  ;;  %v5476_v22 = vld [vmem:[%s6437_s27 + $0xac4] ss:$8 sps:$4 sm:$0xff]   ;;  %v5471_v23 = vld [vmem:[%s6437_s27 + $0x2c0] ss:$8 sps:$4 sm:$0xff]  }
 0x115   : > { %4045 = vmatprep.subr.bf16.mxu0 %v5398_v24  ;;  %v5474_v24 = vld [vmem:[%s6437_s27 + $0xac0] ss:$8 sps:$4 sm:$0xff]  }
 0x117   : > { %3718 = vmatpush1.bf16.msra.mxu1 %v5393_v53  ;;  %v5479_v53 = vld [vmem:[%s6437_s27 + $0x2d4] ss:$8 sps:$4 sm:$0xff]  }
 0x118   : > { %4046 = vmatpush1.bf16.msra.mxu0 %v5396_v57  ;;  %3728 = vmatprep.subr.bf16.mxu1 %v5401_v27  ;;  %v5482_v57 = vld [vmem:[%s6437_s27 + $0xad4] ss:$8 sps:$4 sm:$0xff]   ;;  %v5477_v27 = vld [vmem:[%s6437_s27 + $0x2d0] ss:$8 sps:$4 sm:$0xff]  }
 0x119   : > { %4056 = vmatprep.subr.bf16.mxu0 %v5404_v28  ;;  %v5480_v28 = vld [vmem:[%s6437_s27 + $0xad0] ss:$8 sps:$4 sm:$0xff]  }
 0x11a   : > { %3720 = vmatmul.mubr.bf16.vlgmr.msra.gmra.mrb[0].mxu1 %v903_v31  ;;  %v5483_v31 = vld [vmem:[%s6437_s27 + $0x2e0] ss:$8 sps:$4 sm:$0xff]  }
 0x11b   : > { %4048 = vmatmul.mubr.bf16.vlgmr.msra.gmra.mrb[0].mxu0 %v1001_v32  ;;  %3729 = vmatpush1.bf16.msra.mxu1 %v5399_v33  ;;  %v5486_v32 = vld [vmem:[%s6437_s27 + $0xae0] ss:$8 sps:$4 sm:$0xff]   ;;  %v5491_v33 = vld [vmem:[%s6437_s27 + $0x2f4] ss:$8 sps:$4 sm:$0xff]  }
 0x11c   : > { %4057 = vmatpush1.bf16.msra.mxu0 %v5402_v34  ;;  %3730 = vmatprep.subr.bf16.mxu1 %v5407_v35  ;;  %v5494_v34 = vld [vmem:[%s6437_s27 + $0xaf4] ss:$8 sps:$4 sm:$0xff]   ;;  %v5489_v35 = vld [vmem:[%s6437_s27 + $0x2f0] ss:$8 sps:$4 sm:$0xff]  }
 0x11d   : > { %4058 = vmatprep.subr.bf16.mxu0 %v5410_v36  ;;  %3760 = vmatprep.mubr.bf16.mxu1 %v6645_v37  ;;  %v5492_v36 = vld [vmem:[%s6437_s27 + $0xaf0] ss:$8 sps:$4 sm:$0xff]  }
 0x11e   : > { %4088 = vmatprep.mubr.bf16.mxu0 %v6648_v17 }
 0x11f   : > { %3731 = vmatpush1.bf16.msra.mxu1 %v5405_v18  ;;  %v5497_v18 = vld [vmem:[%s6437_s27 + $0x304] ss:$8 sps:$4 sm:$0xff]  }
 0x120   : > { %4059 = vmatpush1.bf16.msra.mxu0 %v5408_v38  ;;  %3732 = vmatprep.subr.bf16.mxu1 %v5413_v39  ;;  %v5500_v38 = vld [vmem:[%s6437_s27 + $0xb04] ss:$8 sps:$4 sm:$0xff]   ;;  %v6714_v39 = vrot.slane %v6623_v25, %v6514_v50  ;;  %v906_v25 = vcombine.high %v6645_v37, %v6645_v37 }
 0x121   : > { %4060 = vmatprep.subr.bf16.mxu0 %v5416_v40  ;;  %v6718_v40 = vrot.slane %v6626_v26, %v6514_v50  ;;  %v5501_v26 = vld [vmem:[%s6437_s27 + $0x310] ss:$8 sps:$4 sm:$0xff]   ;;  %v5509_v37 = vld [vmem:[%s6437_s27 + $0x324] ss:$8 sps:$4 sm:$0xff]  }
 0x123   : > { %3733 = vmatpush1.bf16.msra.mxu1 %v5411_v41  ;;  %v5495_v41 = vld [vmem:[%s6437_s27 + $0x300] ss:$8 sps:$4 sm:$0xff]  }
 0x124   : > { %4061 = vmatpush1.bf16.msra.mxu0 %v5414_v42  ;;  %3734 = vmatprep.subr.bf16.mxu1 %v5419_v43  ;;  %v5498_v42 = vld [vmem:[%s6437_s27 + $0xb00] ss:$8 sps:$4 sm:$0xff]   ;;  %v5503_v43 = vld [vmem:[%s6437_s27 + $0x314] ss:$8 sps:$4 sm:$0xff]  }
 0x125   : > { %4062 = vmatprep.subr.bf16.mxu0 %v5422_v45  ;;  %v5506_v45 = vld [vmem:[%s6437_s27 + $0xb14] ss:$8 sps:$4 sm:$0xff]  }
 0x127   : > { %3735 = vmatpush1.bf16.msra.mxu1 %v5417_v46  ;;  %v1004_v46 = vcombine.high %v6648_v17, %v6648_v17  ;;  %v5507_v17 = vld [vmem:[%s6437_s27 + $0x320] ss:$8 sps:$4 sm:$0xff]  }
 0x128   : > { %4063 = vmatpush1.bf16.msra.mxu0 %v5420_v47  ;;  %3736 = vmatprep.subr.bf16.mxu1 %v5425_v48  ;;  %v5504_v47 = vld [vmem:[%s6437_s27 + $0xb10] ss:$8 sps:$4 sm:$0xff]   ;;  %v5512_v48 = vld [vmem:[%s6437_s27 + $0xb24] ss:$8 sps:$4 sm:$0xff]  }
 0x129   : > { %4064 = vmatprep.subr.bf16.mxu0 %v5428_v49  ;;  %v5510_v49 = vld [vmem:[%s6437_s27 + $0xb20] ss:$8 sps:$4 sm:$0xff]  }
 0x12b   : > { %3737 = vmatpush1.bf16.msra.mxu1 %v5423_v51  ;;  %v5515_v51 = vld [vmem:[%s6437_s27 + $0x334] ss:$8 sps:$4 sm:$0xff]  }
 0x12c   : > { %4065 = vmatpush1.bf16.msra.mxu0 %v5426_v52  ;;  %3738 = vmatprep.subr.bf16.mxu1 %v5431_v54  ;;  %v5518_v52 = vld [vmem:[%s6437_s27 + $0xb34] ss:$8 sps:$4 sm:$0xff]   ;;  %v5513_v54 = vld [vmem:[%s6437_s27 + $0x330] ss:$8 sps:$4 sm:$0xff]  }
 0x12d   : > { %4066 = vmatprep.subr.bf16.mxu0 %v5434_v55  ;;  %v5516_v55 = vld [vmem:[%s6437_s27 + $0xb30] ss:$8 sps:$4 sm:$0xff]  }
 0x12f   : > { %3739 = vmatpush1.bf16.msra.mxu1 %v5429_v56  ;;  %v5521_v56 = vld [vmem:[%s6437_s27 + $0x344] ss:$8 sps:$4 sm:$0xff]  }
 0x130   : > { %4067 = vmatpush1.bf16.msra.mxu0 %v5432_v58  ;;  %3740 = vmatprep.subr.bf16.mxu1 %v5437_v59  ;;  %v5524_v58 = vld [vmem:[%s6437_s27 + $0xb44] ss:$8 sps:$4 sm:$0xff]   ;;  %v5519_v59 = vld [vmem:[%s6437_s27 + $0x340] ss:$8 sps:$4 sm:$0xff]  }
 0x131   : > { %4068 = vmatprep.subr.bf16.mxu0 %v5440_v60  ;;  %v5522_v60 = vld [vmem:[%s6437_s27 + $0xb40] ss:$8 sps:$4 sm:$0xff]  }
 0x133   : > { %3741 = vmatpush1.bf16.msra.mxu1 %v5435_v61  ;;  %v5527_v61 = vld [vmem:[%s6437_s27 + $0x354] ss:$8 sps:$4 sm:$0xff]  }
 0x134   : > { %4069 = vmatpush1.bf16.msra.mxu0 %v5438_v62  ;;  %3742 = vmatprep.subr.bf16.mxu1 %v5443_v63  ;;  %v5530_v62 = vld [vmem:[%s6437_s27 + $0xb54] ss:$8 sps:$4 sm:$0xff]   ;;  %v5525_v63 = vld [vmem:[%s6437_s27 + $0x350] ss:$8 sps:$4 sm:$0xff]  }
 0x135   : > { %4070 = vmatprep.subr.bf16.mxu0 %v5446_v0  ;;  %v5528_v0 = vld [vmem:[%s6437_s27 + $0xb50] ss:$8 sps:$4 sm:$0xff]  }
 0x137   : > { %3743 = vmatpush1.bf16.msra.mxu1 %v5441_v1  ;;  %v5533_v1 = vld [vmem:[%s6437_s27 + $0x364] ss:$8 sps:$4 sm:$0xff]  }
 0x138   : > { %4071 = vmatpush1.bf16.msra.mxu0 %v5444_v2  ;;  %3744 = vmatprep.subr.bf16.mxu1 %v5449_v3  ;;  %v5536_v2 = vld [vmem:[%s6437_s27 + $0xb64] ss:$8 sps:$4 sm:$0xff]   ;;  %v5531_v3 = vld [vmem:[%s6437_s27 + $0x360] ss:$8 sps:$4 sm:$0xff]  }
 0x139   : > { %4072 = vmatprep.subr.bf16.mxu0 %v5452_v4  ;;  %v5534_v4 = vld [vmem:[%s6437_s27 + $0xb60] ss:$8 sps:$4 sm:$0xff]  }
 0x13b   : > { %3745 = vmatpush1.bf16.msra.mxu1 %v5447_v5  ;;  %v5539_v5 = vld [vmem:[%s6437_s27 + $0x374] ss:$8 sps:$4 sm:$0xff]  }
 0x13c   : > { %4073 = vmatpush1.bf16.msra.mxu0 %v5450_v6  ;;  %3746 = vmatprep.subr.bf16.mxu1 %v5455_v7  ;;  %v5542_v6 = vld [vmem:[%s6437_s27 + $0xb74] ss:$8 sps:$4 sm:$0xff]   ;;  %v5537_v7 = vld [vmem:[%s6437_s27 + $0x370] ss:$8 sps:$4 sm:$0xff]  }
 0x13d   : > { %4074 = vmatprep.subr.bf16.mxu0 %v5458_v8  ;;  %v5540_v8 = vld [vmem:[%s6437_s27 + $0xb70] ss:$8 sps:$4 sm:$0xff]  }
 0x13f   : > { %3747 = vmatpush1.bf16.msra.mxu1 %v5453_v9  ;;  %v5545_v9 = vld [vmem:[%s6437_s27 + $0x384] ss:$8 sps:$4 sm:$0xff]  }
 0x140   : > { %4075 = vmatpush1.bf16.msra.mxu0 %v5456_v10  ;;  %3748 = vmatprep.subr.bf16.mxu1 %v5461_v11  ;;  %v5548_v10 = vld [vmem:[%s6437_s27 + $0xb84] ss:$8 sps:$4 sm:$0xff]   ;;  %v5543_v11 = vld [vmem:[%s6437_s27 + $0x380] ss:$8 sps:$4 sm:$0xff]  }
 0x141   : > { %4076 = vmatprep.subr.bf16.mxu0 %v5464_v12  ;;  %v5546_v12 = vld [vmem:[%s6437_s27 + $0xb80] ss:$8 sps:$4 sm:$0xff]  }
 0x143   : > { %3749 = vmatpush1.bf16.msra.mxu1 %v5459_v13  ;;  %v5551_v13 = vld [vmem:[%s6437_s27 + $0x394] ss:$8 sps:$4 sm:$0xff]  }
 0x144   : > { %4077 = vmatpush1.bf16.msra.mxu0 %v5462_v14  ;;  %3750 = vmatprep.subr.bf16.mxu1 %v5467_v15  ;;  %v5554_v14 = vld [vmem:[%s6437_s27 + $0xb94] ss:$8 sps:$4 sm:$0xff]   ;;  %v5549_v15 = vld [vmem:[%s6437_s27 + $0x390] ss:$8 sps:$4 sm:$0xff]  }
 0x145   : > { %4078 = vmatprep.subr.bf16.mxu0 %v5470_v16  ;;  %v5552_v16 = vld [vmem:[%s6437_s27 + $0xb90] ss:$8 sps:$4 sm:$0xff]  }
 0x147   : > { %3751 = vmatpush1.bf16.msra.mxu1 %v5465_v19  ;;  %v5557_v19 = vld [vmem:[%s6437_s27 + $0x3a4] ss:$8 sps:$4 sm:$0xff]  }
 0x148   : > { %4079 = vmatpush1.bf16.msra.mxu0 %v5468_v20  ;;  %3752 = vmatprep.subr.bf16.mxu1 %v5473_v21  ;;  %v5560_v20 = vld [vmem:[%s6437_s27 + $0xba4] ss:$8 sps:$4 sm:$0xff]   ;;  %v5555_v21 = vld [vmem:[%s6437_s27 + $0x3a0] ss:$8 sps:$4 sm:$0xff]  }
 0x149   : > { %4080 = vmatprep.subr.bf16.mxu0 %v5476_v22  ;;  %v5558_v22 = vld [vmem:[%s6437_s27 + $0xba0] ss:$8 sps:$4 sm:$0xff]  }
 0x14b   : > { %3753 = vmatpush1.bf16.msra.mxu1 %v5471_v23  ;;  %v5563_v23 = vld [vmem:[%s6437_s27 + $0x3b4] ss:$8 sps:$4 sm:$0xff]  }
 0x14c   : > { %4081 = vmatpush1.bf16.msra.mxu0 %v5474_v24  ;;  %3754 = vmatprep.subr.bf16.mxu1 %v5479_v53  ;;  %v5566_v24 = vld [vmem:[%s6437_s27 + $0xbb4] ss:$8 sps:$4 sm:$0xff]   ;;  %v5561_v53 = vld [vmem:[%s6437_s27 + $0x3b0] ss:$8 sps:$4 sm:$0xff]  }
 0x14d   : > { %4082 = vmatprep.subr.bf16.mxu0 %v5482_v57  ;;  %v5564_v57 = vld [vmem:[%s6437_s27 + $0xbb0] ss:$8 sps:$4 sm:$0xff]  }
 0x14f   : > { %3755 = vmatpush1.bf16.msra.mxu1 %v5477_v27  ;;  %v5569_v27 = vld [vmem:[%s6437_s27 + $0x3c4] ss:$8 sps:$4 sm:$0xff]  }
 0x150   : > { %4083 = vmatpush1.bf16.msra.mxu0 %v5480_v28  ;;  %3756 = vmatprep.subr.bf16.mxu1 %v5485_v29  ;;  %v5572_v28 = vld [vmem:[%s6437_s27 + $0xbc4] ss:$8 sps:$4 sm:$0xff]   ;;  %v5567_v29 = vld [vmem:[%s6437_s27 + $0x3c0] ss:$8 sps:$4 sm:$0xff]  }
 0x151   : > { %4084 = vmatprep.subr.bf16.mxu0 %v5488_v30  ;;  %v5570_v30 = vld [vmem:[%s6437_s27 + $0xbc0] ss:$8 sps:$4 sm:$0xff]  }
 0x153   : > { %3757 = vmatpush1.bf16.msra.mxu1 %v5483_v31  ;;  %v5575_v31 = vld [vmem:[%s6437_s27 + $0x3d4] ss:$8 sps:$4 sm:$0xff]  }
 0x154   : > { %4085 = vmatpush1.bf16.msra.mxu0 %v5486_v32  ;;  %3758 = vmatprep.subr.bf16.mxu1 %v5491_v33  ;;  %v5578_v32 = vld [vmem:[%s6437_s27 + $0xbd4] ss:$8 sps:$4 sm:$0xff]   ;;  %v5573_v33 = vld [vmem:[%s6437_s27 + $0x3d0] ss:$8 sps:$4 sm:$0xff]  }
 0x155   : > { %4086 = vmatprep.subr.bf16.mxu0 %v5494_v34  ;;  %v5576_v34 = vld [vmem:[%s6437_s27 + $0xbd0] ss:$8 sps:$4 sm:$0xff]  }
 0x157   : > { %3759 = vmatpush1.bf16.msra.mxu1 %v5489_v35  ;;  %v5581_v35 = vld [vmem:[%s6437_s27 + $0x3e4] ss:$8 sps:$4 sm:$0xff]  }
 0x158   : > { %4087 = vmatpush1.bf16.msra.mxu0 %v5492_v36  ;;  %3769 = vmatprep.subr.bf16.mxu1 %v5497_v18  ;;  %v5584_v36 = vld [vmem:[%s6437_s27 + $0xbe4] ss:$8 sps:$4 sm:$0xff]   ;;  %v5579_v18 = vld [vmem:[%s6437_s27 + $0x3e0] ss:$8 sps:$4 sm:$0xff]  }
 0x159   : > { %4097 = vmatprep.subr.bf16.mxu0 %v5500_v38  ;;  %v5582_v38 = vld [vmem:[%s6437_s27 + $0xbe0] ss:$8 sps:$4 sm:$0xff]  }
 0x15a   : > { %3761 = vmatmul.mubr.bf16.vlgmr.msra.gmra.mrb[0].mxu1 %v6714_v39 }
 0x15b   : > { %4089 = vmatmul.mubr.bf16.vlgmr.msra.gmra.mrb[0].mxu0 %v6718_v40  ;;  %3770 = vmatpush1.bf16.msra.mxu1 %v5495_v41  ;;  %v6785_v41 = vld [vmem:[%s6458_s8 + $0x8] sm:$0xff] }
 0x15c   : > { %4098 = vmatpush1.bf16.msra.mxu0 %v5498_v42  ;;  %3771 = vmatprep.subr.bf16.mxu1 %v5503_v43  ;;  %v6788_v42 = vld [vmem:[%s6458_s8 + $0x18] sm:$0xff] }
 0x15d   : > { %4099 = vmatprep.subr.bf16.mxu0 %v5506_v45  ;;  %3801 = vmatprep.mubr.bf16.mxu1 %v906_v25  ;;  %v5587_v43 = vld [vmem:[%s6437_s27 + $0x3f4] ss:$8 sps:$4 sm:$0xff]   ;;  %v6794_v25 = vrot.slane %v6785_v41, %v6514_v50 }
 0x15e   : > { %4129 = vmatprep.mubr.bf16.mxu0 %v1004_v46  ;;  %v5590_v45 = vld [vmem:[%s6437_s27 + $0xbf4] ss:$8 sps:$4 sm:$0xff]   ;;  %v6798_v46 = vrot.slane %v6788_v42, %v6514_v50 }
 0x15f   : > { %3772 = vmatpush1.bf16.msra.mxu1 %v5501_v26  ;;  %v5585_v26 = vld [vmem:[%s6437_s27 + $0x3f0] ss:$8 sps:$4 sm:$0xff]  }
 0x160   : > { %4100 = vmatpush1.bf16.msra.mxu0 %v5504_v47  ;;  %3773 = vmatprep.subr.bf16.mxu1 %v5509_v37  ;;  %v5588_v47 = vld [vmem:[%s6437_s27 + $0xbf0] ss:$8 sps:$4 sm:$0xff]   ;;  %v5593_v37 = vld [vmem:[%s6437_s27 + $0x404] ss:$8 sps:$4 sm:$0xff]  }
 0x161   : > { %4101 = vmatprep.subr.bf16.mxu0 %v5512_v48  ;;  %v5596_v48 = vld [vmem:[%s6437_s27 + $0xc04] ss:$8 sps:$4 sm:$0xff]  }
 0x163   : > { %3774 = vmatpush1.bf16.msra.mxu1 %v5507_v17  ;;  %v922_v17 = vcombine.high %v6794_v25, %v6794_v25 }
 0x164   : > { %4102 = vmatpush1.bf16.msra.mxu0 %v5510_v49  ;;  %3775 = vmatprep.subr.bf16.mxu1 %v5515_v51  ;;  %v1020_v49 = vcombine.high %v6798_v46, %v6798_v46  ;;  %v5591_v51 = vld [vmem:[%s6437_s27 + $0x400] ss:$8 sps:$4 sm:$0xff]  }
 0x165   : > { %4103 = vmatprep.subr.bf16.mxu0 %v5518_v52  ;;  %v5594_v52 = vld [vmem:[%s6437_s27 + $0xc00] ss:$8 sps:$4 sm:$0xff]  }
 0x167   : > { %3776 = vmatpush1.bf16.msra.mxu1 %v5513_v54  ;;  %v904_v54 = vcombine.high %v6714_v39, %v6714_v39  ;;  %v5597_v39 = vld [vmem:[%s6437_s27 + $0x410] ss:$8 sps:$4 sm:$0xff]  }
 0x168   : > { %4104 = vmatpush1.bf16.msra.mxu0 %v5516_v55  ;;  %3777 = vmatprep.subr.bf16.mxu1 %v5521_v56  ;;  %v1002_v55 = vcombine.high %v6718_v40, %v6718_v40  ;;  %v5599_v56 = vld [vmem:[%s6437_s27 + $0x414] ss:$8 sps:$4 sm:$0xff]   ;;  %v5600_v40 = vld [vmem:[%s6437_s27 + $0xc10] ss:$8 sps:$4 sm:$0xff]  }
 0x169   : > { %4105 = vmatprep.subr.bf16.mxu0 %v5524_v58  ;;  %v5602_v58 = vld [vmem:[%s6437_s27 + $0xc14] ss:$8 sps:$4 sm:$0xff]  }
 0x16b   : > { %3778 = vmatpush1.bf16.msra.mxu1 %v5519_v59  ;;  %v6817_v59 = vrot.slane %v922_v17, %v6514_v50  ;;  %v5669_v17 = vld [vmem:[%s6437_s27 + $0x4d0] ss:$8 sps:$4 sm:$0xff]  }
 0x16c   : > { %4106 = vmatpush1.bf16.msra.mxu0 %v5522_v60  ;;  %3779 = vmatprep.subr.bf16.mxu1 %v5527_v61  ;;  %v6820_v60 = vrot.slane %v1020_v49, %v6514_v50  ;;  %v5605_v61 = vld [vmem:[%s6437_s27 + $0x424] ss:$8 sps:$4 sm:$0xff]   ;;  %v5672_v49 = vld [vmem:[%s6437_s27 + $0xcd0] ss:$8 sps:$4 sm:$0xff]  }
 0x16d   : > { %4107 = vmatprep.subr.bf16.mxu0 %v5530_v62  ;;  %v5608_v62 = vld [vmem:[%s6437_s27 + $0xc24] ss:$8 sps:$4 sm:$0xff]  }
 0x16f   : > { %3780 = vmatpush1.bf16.msra.mxu1 %v5525_v63  ;;  %v5603_v63 = vld [vmem:[%s6437_s27 + $0x420] ss:$8 sps:$4 sm:$0xff]  }
 0x170   : > { %4108 = vmatpush1.bf16.msra.mxu0 %v5528_v0  ;;  %3781 = vmatprep.subr.bf16.mxu1 %v5533_v1  ;;  %v5606_v0 = vld [vmem:[%s6437_s27 + $0xc20] ss:$8 sps:$4 sm:$0xff]   ;;  %v5611_v1 = vld [vmem:[%s6437_s27 + $0x434] ss:$8 sps:$4 sm:$0xff]  }
 0x171   : > { %4109 = vmatprep.subr.bf16.mxu0 %v5536_v2  ;;  %v5614_v2 = vld [vmem:[%s6437_s27 + $0xc34] ss:$8 sps:$4 sm:$0xff]  }
 0x173   : > { %3782 = vmatpush1.bf16.msra.mxu1 %v5531_v3  ;;  %v5609_v3 = vld [vmem:[%s6437_s27 + $0x430] ss:$8 sps:$4 sm:$0xff]  }
 0x174   : > { %4110 = vmatpush1.bf16.msra.mxu0 %v5534_v4  ;;  %3783 = vmatprep.subr.bf16.mxu1 %v5539_v5  ;;  %v5612_v4 = vld [vmem:[%s6437_s27 + $0xc30] ss:$8 sps:$4 sm:$0xff]   ;;  %v5617_v5 = vld [vmem:[%s6437_s27 + $0x444] ss:$8 sps:$4 sm:$0xff]  }
 0x175   : > { %4111 = vmatprep.subr.bf16.mxu0 %v5542_v6  ;;  %v5620_v6 = vld [vmem:[%s6437_s27 + $0xc44] ss:$8 sps:$4 sm:$0xff]  }
 0x177   : > { %3784 = vmatpush1.bf16.msra.mxu1 %v5537_v7  ;;  %v5615_v7 = vld [vmem:[%s6437_s27 + $0x440] ss:$8 sps:$4 sm:$0xff]  }
 0x178   : > { %4112 = vmatpush1.bf16.msra.mxu0 %v5540_v8  ;;  %3785 = vmatprep.subr.bf16.mxu1 %v5545_v9  ;;  %v5618_v8 = vld [vmem:[%s6437_s27 + $0xc40] ss:$8 sps:$4 sm:$0xff]   ;;  %v5623_v9 = vld [vmem:[%s6437_s27 + $0x454] ss:$8 sps:$4 sm:$0xff]  }
 0x179   : > { %4113 = vmatprep.subr.bf16.mxu0 %v5548_v10  ;;  %v5626_v10 = vld [vmem:[%s6437_s27 + $0xc54] ss:$8 sps:$4 sm:$0xff]  }
 0x17b   : > { %3786 = vmatpush1.bf16.msra.mxu1 %v5543_v11  ;;  %v5621_v11 = vld [vmem:[%s6437_s27 + $0x450] ss:$8 sps:$4 sm:$0xff]  }
 0x17c   : > { %4114 = vmatpush1.bf16.msra.mxu0 %v5546_v12  ;;  %3787 = vmatprep.subr.bf16.mxu1 %v5551_v13  ;;  %v5624_v12 = vld [vmem:[%s6437_s27 + $0xc50] ss:$8 sps:$4 sm:$0xff]   ;;  %v5629_v13 = vld [vmem:[%s6437_s27 + $0x464] ss:$8 sps:$4 sm:$0xff]  }
 0x17d   : > { %4115 = vmatprep.subr.bf16.mxu0 %v5554_v14  ;;  %v5632_v14 = vld [vmem:[%s6437_s27 + $0xc64] ss:$8 sps:$4 sm:$0xff]  }
 0x17f   : > { %3788 = vmatpush1.bf16.msra.mxu1 %v5549_v15  ;;  %v5627_v15 = vld [vmem:[%s6437_s27 + $0x460] ss:$8 sps:$4 sm:$0xff]  }
 0x180   : > { %4116 = vmatpush1.bf16.msra.mxu0 %v5552_v16  ;;  %3789 = vmatprep.subr.bf16.mxu1 %v5557_v19  ;;  %v5630_v16 = vld [vmem:[%s6437_s27 + $0xc60] ss:$8 sps:$4 sm:$0xff]   ;;  %v5635_v19 = vld [vmem:[%s6437_s27 + $0x474] ss:$8 sps:$4 sm:$0xff]  }
 0x181   : > { %4117 = vmatprep.subr.bf16.mxu0 %v5560_v20  ;;  %v5638_v20 = vld [vmem:[%s6437_s27 + $0xc74] ss:$8 sps:$4 sm:$0xff]  }
 0x183   : > { %3790 = vmatpush1.bf16.msra.mxu1 %v5555_v21  ;;  %v5633_v21 = vld [vmem:[%s6437_s27 + $0x470] ss:$8 sps:$4 sm:$0xff]  }
 0x184   : > { %4118 = vmatpush1.bf16.msra.mxu0 %v5558_v22  ;;  %3791 = vmatprep.subr.bf16.mxu1 %v5563_v23  ;;  %v5636_v22 = vld [vmem:[%s6437_s27 + $0xc70] ss:$8 sps:$4 sm:$0xff]   ;;  %v5641_v23 = vld [vmem:[%s6437_s27 + $0x484] ss:$8 sps:$4 sm:$0xff]  }
 0x185   : > { %4119 = vmatprep.subr.bf16.mxu0 %v5566_v24  ;;  %v5644_v24 = vld [vmem:[%s6437_s27 + $0xc84] ss:$8 sps:$4 sm:$0xff]  }
 0x187   : > { %3792 = vmatpush1.bf16.msra.mxu1 %v5561_v53  ;;  %v5639_v53 = vld [vmem:[%s6437_s27 + $0x480] ss:$8 sps:$4 sm:$0xff]  }
 0x188   : > { %4120 = vmatpush1.bf16.msra.mxu0 %v5564_v57  ;;  %3793 = vmatprep.subr.bf16.mxu1 %v5569_v27  ;;  %v5642_v57 = vld [vmem:[%s6437_s27 + $0xc80] ss:$8 sps:$4 sm:$0xff]   ;;  %v5647_v27 = vld [vmem:[%s6437_s27 + $0x494] ss:$8 sps:$4 sm:$0xff]  }
 0x189   : > { %4121 = vmatprep.subr.bf16.mxu0 %v5572_v28  ;;  %v5650_v28 = vld [vmem:[%s6437_s27 + $0xc94] ss:$8 sps:$4 sm:$0xff]  }
 0x18b   : > { %3794 = vmatpush1.bf16.msra.mxu1 %v5567_v29  ;;  %v5645_v29 = vld [vmem:[%s6437_s27 + $0x490] ss:$8 sps:$4 sm:$0xff]  }
 0x18c   : > { %4122 = vmatpush1.bf16.msra.mxu0 %v5570_v30  ;;  %3795 = vmatprep.subr.bf16.mxu1 %v5575_v31  ;;  %v5648_v30 = vld [vmem:[%s6437_s27 + $0xc90] ss:$8 sps:$4 sm:$0xff]   ;;  %v5653_v31 = vld [vmem:[%s6437_s27 + $0x4a4] ss:$8 sps:$4 sm:$0xff]  }
 0x18d   : > { %4123 = vmatprep.subr.bf16.mxu0 %v5578_v32  ;;  %v5656_v32 = vld [vmem:[%s6437_s27 + $0xca4] ss:$8 sps:$4 sm:$0xff]  }
 0x18f   : > { %3796 = vmatpush1.bf16.msra.mxu1 %v5573_v33  ;;  %v5651_v33 = vld [vmem:[%s6437_s27 + $0x4a0] ss:$8 sps:$4 sm:$0xff]  }
 0x190   : > { %4124 = vmatpush1.bf16.msra.mxu0 %v5576_v34  ;;  %3797 = vmatprep.subr.bf16.mxu1 %v5581_v35  ;;  %v5654_v34 = vld [vmem:[%s6437_s27 + $0xca0] ss:$8 sps:$4 sm:$0xff]   ;;  %v5659_v35 = vld [vmem:[%s6437_s27 + $0x4b4] ss:$8 sps:$4 sm:$0xff]  }
 0x191   : > { %4125 = vmatprep.subr.bf16.mxu0 %v5584_v36  ;;  %v5662_v36 = vld [vmem:[%s6437_s27 + $0xcb4] ss:$8 sps:$4 sm:$0xff]  }
 0x193   : > { %3798 = vmatpush1.bf16.msra.mxu1 %v5579_v18  ;;  %v5657_v18 = vld [vmem:[%s6437_s27 + $0x4b0] ss:$8 sps:$4 sm:$0xff]  }
 0x194   : > { %4126 = vmatpush1.bf16.msra.mxu0 %v5582_v38  ;;  %3799 = vmatprep.subr.bf16.mxu1 %v5587_v43  ;;  %v5660_v38 = vld [vmem:[%s6437_s27 + $0xcb0] ss:$8 sps:$4 sm:$0xff]   ;;  %v5665_v43 = vld [vmem:[%s6437_s27 + $0x4c4] ss:$8 sps:$4 sm:$0xff]  }
 0x195   : > { %4127 = vmatprep.subr.bf16.mxu0 %v5590_v45  ;;  %v5668_v45 = vld [vmem:[%s6437_s27 + $0xcc4] ss:$8 sps:$4 sm:$0xff]  }
 0x197   : > { %3800 = vmatpush1.bf16.msra.mxu1 %v5585_v26  ;;  %v5663_v26 = vld [vmem:[%s6437_s27 + $0x4c0] ss:$8 sps:$4 sm:$0xff]  }
 0x198   : > { %4128 = vmatpush1.bf16.msra.mxu0 %v5588_v47  ;;  %3810 = vmatprep.subr.bf16.mxu1 %v5593_v37  ;;  %v5666_v47 = vld [vmem:[%s6437_s27 + $0xcc0] ss:$8 sps:$4 sm:$0xff]   ;;  %v5671_v37 = vld [vmem:[%s6437_s27 + $0x4d4] ss:$8 sps:$4 sm:$0xff]  }
 0x199   : > { %4138 = vmatprep.subr.bf16.mxu0 %v5596_v48  ;;  %v5674_v48 = vld [vmem:[%s6437_s27 + $0xcd4] ss:$8 sps:$4 sm:$0xff]  }
 0x19a   : > { %3802 = vmatmul.mubr.bf16.vlgmr.msra.gmra.mrb[0].mxu1 %v904_v54  ;;  %v5675_v54 = vld [vmem:[%s6437_s27 + $0x4e0] ss:$8 sps:$4 sm:$0xff]  }
 0x19b   : > { %4130 = vmatmul.mubr.bf16.vlgmr.msra.gmra.mrb[0].mxu0 %v1002_v55  ;;  %3811 = vmatpush1.bf16.msra.mxu1 %v5591_v51  ;;  %v5677_v51 = vld [vmem:[%s6437_s27 + $0x4e4] ss:$8 sps:$4 sm:$0xff]   ;;  %v5678_v55 = vld [vmem:[%s6437_s27 + $0xce0] ss:$8 sps:$4 sm:$0xff]  }
 0x19c   : > { %4139 = vmatpush1.bf16.msra.mxu0 %v5594_v52  ;;  %3812 = vmatprep.subr.bf16.mxu1 %v5599_v56  ;;  %v5680_v52 = vld [vmem:[%s6437_s27 + $0xce4] ss:$8 sps:$4 sm:$0xff]   ;;  %v5683_v56 = vld [vmem:[%s6437_s27 + $0x4f4] ss:$8 sps:$4 sm:$0xff]  }
 0x19d   : > { %4140 = vmatprep.subr.bf16.mxu0 %v5602_v58  ;;  %3842 = vmatprep.mubr.bf16.mxu1 %v6817_v59  ;;  %v5686_v58 = vld [vmem:[%s6437_s27 + $0xcf4] ss:$8 sps:$4 sm:$0xff]  }
 0x19e   : > { %4170 = vmatprep.mubr.bf16.mxu0 %v6820_v60 }
 0x19f   : > { %3813 = vmatpush1.bf16.msra.mxu1 %v5597_v39  ;;  %v5681_v39 = vld [vmem:[%s6437_s27 + $0x4f0] ss:$8 sps:$4 sm:$0xff]  }
 0x1a0   : > { %4141 = vmatpush1.bf16.msra.mxu0 %v5600_v40  ;;  %3814 = vmatprep.subr.bf16.mxu1 %v5605_v61  ;;  %v5684_v40 = vld [vmem:[%s6437_s27 + $0xcf0] ss:$8 sps:$4 sm:$0xff]   ;;  %v5689_v61 = vld [vmem:[%s6437_s27 + $0x504] ss:$8 sps:$4 sm:$0xff]  }
 0x1a1   : > { %4142 = vmatprep.subr.bf16.mxu0 %v5608_v62  ;;  %v5692_v62 = vld [vmem:[%s6437_s27 + $0xd04] ss:$8 sps:$4 sm:$0xff]  }
 0x1a3   : > { %3815 = vmatpush1.bf16.msra.mxu1 %v5603_v63  ;;  %v6886_v63 = vrot.slane %v6794_v25, %v6514_v50  ;;  %v954_v25 = vcombine.high %v6817_v59, %v6817_v59  ;;  %v5701_v59 = vld [vmem:[%s6437_s27 + $0x524] ss:$8 sps:$4 sm:$0xff]  }
 0x1a4   : > { %4143 = vmatpush1.bf16.msra.mxu0 %v5606_v0  ;;  %3816 = vmatprep.subr.bf16.mxu1 %v5611_v1  ;;  %v6890_v0 = vrot.slane %v6798_v46, %v6514_v50  ;;  %v5687_v1 = vld [vmem:[%s6437_s27 + $0x500] ss:$8 sps:$4 sm:$0xff]   ;;  %v5693_v46 = vld [vmem:[%s6437_s27 + $0x510] ss:$8 sps:$4 sm:$0xff]  }
 0x1a5   : > { %4144 = vmatprep.subr.bf16.mxu0 %v5614_v2  ;;  %v5690_v2 = vld [vmem:[%s6437_s27 + $0xd00] ss:$8 sps:$4 sm:$0xff]  }
 0x1a7   : > { %3817 = vmatpush1.bf16.msra.mxu1 %v5609_v3  ;;  %v5695_v3 = vld [vmem:[%s6437_s27 + $0x514] ss:$8 sps:$4 sm:$0xff]  }
 0x1a8   : > { %4145 = vmatpush1.bf16.msra.mxu0 %v5612_v4  ;;  %3818 = vmatprep.subr.bf16.mxu1 %v5617_v5  ;;  %v5698_v4 = vld [vmem:[%s6437_s27 + $0xd14] ss:$8 sps:$4 sm:$0xff]   ;;  %v1052_v5 = vcombine.high %v6820_v60, %v6820_v60  ;;  %v5699_v60 = vld [vmem:[%s6437_s27 + $0x520] ss:$8 sps:$4 sm:$0xff]  }
 0x1a9   : > { %4146 = vmatprep.subr.bf16.mxu0 %v5620_v6  ;;  %v5696_v6 = vld [vmem:[%s6437_s27 + $0xd10] ss:$8 sps:$4 sm:$0xff]  }
 0x1ab   : > { %3819 = vmatpush1.bf16.msra.mxu1 %v5615_v7  ;;  %v5704_v7 = vld [vmem:[%s6437_s27 + $0xd24] ss:$8 sps:$4 sm:$0xff]  }
 0x1ac   : > { %4147 = vmatpush1.bf16.msra.mxu0 %v5618_v8  ;;  %3820 = vmatprep.subr.bf16.mxu1 %v5623_v9  ;;  %v5702_v8 = vld [vmem:[%s6437_s27 + $0xd20] ss:$8 sps:$4 sm:$0xff]   ;;  %v5707_v9 = vld [vmem:[%s6437_s27 + $0x534] ss:$8 sps:$4 sm:$0xff]  }
 0x1ad   : > { %4148 = vmatprep.subr.bf16.mxu0 %v5626_v10  ;;  %v5710_v10 = vld [vmem:[%s6437_s27 + $0xd34] ss:$8 sps:$4 sm:$0xff]  }
 0x1af   : > { %3821 = vmatpush1.bf16.msra.mxu1 %v5621_v11  ;;  %v5705_v11 = vld [vmem:[%s6437_s27 + $0x530] ss:$8 sps:$4 sm:$0xff]  }
 0x1b0   : > { %4149 = vmatpush1.bf16.msra.mxu0 %v5624_v12  ;;  %3822 = vmatprep.subr.bf16.mxu1 %v5629_v13  ;;  %v5708_v12 = vld [vmem:[%s6437_s27 + $0xd30] ss:$8 sps:$4 sm:$0xff]   ;;  %v5713_v13 = vld [vmem:[%s6437_s27 + $0x544] ss:$8 sps:$4 sm:$0xff]  }
 0x1b1   : > { %4150 = vmatprep.subr.bf16.mxu0 %v5632_v14  ;;  %v5716_v14 = vld [vmem:[%s6437_s27 + $0xd44] ss:$8 sps:$4 sm:$0xff]  }
 0x1b3   : > { %3823 = vmatpush1.bf16.msra.mxu1 %v5627_v15  ;;  %v5711_v15 = vld [vmem:[%s6437_s27 + $0x540] ss:$8 sps:$4 sm:$0xff]  }
 0x1b4   : > { %4151 = vmatpush1.bf16.msra.mxu0 %v5630_v16  ;;  %3824 = vmatprep.subr.bf16.mxu1 %v5635_v19  ;;  %v5714_v16 = vld [vmem:[%s6437_s27 + $0xd40] ss:$8 sps:$4 sm:$0xff]   ;;  %v5719_v19 = vld [vmem:[%s6437_s27 + $0x554] ss:$8 sps:$4 sm:$0xff]  }
 0x1b5   : > { %4152 = vmatprep.subr.bf16.mxu0 %v5638_v20  ;;  %v5722_v20 = vld [vmem:[%s6437_s27 + $0xd54] ss:$8 sps:$4 sm:$0xff]  }
 0x1b7   : > { %3825 = vmatpush1.bf16.msra.mxu1 %v5633_v21  ;;  %v5717_v21 = vld [vmem:[%s6437_s27 + $0x550] ss:$8 sps:$4 sm:$0xff]  }
 0x1b8   : > { %4153 = vmatpush1.bf16.msra.mxu0 %v5636_v22  ;;  %3826 = vmatprep.subr.bf16.mxu1 %v5641_v23  ;;  %v5720_v22 = vld [vmem:[%s6437_s27 + $0xd50] ss:$8 sps:$4 sm:$0xff]   ;;  %v5725_v23 = vld [vmem:[%s6437_s27 + $0x564] ss:$8 sps:$4 sm:$0xff]  }
 0x1b9   : > { %4154 = vmatprep.subr.bf16.mxu0 %v5644_v24  ;;  %v5728_v24 = vld [vmem:[%s6437_s27 + $0xd64] ss:$8 sps:$4 sm:$0xff]  }
 0x1bb   : > { %3827 = vmatpush1.bf16.msra.mxu1 %v5639_v53  ;;  %v5723_v53 = vld [vmem:[%s6437_s27 + $0x560] ss:$8 sps:$4 sm:$0xff]  }
 0x1bc   : > { %4155 = vmatpush1.bf16.msra.mxu0 %v5642_v57  ;;  %3828 = vmatprep.subr.bf16.mxu1 %v5647_v27  ;;  %v5726_v57 = vld [vmem:[%s6437_s27 + $0xd60] ss:$8 sps:$4 sm:$0xff]   ;;  %v5731_v27 = vld [vmem:[%s6437_s27 + $0x574] ss:$8 sps:$4 sm:$0xff]  }
 0x1bd   : > { %4156 = vmatprep.subr.bf16.mxu0 %v5650_v28  ;;  %v5734_v28 = vld [vmem:[%s6437_s27 + $0xd74] ss:$8 sps:$4 sm:$0xff]  }
 0x1bf   : > { %3829 = vmatpush1.bf16.msra.mxu1 %v5645_v29  ;;  %v5729_v29 = vld [vmem:[%s6437_s27 + $0x570] ss:$8 sps:$4 sm:$0xff]  }
 0x1c0   : > { %4157 = vmatpush1.bf16.msra.mxu0 %v5648_v30  ;;  %3830 = vmatprep.subr.bf16.mxu1 %v5653_v31  ;;  %v5732_v30 = vld [vmem:[%s6437_s27 + $0xd70] ss:$8 sps:$4 sm:$0xff]   ;;  %v5737_v31 = vld [vmem:[%s6437_s27 + $0x584] ss:$8 sps:$4 sm:$0xff]  }
 0x1c1   : > { %4158 = vmatprep.subr.bf16.mxu0 %v5656_v32  ;;  %v5740_v32 = vld [vmem:[%s6437_s27 + $0xd84] ss:$8 sps:$4 sm:$0xff]  }
 0x1c3   : > { %3831 = vmatpush1.bf16.msra.mxu1 %v5651_v33  ;;  %v5735_v33 = vld [vmem:[%s6437_s27 + $0x580] ss:$8 sps:$4 sm:$0xff]  }
 0x1c4   : > { %4159 = vmatpush1.bf16.msra.mxu0 %v5654_v34  ;;  %3832 = vmatprep.subr.bf16.mxu1 %v5659_v35  ;;  %v5738_v34 = vld [vmem:[%s6437_s27 + $0xd80] ss:$8 sps:$4 sm:$0xff]   ;;  %v5743_v35 = vld [vmem:[%s6437_s27 + $0x594] ss:$8 sps:$4 sm:$0xff]  }
 0x1c5   : > { %4160 = vmatprep.subr.bf16.mxu0 %v5662_v36  ;;  %v5746_v36 = vld [vmem:[%s6437_s27 + $0xd94] ss:$8 sps:$4 sm:$0xff]  }
 0x1c7   : > { %3833 = vmatpush1.bf16.msra.mxu1 %v5657_v18  ;;  %v5741_v18 = vld [vmem:[%s6437_s27 + $0x590] ss:$8 sps:$4 sm:$0xff]  }
 0x1c8   : > { %4161 = vmatpush1.bf16.msra.mxu0 %v5660_v38  ;;  %3834 = vmatprep.subr.bf16.mxu1 %v5665_v43  ;;  %v5744_v38 = vld [vmem:[%s6437_s27 + $0xd90] ss:$8 sps:$4 sm:$0xff]   ;;  %v5749_v43 = vld [vmem:[%s6437_s27 + $0x5a4] ss:$8 sps:$4 sm:$0xff]  }
 0x1c9   : > { %4162 = vmatprep.subr.bf16.mxu0 %v5668_v45  ;;  %v5752_v45 = vld [vmem:[%s6437_s27 + $0xda4] ss:$8 sps:$4 sm:$0xff]  }
 0x1cb   : > { %3835 = vmatpush1.bf16.msra.mxu1 %v5663_v26  ;;  %v5747_v26 = vld [vmem:[%s6437_s27 + $0x5a0] ss:$8 sps:$4 sm:$0xff]  }
 0x1cc   : > { %4163 = vmatpush1.bf16.msra.mxu0 %v5666_v47  ;;  %3836 = vmatprep.subr.bf16.mxu1 %v5671_v37  ;;  %v5750_v47 = vld [vmem:[%s6437_s27 + $0xda0] ss:$8 sps:$4 sm:$0xff]   ;;  %v5755_v37 = vld [vmem:[%s6437_s27 + $0x5b4] ss:$8 sps:$4 sm:$0xff]  }
 0x1cd   : > { %4164 = vmatprep.subr.bf16.mxu0 %v5674_v48  ;;  %v5758_v48 = vld [vmem:[%s6437_s27 + $0xdb4] ss:$8 sps:$4 sm:$0xff]  }
 0x1cf   : > { %3837 = vmatpush1.bf16.msra.mxu1 %v5669_v17  ;;  %v5753_v17 = vld [vmem:[%s6437_s27 + $0x5b0] ss:$8 sps:$4 sm:$0xff]  }
 0x1d0   : > { %4165 = vmatpush1.bf16.msra.mxu0 %v5672_v49  ;;  %3838 = vmatprep.subr.bf16.mxu1 %v5677_v51  ;;  %v5756_v49 = vld [vmem:[%s6437_s27 + $0xdb0] ss:$8 sps:$4 sm:$0xff]   ;;  %v5761_v51 = vld [vmem:[%s6437_s27 + $0x5c4] ss:$8 sps:$4 sm:$0xff]  }
 0x1d1   : > { %4166 = vmatprep.subr.bf16.mxu0 %v5680_v52  ;;  %v5764_v52 = vld [vmem:[%s6437_s27 + $0xdc4] ss:$8 sps:$4 sm:$0xff]  }
 0x1d3   : > { %3839 = vmatpush1.bf16.msra.mxu1 %v5675_v54  ;;  %v5759_v54 = vld [vmem:[%s6437_s27 + $0x5c0] ss:$8 sps:$4 sm:$0xff]  }
 0x1d4   : > { %4167 = vmatpush1.bf16.msra.mxu0 %v5678_v55  ;;  %3840 = vmatprep.subr.bf16.mxu1 %v5683_v56  ;;  %v5762_v55 = vld [vmem:[%s6437_s27 + $0xdc0] ss:$8 sps:$4 sm:$0xff]   ;;  %v5767_v56 = vld [vmem:[%s6437_s27 + $0x5d4] ss:$8 sps:$4 sm:$0xff]  }
 0x1d5   : > { %4168 = vmatprep.subr.bf16.mxu0 %v5686_v58  ;;  %v5770_v58 = vld [vmem:[%s6437_s27 + $0xdd4] ss:$8 sps:$4 sm:$0xff]  }
 0x1d7   : > { %3841 = vmatpush1.bf16.msra.mxu1 %v5681_v39  ;;  %v5765_v39 = vld [vmem:[%s6437_s27 + $0x5d0] ss:$8 sps:$4 sm:$0xff]  }
 0x1d8   : > { %4169 = vmatpush1.bf16.msra.mxu0 %v5684_v40  ;;  %3851 = vmatprep.subr.bf16.mxu1 %v5689_v61  ;;  %v5768_v40 = vld [vmem:[%s6437_s27 + $0xdd0] ss:$8 sps:$4 sm:$0xff]   ;;  %v5773_v61 = vld [vmem:[%s6437_s27 + $0x5e4] ss:$8 sps:$4 sm:$0xff]  }
 0x1d9   : > { %4179 = vmatprep.subr.bf16.mxu0 %v5692_v62  ;;  %v5776_v62 = vld [vmem:[%s6437_s27 + $0xde4] ss:$8 sps:$4 sm:$0xff]  }
 0x1da   : > { %3843 = vmatmul.mubr.bf16.vlgmr.msra.gmra.mrb[0].mxu1 %v6886_v63 }
 0x1db   : > { %4171 = vmatmul.mubr.bf16.vlgmr.msra.gmra.mrb[0].mxu0 %v6890_v0  ;;  %3852 = vmatpush1.bf16.msra.mxu1 %v5687_v1  ;;  %v907_v1 = vcombine.high %v6785_v41, %v6785_v41  ;;  %v5777_v41 = vld [vmem:[%s6437_s27 + $0x5f0] ss:$8 sps:$4 sm:$0xff]  }
 0x1dc   : > { %4180 = vmatpush1.bf16.msra.mxu0 %v5690_v2  ;;  %3853 = vmatprep.subr.bf16.mxu1 %v5695_v3  ;;  %v1005_v2 = vcombine.high %v6788_v42, %v6788_v42  ;;  %v5771_v3 = vld [vmem:[%s6437_s27 + $0x5e0] ss:$8 sps:$4 sm:$0xff]   ;;  %v5780_v42 = vld [vmem:[%s6437_s27 + $0xdf0] ss:$8 sps:$4 sm:$0xff]  }
 0x1dd   : > { %4181 = vmatprep.subr.bf16.mxu0 %v5698_v4  ;;  %3883 = vmatprep.mubr.bf16.mxu1 %v954_v25  ;;  %v5774_v4 = vld [vmem:[%s6437_s27 + $0xde0] ss:$8 sps:$4 sm:$0xff]   ;;  %v5779_v25 = vld [vmem:[%s6437_s27 + $0x5f4] ss:$8 sps:$4 sm:$0xff]  }
 0x1de   : > { %4211 = vmatprep.mubr.bf16.mxu0 %v1052_v5  ;;  %v5782_v5 = vld [vmem:[%s6437_s27 + $0xdf4] ss:$8 sps:$4 sm:$0xff]  }
 0x1df   : > { %3854 = vmatpush1.bf16.msra.mxu1 %v5693_v46  ;;  %v6963_v46 = vrot.slane %v907_v1, %v6514_v50  ;;  %v5849_v1 = vld [vmem:[%s6437_s27 + $0x6b0] ss:$8 sps:$4 sm:$0xff]  }
 0x1e0   : > { %4182 = vmatpush1.bf16.msra.mxu0 %v5696_v6  ;;  %3855 = vmatprep.subr.bf16.mxu1 %v5701_v59  ;;  %v6966_v6 = vrot.slane %v1005_v2, %v6514_v50  ;;  %v5785_v59 = vld [vmem:[%s6437_s27 + $0x604] ss:$8 sps:$4 sm:$0xff]   ;;  %v5852_v2 = vld [vmem:[%s6437_s27 + $0xeb0] ss:$8 sps:$4 sm:$0xff]  }
 0x1e1   : > { %4183 = vmatprep.subr.bf16.mxu0 %v5704_v7  ;;  %v5788_v7 = vld [vmem:[%s6437_s27 + $0xe04] ss:$8 sps:$4 sm:$0xff]  }
 0x1e3   : > { %3856 = vmatpush1.bf16.msra.mxu1 %v5699_v60  ;;  %v923_v60 = vcombine.high %v6963_v46, %v6963_v46 }
 0x1e4   : > { %4184 = vmatpush1.bf16.msra.mxu0 %v5702_v8  ;;  %3857 = vmatprep.subr.bf16.mxu1 %v5707_v9  ;;  %v1021_v8 = vcombine.high %v6966_v6, %v6966_v6  ;;  %v952_v9 = vcombine.high %v6886_v63, %v6886_v63 }
 0x1e5   : > { %4185 = vmatprep.subr.bf16.mxu0 %v5710_v10  ;;  %v1050_v10 = vcombine.high %v6890_v0, %v6890_v0  ;;  %v5789_v0 = vld [vmem:[%s6437_s27 + $0x610] ss:$8 sps:$4 sm:$0xff]  }
 0x1e6   : > { %v6988_v63 = vrot.slane %v1021_v8, %v6514_v50  ;;  %v5872_v8 = vld [vmem:[%s6437_s27 + $0xee4] ss:$8 sps:$4 sm:$0xff]  }
 0x1e7   : > { %3858 = vmatpush1.bf16.msra.mxu1 %v5705_v11  ;;  %v5783_v11 = vld [vmem:[%s6437_s27 + $0x600] ss:$8 sps:$4 sm:$0xff]  }
 0x1e8   : > { %4186 = vmatpush1.bf16.msra.mxu0 %v5708_v12  ;;  %3859 = vmatprep.subr.bf16.mxu1 %v5713_v13  ;;  %v5786_v12 = vld [vmem:[%s6437_s27 + $0xe00] ss:$8 sps:$4 sm:$0xff]   ;;  %v5791_v13 = vld [vmem:[%s6437_s27 + $0x614] ss:$8 sps:$4 sm:$0xff]  }
 0x1e9   : > { %4187 = vmatprep.subr.bf16.mxu0 %v5716_v14  ;;  %v5794_v14 = vld [vmem:[%s6437_s27 + $0xe14] ss:$8 sps:$4 sm:$0xff]  }
 0x1eb   : > { %3860 = vmatpush1.bf16.msra.mxu1 %v5711_v15  ;;  %v6985_v15 = vrot.slane %v923_v60, %v6514_v50  ;;  %v5869_v60 = vld [vmem:[%s6437_s27 + $0x6e4] ss:$8 sps:$4 sm:$0xff]  }
 0x1ec   : > { %4188 = vmatpush1.bf16.msra.mxu0 %v5714_v16  ;;  %3861 = vmatprep.subr.bf16.mxu1 %v5719_v19  ;;  %v5792_v16 = vld [vmem:[%s6437_s27 + $0xe10] ss:$8 sps:$4 sm:$0xff]   ;;  %v5797_v19 = vld [vmem:[%s6437_s27 + $0x624] ss:$8 sps:$4 sm:$0xff]  }
 0x1ed   : > { %4189 = vmatprep.subr.bf16.mxu0 %v5722_v20  ;;  %v5800_v20 = vld [vmem:[%s6437_s27 + $0xe24] ss:$8 sps:$4 sm:$0xff]  }
 0x1ef   : > { %3862 = vmatpush1.bf16.msra.mxu1 %v5717_v21  ;;  %v5795_v21 = vld [vmem:[%s6437_s27 + $0x620] ss:$8 sps:$4 sm:$0xff]  }
 0x1f0   : > { %4190 = vmatpush1.bf16.msra.mxu0 %v5720_v22  ;;  %3863 = vmatprep.subr.bf16.mxu1 %v5725_v23  ;;  %v5798_v22 = vld [vmem:[%s6437_s27 + $0xe20] ss:$8 sps:$4 sm:$0xff]   ;;  %v5803_v23 = vld [vmem:[%s6437_s27 + $0x634] ss:$8 sps:$4 sm:$0xff]  }
 0x1f1   : > { %4191 = vmatprep.subr.bf16.mxu0 %v5728_v24  ;;  %v5806_v24 = vld [vmem:[%s6437_s27 + $0xe34] ss:$8 sps:$4 sm:$0xff]  }
 0x1f3   : > { %3864 = vmatpush1.bf16.msra.mxu1 %v5723_v53  ;;  %v5801_v53 = vld [vmem:[%s6437_s27 + $0x630] ss:$8 sps:$4 sm:$0xff]  }
 0x1f4   : > { %4192 = vmatpush1.bf16.msra.mxu0 %v5726_v57  ;;  %3865 = vmatprep.subr.bf16.mxu1 %v5731_v27  ;;  %v5804_v57 = vld [vmem:[%s6437_s27 + $0xe30] ss:$8 sps:$4 sm:$0xff]   ;;  %v5809_v27 = vld [vmem:[%s6437_s27 + $0x644] ss:$8 sps:$4 sm:$0xff]  }
 0x1f5   : > { %4193 = vmatprep.subr.bf16.mxu0 %v5734_v28  ;;  %v5812_v28 = vld [vmem:[%s6437_s27 + $0xe44] ss:$8 sps:$4 sm:$0xff]  }
 0x1f7   : > { %3866 = vmatpush1.bf16.msra.mxu1 %v5729_v29  ;;  %v5807_v29 = vld [vmem:[%s6437_s27 + $0x640] ss:$8 sps:$4 sm:$0xff]  }
 0x1f8   : > { %4194 = vmatpush1.bf16.msra.mxu0 %v5732_v30  ;;  %3867 = vmatprep.subr.bf16.mxu1 %v5737_v31  ;;  %v5810_v30 = vld [vmem:[%s6437_s27 + $0xe40] ss:$8 sps:$4 sm:$0xff]   ;;  %v5815_v31 = vld [vmem:[%s6437_s27 + $0x654] ss:$8 sps:$4 sm:$0xff]  }
 0x1f9   : > { %4195 = vmatprep.subr.bf16.mxu0 %v5740_v32  ;;  %v5818_v32 = vld [vmem:[%s6437_s27 + $0xe54] ss:$8 sps:$4 sm:$0xff]  }
 0x1fb   : > { %3868 = vmatpush1.bf16.msra.mxu1 %v5735_v33  ;;  %v5813_v33 = vld [vmem:[%s6437_s27 + $0x650] ss:$8 sps:$4 sm:$0xff]  }
 0x1fc   : > { %4196 = vmatpush1.bf16.msra.mxu0 %v5738_v34  ;;  %3869 = vmatprep.subr.bf16.mxu1 %v5743_v35  ;;  %v5816_v34 = vld [vmem:[%s6437_s27 + $0xe50] ss:$8 sps:$4 sm:$0xff]   ;;  %v5821_v35 = vld [vmem:[%s6437_s27 + $0x664] ss:$8 sps:$4 sm:$0xff]  }
 0x1fd   : > { %4197 = vmatprep.subr.bf16.mxu0 %v5746_v36  ;;  %v5824_v36 = vld [vmem:[%s6437_s27 + $0xe64] ss:$8 sps:$4 sm:$0xff]  }
 0x1ff   : > { %3870 = vmatpush1.bf16.msra.mxu1 %v5741_v18  ;;  %v5819_v18 = vld [vmem:[%s6437_s27 + $0x660] ss:$8 sps:$4 sm:$0xff]  }
 0x200   : > { %4198 = vmatpush1.bf16.msra.mxu0 %v5744_v38  ;;  %3871 = vmatprep.subr.bf16.mxu1 %v5749_v43  ;;  %v5822_v38 = vld [vmem:[%s6437_s27 + $0xe60] ss:$8 sps:$4 sm:$0xff]   ;;  %v5827_v43 = vld [vmem:[%s6437_s27 + $0x674] ss:$8 sps:$4 sm:$0xff]  }
 0x201   : > { %4199 = vmatprep.subr.bf16.mxu0 %v5752_v45  ;;  %v5830_v45 = vld [vmem:[%s6437_s27 + $0xe74] ss:$8 sps:$4 sm:$0xff]  }
 0x203   : > { %3872 = vmatpush1.bf16.msra.mxu1 %v5747_v26  ;;  %v5825_v26 = vld [vmem:[%s6437_s27 + $0x670] ss:$8 sps:$4 sm:$0xff]  }
 0x204   : > { %4200 = vmatpush1.bf16.msra.mxu0 %v5750_v47  ;;  %3873 = vmatprep.subr.bf16.mxu1 %v5755_v37  ;;  %v5828_v47 = vld [vmem:[%s6437_s27 + $0xe70] ss:$8 sps:$4 sm:$0xff]   ;;  %v5833_v37 = vld [vmem:[%s6437_s27 + $0x684] ss:$8 sps:$4 sm:$0xff]  }
 0x205   : > { %4201 = vmatprep.subr.bf16.mxu0 %v5758_v48  ;;  %v5836_v48 = vld [vmem:[%s6437_s27 + $0xe84] ss:$8 sps:$4 sm:$0xff]  }
 0x207   : > { %3874 = vmatpush1.bf16.msra.mxu1 %v5753_v17  ;;  %v5831_v17 = vld [vmem:[%s6437_s27 + $0x680] ss:$8 sps:$4 sm:$0xff]  }
 0x208   : > { %4202 = vmatpush1.bf16.msra.mxu0 %v5756_v49  ;;  %3875 = vmatprep.subr.bf16.mxu1 %v5761_v51  ;;  %v5834_v49 = vld [vmem:[%s6437_s27 + $0xe80] ss:$8 sps:$4 sm:$0xff]   ;;  %v5839_v51 = vld [vmem:[%s6437_s27 + $0x694] ss:$8 sps:$4 sm:$0xff]  }
 0x209   : > { %4203 = vmatprep.subr.bf16.mxu0 %v5764_v52  ;;  %v5842_v52 = vld [vmem:[%s6437_s27 + $0xe94] ss:$8 sps:$4 sm:$0xff]  }
 0x20b   : > { %3876 = vmatpush1.bf16.msra.mxu1 %v5759_v54  ;;  %v5837_v54 = vld [vmem:[%s6437_s27 + $0x690] ss:$8 sps:$4 sm:$0xff]  }
 0x20c   : > { %4204 = vmatpush1.bf16.msra.mxu0 %v5762_v55  ;;  %3877 = vmatprep.subr.bf16.mxu1 %v5767_v56  ;;  %v5840_v55 = vld [vmem:[%s6437_s27 + $0xe90] ss:$8 sps:$4 sm:$0xff]   ;;  %v5845_v56 = vld [vmem:[%s6437_s27 + $0x6a4] ss:$8 sps:$4 sm:$0xff]  }
 0x20d   : > { %4205 = vmatprep.subr.bf16.mxu0 %v5770_v58  ;;  %v5848_v58 = vld [vmem:[%s6437_s27 + $0xea4] ss:$8 sps:$4 sm:$0xff]  }
 0x20f   : > { %3878 = vmatpush1.bf16.msra.mxu1 %v5765_v39  ;;  %v5843_v39 = vld [vmem:[%s6437_s27 + $0x6a0] ss:$8 sps:$4 sm:$0xff]  }
 0x210   : > { %4206 = vmatpush1.bf16.msra.mxu0 %v5768_v40  ;;  %3879 = vmatprep.subr.bf16.mxu1 %v5773_v61  ;;  %v5846_v40 = vld [vmem:[%s6437_s27 + $0xea0] ss:$8 sps:$4 sm:$0xff]   ;;  %v5851_v61 = vld [vmem:[%s6437_s27 + $0x6b4] ss:$8 sps:$4 sm:$0xff]  }
 0x211   : > { %4207 = vmatprep.subr.bf16.mxu0 %v5776_v62  ;;  %v5854_v62 = vld [vmem:[%s6437_s27 + $0xeb4] ss:$8 sps:$4 sm:$0xff]  }
 0x213   : > { %3880 = vmatpush1.bf16.msra.mxu1 %v5771_v3  ;;  %v5857_v3 = vld [vmem:[%s6437_s27 + $0x6c4] ss:$8 sps:$4 sm:$0xff]  }
 0x214   : > { %4208 = vmatpush1.bf16.msra.mxu0 %v5774_v4  ;;  %3881 = vmatprep.subr.bf16.mxu1 %v5779_v25  ;;  %v5860_v4 = vld [vmem:[%s6437_s27 + $0xec4] ss:$8 sps:$4 sm:$0xff]   ;;  %v5855_v25 = vld [vmem:[%s6437_s27 + $0x6c0] ss:$8 sps:$4 sm:$0xff]  }
 0x215   : > { %4209 = vmatprep.subr.bf16.mxu0 %v5782_v5  ;;  %v5858_v5 = vld [vmem:[%s6437_s27 + $0xec0] ss:$8 sps:$4 sm:$0xff]  }
 0x217   : > { %3882 = vmatpush1.bf16.msra.mxu1 %v5777_v41  ;;  %v5863_v41 = vld [vmem:[%s6437_s27 + $0x6d4] ss:$8 sps:$4 sm:$0xff]  }
 0x218   : > { %4210 = vmatpush1.bf16.msra.mxu0 %v5780_v42  ;;  %3892 = vmatprep.subr.bf16.mxu1 %v5785_v59  ;;  %v5866_v42 = vld [vmem:[%s6437_s27 + $0xed4] ss:$8 sps:$4 sm:$0xff]   ;;  %v5861_v59 = vld [vmem:[%s6437_s27 + $0x6d0] ss:$8 sps:$4 sm:$0xff]  }
 0x219   : > { %4220 = vmatprep.subr.bf16.mxu0 %v5788_v7  ;;  %v5864_v7 = vld [vmem:[%s6437_s27 + $0xed0] ss:$8 sps:$4 sm:$0xff]  }
 0x21a   : > { %3884 = vmatmul.mubr.bf16.vlgmr.msra.gmra.mrb[0].mxu1 %v952_v9  ;;  %v5867_v9 = vld [vmem:[%s6437_s27 + $0x6e0] ss:$8 sps:$4 sm:$0xff]  }
 0x21b   : > { %4212 = vmatmul.mubr.bf16.vlgmr.msra.gmra.mrb[0].mxu0 %v1050_v10  ;;  %3893 = vmatpush1.bf16.msra.mxu1 %v5783_v11  ;;  %v5870_v10 = vld [vmem:[%s6437_s27 + $0xee0] ss:$8 sps:$4 sm:$0xff]   ;;  %v5875_v11 = vld [vmem:[%s6437_s27 + $0x6f4] ss:$8 sps:$4 sm:$0xff]  }
 0x21c   : > { %4221 = vmatpush1.bf16.msra.mxu0 %v5786_v12  ;;  %3894 = vmatprep.subr.bf16.mxu1 %v5791_v13  ;;  %v5878_v12 = vld [vmem:[%s6437_s27 + $0xef4] ss:$8 sps:$4 sm:$0xff]   ;;  %v5873_v13 = vld [vmem:[%s6437_s27 + $0x6f0] ss:$8 sps:$4 sm:$0xff]  }
 0x21d   : > { %4222 = vmatprep.subr.bf16.mxu0 %v5794_v14  ;;  %3924 = vmatprep.mubr.bf16.mxu1 %v6985_v15  ;;  %v5876_v14 = vld [vmem:[%s6437_s27 + $0xef0] ss:$8 sps:$4 sm:$0xff]  }
 0x21e   : > { %4252 = vmatprep.mubr.bf16.mxu0 %v6988_v63 }
 0x21f   : > { %3895 = vmatpush1.bf16.msra.mxu1 %v5789_v0  ;;  %v5882_v0 = vld [vmem:[%s6437_s27 + $0x704] ss:$8 sps:$4 sm:$0xff]  }
 0x220   : > { %4223 = vmatpush1.bf16.msra.mxu0 %v5792_v16  ;;  %3896 = vmatprep.subr.bf16.mxu1 %v5797_v19  ;;  %v5886_v16 = vld [vmem:[%s6437_s27 + $0xf04] ss:$8 sps:$4 sm:$0xff]   ;;  %v7054_v19 = vrot.slane %v6963_v46, %v6514_v50  ;;  %v955_v46 = vcombine.high %v6985_v15, %v6985_v15 }
 0x221   : > { %4224 = vmatprep.subr.bf16.mxu0 %v5800_v20  ;;  %v7058_v20 = vrot.slane %v6966_v6, %v6514_v50  ;;  %v5887_v50 = vld [vmem:[%s6437_s27 + $0x710] ss:$8 sps:$4 sm:$0xff]   ;;  %v5895_v15 = vld [vmem:[%s6437_s27 + $0x724] ss:$8 sps:$4 sm:$0xff]  }
 0x222   : > { %v5890_v6 = vld [vmem:[%s6437_s27 + $0xf10] ss:$8 sps:$4 sm:$0xff]  }
 0x223   : > { %3897 = vmatpush1.bf16.msra.mxu1 %v5795_v21  ;;  %v5880_v21 = vld [vmem:[%s6437_s27 + $0x700] ss:$8 sps:$4 sm:$0xff]  }
 0x224   : > { %4225 = vmatpush1.bf16.msra.mxu0 %v5798_v22  ;;  %3898 = vmatprep.subr.bf16.mxu1 %v5803_v23  ;;  %v5884_v22 = vld [vmem:[%s6437_s27 + $0xf00] ss:$8 sps:$4 sm:$0xff]   ;;  %v5889_v23 = vld [vmem:[%s6437_s27 + $0x714] ss:$8 sps:$4 sm:$0xff]  }
 0x225   : > { %4226 = vmatprep.subr.bf16.mxu0 %v5806_v24  ;;  %v5892_v24 = vld [vmem:[%s6437_s27 + $0xf14] ss:$8 sps:$4 sm:$0xff]  }
 0x227   : > { %3899 = vmatpush1.bf16.msra.mxu1 %v5801_v53  ;;  %v1053_v53 = vcombine.high %v6988_v63, %v6988_v63  ;;  %v5893_v63 = vld [vmem:[%s6437_s27 + $0x720] ss:$8 sps:$4 sm:$0xff]  }
 0x228   : > { %4227 = vmatpush1.bf16.msra.mxu0 %v5804_v57  ;;  %3900 = vmatprep.subr.bf16.mxu1 %v5809_v27  ;;  %v5898_v57 = vld [vmem:[%s6437_s27 + $0xf24] ss:$8 sps:$4 sm:$0xff]   ;;  %v5896_v27 = vld [vmem:[%s6437_s27 + $0xf20] ss:$8 sps:$4 sm:$0xff]  }
 0x229   : > { %4228 = vmatprep.subr.bf16.mxu0 %v5812_v28  ;;  %v5901_v28 = vld [vmem:[%s6437_s27 + $0x734] ss:$8 sps:$4 sm:$0xff]  }
 0x22b   : > { %3901 = vmatpush1.bf16.msra.mxu1 %v5807_v29  ;;  %v5904_v29 = vld [vmem:[%s6437_s27 + $0xf34] ss:$8 sps:$4 sm:$0xff]  }
 0x22c   : > { %4229 = vmatpush1.bf16.msra.mxu0 %v5810_v30  ;;  %3902 = vmatprep.subr.bf16.mxu1 %v5815_v31  ;;  %v5899_v30 = vld [vmem:[%s6437_s27 + $0x730] ss:$8 sps:$4 sm:$0xff]  }
 0x22d   : > { %4230 = vmatprep.subr.bf16.mxu0 %v5818_v32  ;;  %v5902_v31 = vld [vmem:[%s6437_s27 + $0xf30] ss:$8 sps:$4 sm:$0xff]   ;;  %v5907_v32 = vld [vmem:[%s6437_s27 + $0x744] ss:$8 sps:$4 sm:$0xff]  }
 0x22f   : > { %3903 = vmatpush1.bf16.msra.mxu1 %v5813_v33  ;;  %v5910_v33 = vld [vmem:[%s6437_s27 + $0xf44] ss:$8 sps:$4 sm:$0xff]  }
 0x230   : > { %4231 = vmatpush1.bf16.msra.mxu0 %v5816_v34  ;;  %3904 = vmatprep.subr.bf16.mxu1 %v5821_v35  ;;  %v5905_v34 = vld [vmem:[%s6437_s27 + $0x740] ss:$8 sps:$4 sm:$0xff]  }
 0x231   : > { %4232 = vmatprep.subr.bf16.mxu0 %v5824_v36  ;;  %v5908_v35 = vld [vmem:[%s6437_s27 + $0xf40] ss:$8 sps:$4 sm:$0xff]   ;;  %v5913_v36 = vld [vmem:[%s6437_s27 + $0x754] ss:$8 sps:$4 sm:$0xff]  }
 0x233   : > { %3905 = vmatpush1.bf16.msra.mxu1 %v5819_v18  ;;  %v5916_v18 = vld [vmem:[%s6437_s27 + $0xf54] ss:$8 sps:$4 sm:$0xff]  }
 0x234   : > { %4233 = vmatpush1.bf16.msra.mxu0 %v5822_v38  ;;  %3906 = vmatprep.subr.bf16.mxu1 %v5827_v43  ;;  %v5911_v38 = vld [vmem:[%s6437_s27 + $0x750] ss:$8 sps:$4 sm:$0xff]  }
 0x235   : > { %4234 = vmatprep.subr.bf16.mxu0 %v5830_v45  ;;  %v5914_v43 = vld [vmem:[%s6437_s27 + $0xf50] ss:$8 sps:$4 sm:$0xff]   ;;  %v5919_v45 = vld [vmem:[%s6437_s27 + $0x764] ss:$8 sps:$4 sm:$0xff]  }
 0x237   : > { %3907 = vmatpush1.bf16.msra.mxu1 %v5825_v26  ;;  %v5922_v26 = vld [vmem:[%s6437_s27 + $0xf64] ss:$8 sps:$4 sm:$0xff]  }
 0x238   : > { %4235 = vmatpush1.bf16.msra.mxu0 %v5828_v47  ;;  %3908 = vmatprep.subr.bf16.mxu1 %v5833_v37  ;;  %v5917_v47 = vld [vmem:[%s6437_s27 + $0x760] ss:$8 sps:$4 sm:$0xff]  }
 0x239   : > { %4236 = vmatprep.subr.bf16.mxu0 %v5836_v48  ;;  %v5920_v37 = vld [vmem:[%s6437_s27 + $0xf60] ss:$8 sps:$4 sm:$0xff]   ;;  %v5925_v48 = vld [vmem:[%s6437_s27 + $0x774] ss:$8 sps:$4 sm:$0xff]  }
 0x23b   : > { %3909 = vmatpush1.bf16.msra.mxu1 %v5831_v17  ;;  %v5928_v17 = vld [vmem:[%s6437_s27 + $0xf74] ss:$8 sps:$4 sm:$0xff]  }
 0x23c   : > { %4237 = vmatpush1.bf16.msra.mxu0 %v5834_v49  ;;  %3910 = vmatprep.subr.bf16.mxu1 %v5839_v51  ;;  %v5923_v49 = vld [vmem:[%s6437_s27 + $0x770] ss:$8 sps:$4 sm:$0xff]  }
 0x23d   : > { %4238 = vmatprep.subr.bf16.mxu0 %v5842_v52  ;;  %v5926_v51 = vld [vmem:[%s6437_s27 + $0xf70] ss:$8 sps:$4 sm:$0xff]   ;;  %v5931_v52 = vld [vmem:[%s6437_s27 + $0x784] ss:$8 sps:$4 sm:$0xff]  }
 0x23f   : > { %3911 = vmatpush1.bf16.msra.mxu1 %v5837_v54  ;;  %v5934_v54 = vld [vmem:[%s6437_s27 + $0xf84] ss:$8 sps:$4 sm:$0xff]  }
 0x240   : > { %4239 = vmatpush1.bf16.msra.mxu0 %v5840_v55  ;;  %3912 = vmatprep.subr.bf16.mxu1 %v5845_v56  ;;  %v5929_v55 = vld [vmem:[%s6437_s27 + $0x780] ss:$8 sps:$4 sm:$0xff]  }
 0x241   : > { %4240 = vmatprep.subr.bf16.mxu0 %v5848_v58  ;;  %v5932_v56 = vld [vmem:[%s6437_s27 + $0xf80] ss:$8 sps:$4 sm:$0xff]   ;;  %v5937_v58 = vld [vmem:[%s6437_s27 + $0x794] ss:$8 sps:$4 sm:$0xff]  }
 0x243   : > { %3913 = vmatpush1.bf16.msra.mxu1 %v5843_v39  ;;  %v5940_v39 = vld [vmem:[%s6437_s27 + $0xf94] ss:$8 sps:$4 sm:$0xff]  }
 0x244   : > { %4241 = vmatpush1.bf16.msra.mxu0 %v5846_v40  ;;  %3914 = vmatprep.subr.bf16.mxu1 %v5851_v61  ;;  %v5935_v40 = vld [vmem:[%s6437_s27 + $0x790] ss:$8 sps:$4 sm:$0xff]  }
 0x245   : > { %4242 = vmatprep.subr.bf16.mxu0 %v5854_v62  ;;  %v5938_v61 = vld [vmem:[%s6437_s27 + $0xf90] ss:$8 sps:$4 sm:$0xff]   ;;  %v5943_v62 = vld [vmem:[%s6437_s27 + $0x7a4] ss:$8 sps:$4 sm:$0xff]  }
 0x247   : > { %3915 = vmatpush1.bf16.msra.mxu1 %v5849_v1  ;;  %v5946_v1 = vld [vmem:[%s6437_s27 + $0xfa4] ss:$8 sps:$4 sm:$0xff]  }
 0x248   : > { %4243 = vmatpush1.bf16.msra.mxu0 %v5852_v2  ;;  %3916 = vmatprep.subr.bf16.mxu1 %v5857_v3  ;;  %v5941_v2 = vld [vmem:[%s6437_s27 + $0x7a0] ss:$8 sps:$4 sm:$0xff]  }
 0x249   : > { %4244 = vmatprep.subr.bf16.mxu0 %v5860_v4  ;;  %v5944_v3 = vld [vmem:[%s6437_s27 + $0xfa0] ss:$8 sps:$4 sm:$0xff]   ;;  %v5949_v4 = vld [vmem:[%s6437_s27 + $0x7b4] ss:$8 sps:$4 sm:$0xff]  }
 0x24b   : > { %3917 = vmatpush1.bf16.msra.mxu1 %v5855_v25  ;;  %v5952_v25 = vld [vmem:[%s6437_s27 + $0xfb4] ss:$8 sps:$4 sm:$0xff]  }
 0x24c   : > { %4245 = vmatpush1.bf16.msra.mxu0 %v5858_v5  ;;  %3918 = vmatprep.subr.bf16.mxu1 %v5863_v41  ;;  %v5947_v5 = vld [vmem:[%s6437_s27 + $0x7b0] ss:$8 sps:$4 sm:$0xff]  }
 0x24d   : > { %4246 = vmatprep.subr.bf16.mxu0 %v5866_v42  ;;  %v5950_v41 = vld [vmem:[%s6437_s27 + $0xfb0] ss:$8 sps:$4 sm:$0xff]   ;;  %v5955_v42 = vld [vmem:[%s6437_s27 + $0x7c4] ss:$8 sps:$4 sm:$0xff]  }
 0x24f   : > { %3919 = vmatpush1.bf16.msra.mxu1 %v5861_v59  ;;  %v5958_v59 = vld [vmem:[%s6437_s27 + $0xfc4] ss:$8 sps:$4 sm:$0xff]  }
 0x250   : > { %4247 = vmatpush1.bf16.msra.mxu0 %v5864_v7  ;;  %3920 = vmatprep.subr.bf16.mxu1 %v5869_v60  ;;  %v5953_v7 = vld [vmem:[%s6437_s27 + $0x7c0] ss:$8 sps:$4 sm:$0xff]  }
 0x251   : > { %4248 = vmatprep.subr.bf16.mxu0 %v5872_v8  ;;  %v5956_v60 = vld [vmem:[%s6437_s27 + $0xfc0] ss:$8 sps:$4 sm:$0xff]   ;;  %v5961_v8 = vld [vmem:[%s6437_s27 + $0x7d4] ss:$8 sps:$4 sm:$0xff]  }
 0x253   : > { %3921 = vmatpush1.bf16.msra.mxu1 %v5867_v9  ;;  %v5964_v9 = vld [vmem:[%s6437_s27 + $0xfd4] ss:$8 sps:$4 sm:$0xff]  }
 0x254   : > { %4249 = vmatpush1.bf16.msra.mxu0 %v5870_v10  ;;  %3922 = vmatprep.subr.bf16.mxu1 %v5875_v11  ;;  %v5959_v10 = vld [vmem:[%s6437_s27 + $0x7d0] ss:$8 sps:$4 sm:$0xff]  }
 0x255   : > { %4250 = vmatprep.subr.bf16.mxu0 %v5878_v12  ;;  %v5962_v11 = vld [vmem:[%s6437_s27 + $0xfd0] ss:$8 sps:$4 sm:$0xff]   ;;  %v5967_v12 = vld [vmem:[%s6437_s27 + $0x7e4] ss:$8 sps:$4 sm:$0xff]  }
 0x257   : > { %3923 = vmatpush1.bf16.msra.mxu1 %v5873_v13  ;;  %v5970_v13 = vld [vmem:[%s6437_s27 + $0xfe4] ss:$8 sps:$4 sm:$0xff]  }
 0x258   : > { %4251 = vmatpush1.bf16.msra.mxu0 %v5876_v14  ;;  %3933 = vmatprep.subr.bf16.mxu1 %v5882_v0  ;;  %v5965_v14 = vld [vmem:[%s6437_s27 + $0x7e0] ss:$8 sps:$4 sm:$0xff]  }
 0x259   : > { %4261 = vmatprep.subr.bf16.mxu0 %v5886_v16  ;;  %v5968_v0 = vld [vmem:[%s6437_s27 + $0xfe0] ss:$8 sps:$4 sm:$0xff]   ;;  %v5973_v16 = vld [vmem:[%s6437_s27 + $0x7f4] ss:$8 sps:$4 sm:$0xff]  }
 0x25a   : > { %3925 = vmatmul.mubr.bf16.vlgmr.msra.gmra.mrb[0].mxu1 %v7054_v19 }
 0x25b   : > { %4253 = vmatmul.mubr.bf16.vlgmr.msra.gmra.mrb[0].mxu0 %v7058_v20  ;;  %3934 = vmatpush1.bf16.msra.mxu1 %v5880_v21  ;;  %v5976_v21 = vld [vmem:[%s6437_s27 + $0xff4] ss:$8 sps:$4 sm:$0xff]  }
 0x25c   : > { %4262 = vmatpush1.bf16.msra.mxu0 %v5884_v22  ;;  %3935 = vmatprep.subr.bf16.mxu1 %v5889_v23  ;;  %v5971_v22 = vld [vmem:[%s6437_s27 + $0x7f0] ss:$8 sps:$4 sm:$0xff]  }
 0x25d   : > { %4263 = vmatprep.subr.bf16.mxu0 %v5892_v24  ;;  %3965 = vmatprep.mubr.bf16.mxu1 %v955_v46  ;;  %v5974_v23 = vld [vmem:[%s6437_s27 + $0xff0] ss:$8 sps:$4 sm:$0xff]   ;;  %v953_v24 = vcombine.high %v7054_v19, %v7054_v19  ;;  %v1051_v46 = vcombine.high %v7058_v20, %v7058_v20 }
 0x25e   : > { %4293 = vmatprep.mubr.bf16.mxu0 %v1053_v53  ;;  %v6171_v53 = vmov 1983009808  }
 0x25f   : > { %3936 = vmatpush1.bf16.msra.mxu1 %v5887_v50  ;;  %v4306_v50 = vunpack.c.l.s4 %v6171_v53 }
 0x260   : > { %4264 = vmatpush1.bf16.msra.mxu0 %v5890_v6  ;;  %3937 = vmatprep.subr.bf16.mxu1 %v5895_v15 }
 0x261   : > { %4265 = vmatprep.subr.bf16.mxu0 %v5898_v57  ;;  %v4307_v6 = vunpack.c.0.s8 %v4306_v50 }
 0x263   : > { %3938 = vmatpush1.bf16.msra.mxu1 %v5893_v63 }
 0x264   : > { %4266 = vmatpush1.bf16.msra.mxu0 %v5896_v27  ;;  %3939 = vmatprep.subr.bf16.mxu1 %v5901_v28 }
 0x265   : > { %4267 = vmatprep.subr.bf16.mxu0 %v5904_v29 }
 0x267   : > { %3940 = vmatpush1.bf16.msra.mxu1 %v5899_v30  ;;  %v4310_v30 = vsub.s32 %v4307_v6, %v6506_v44 }
 0x268   : > { %4268 = vmatpush1.bf16.msra.mxu0 %v5902_v31  ;;  %3941 = vmatprep.subr.bf16.mxu1 %v5907_v32 }
 0x269   : > { %4269 = vmatprep.subr.bf16.mxu0 %v5910_v33 }
 0x26b   : > { %3942 = vmatpush1.bf16.msra.mxu1 %v5905_v34  ;;  %v337_v34 = vld [vmem:[#allocation2] sm:$0xf] }
 0x26c   : > { %4270 = vmatpush1.bf16.msra.mxu0 %v5908_v35  ;;  %3943 = vmatprep.subr.bf16.mxu1 %v5913_v36 }
 0x26d   : > { %4271 = vmatprep.subr.bf16.mxu0 %v5916_v18  ;;  %v4320_v18 = vld [vmem:[%s269_s17] sm:$0x3] (!%p5030_p6) }
 0x26f   : > { %3944 = vmatpush1.bf16.msra.mxu1 %v5911_v38  ;;  %v4324_v38 = vsub.s32 (!%p5030_p6), 0, %v6506_v44 }
 0x270   : > { %4272 = vmatpush1.bf16.msra.mxu0 %v5914_v43  ;;  %3945 = vmatprep.subr.bf16.mxu1 %v5919_v45  ;;  %v4328_v43 = vsub.s32 (!%p5030_p6), 1, %v6506_v44  ;;  %v4340_v45 = vld [vmem:[%s278_s10] sm:$0x3] (!%p5030_p6) }
 0x271   : > { %4273 = vmatprep.subr.bf16.mxu0 %v5922_v26  ;;  %v4325_v26 = vrot.slane (!%p5030_p6), %v4320_v18, %v4324_v38 }
 0x273   : > { %3946 = vmatpush1.bf16.msra.mxu1 %v5917_v47  ;;  %v4329_v47 = vrot.slane (!%p5030_p6), %v4320_v18, %v4328_v43 }
 0x274   : > { %4274 = vmatpush1.bf16.msra.mxu0 %v5920_v37  ;;  %3947 = vmatprep.subr.bf16.mxu1 %v5925_v48  ;;  %v4345_v37 = vrot.slane (!%p5030_p6), %v4340_v45, %v4324_v38  ;;  %v4349_v48 = vrot.slane (!%p5030_p6), %v4340_v45, %v4328_v43 }
 0x275   : > { %4275 = vmatprep.subr.bf16.mxu0 %v5928_v17  ;;  %v4330_v17 = vcombine.low (!%p5030_p6), %v4325_v26, %v4329_v47 }
 0x277   : > { %3948 = vmatpush1.bf16.msra.mxu1 %v5923_v49  ;;  %v4350_v49 = vcombine.low (!%p5030_p6), %v4345_v37, %v4349_v48 }
 0x278   : > { %4276 = vmatpush1.bf16.msra.mxu0 %v5926_v51  ;;  %3949 = vmatprep.subr.bf16.mxu1 %v5931_v52  ;;  %v4337_v52 = vrot.slane (!%p5030_p6), %v4330_v17, %v4310_v30 }
 0x279   : > { %4277 = vmatprep.subr.bf16.mxu0 %v5934_v54  ;;  %v4357_v54 = vrot.slane (!%p5030_p6), %v4350_v49, %v4310_v30 }
 0x27b   : > { %3950 = vmatpush1.bf16.msra.mxu1 %v5929_v55 }
 0x27c   : > { %4278 = vmatpush1.bf16.msra.mxu0 %v5932_v56  ;;  %3951 = vmatprep.subr.bf16.mxu1 %v5937_v58 }
 0x27d   : > { %4279 = vmatprep.subr.bf16.mxu0 %v5940_v39 }
 0x27f   : > { %3952 = vmatpush1.bf16.msra.mxu1 %v5935_v40 }
 0x280   : > { %4280 = vmatpush1.bf16.msra.mxu0 %v5938_v61  ;;  %3953 = vmatprep.subr.bf16.mxu1 %v5943_v62 }
 0x281   : > { %4281 = vmatprep.subr.bf16.mxu0 %v5946_v1 }
 0x283   : > { %3954 = vmatpush1.bf16.msra.mxu1 %v5941_v2 }
 0x284   : > { %4282 = vmatpush1.bf16.msra.mxu0 %v5944_v3  ;;  %3955 = vmatprep.subr.bf16.mxu1 %v5949_v4 }
 0x285   : > { %4283 = vmatprep.subr.bf16.mxu0 %v5952_v25 }
 0x287   : > { %3956 = vmatpush1.bf16.msra.mxu1 %v5947_v5 }
 0x288   : > { %4284 = vmatpush1.bf16.msra.mxu0 %v5950_v41  ;;  %3957 = vmatprep.subr.bf16.mxu1 %v5955_v42 }
 0x289   : > { %4285 = vmatprep.subr.bf16.mxu0 %v5958_v59 }
 0x28b   : > { %3958 = vmatpush1.bf16.msra.mxu1 %v5953_v7 }
 0x28c   : > { %4286 = vmatpush1.bf16.msra.mxu0 %v5956_v60  ;;  %3959 = vmatprep.subr.bf16.mxu1 %v5961_v8 }
 0x28d   : > { %4287 = vmatprep.subr.bf16.mxu0 %v5964_v9 }
 0x28f   : > { %3960 = vmatpush1.bf16.msra.mxu1 %v5959_v10 }
 0x290   : > { %4288 = vmatpush1.bf16.msra.mxu0 %v5962_v11  ;;  %3961 = vmatprep.subr.bf16.mxu1 %v5967_v12 }
 0x291   : > { %4289 = vmatprep.subr.bf16.mxu0 %v5970_v13 }
 0x293   : > { %3962 = vmatpush1.bf16.msra.mxu1 %v5965_v14 }
 0x294   : > { %4290 = vmatpush1.bf16.msra.mxu0 %v5968_v0  ;;  %3963 = vmatprep.subr.bf16.mxu1 %v5973_v16 }
 0x295   : > { %4291 = vmatprep.subr.bf16.mxu0 %v5976_v21 }
 0x297   : > { %3964 = vmatpush1.bf16.msra.mxu1 %v5971_v22 }
 0x298   : > { %4292 = vmatpush1.bf16.msra.mxu0 %v5974_v23 }
 0x29a   : > { %3966 = vmatmul.mubr.bf16.vlgmr.msra.gmra.mrb[0].mxu1 %v953_v24 }
 0x29b   : > { %4294 = vmatmul.mubr.bf16.vlgmr.msra.gmra.mrb[0].mxu0 %v1051_v46 }
 0x36d   : > { %v3967_v15 = vpop.f32.mrb[0].mxu1 }
 0x36e   : > { %v4295_v57 = vpop.f32.mrb[0].mxu0  ;;  %v3969_v27 = vpop.f32.mrb[1].mxu1 }
 0x36f   : > { %v5036_v63 = vadd.f32 %v4295_v57, %v3967_v15  ;;  %v4297_v28 = vpop.f32.mrb[1].mxu0  ;;  %v3971_v31 = vpop.f32.mrb[2].mxu1 }
 0x370   : > { %v5037_v29 = vadd.f32 %v4297_v28, %v3969_v27  ;;  %v4299_v19 = vpop.f32.mrb[2].mxu0  ;;  %v3972_v32 = vpop.f32.mrb[3].mxu1 }
 0x371   : > { %v4300_v33 = vpop.f32.mrb[3].mxu0 }
 0x372   : > { %v4304_v20 = vcombine.low %v5036_v63, %v5037_v29  ;;  %4318 = sbr.rel (%p5030_p6) target bundleno = 901 (0x385), region = 56 }
 0x374   : > { %v4311_v35 = vrot.slane %v4304_v20, %v4310_v30 }
 0x376   : > { %v4313_v36 = vadd.f32 %v4311_v35, %v337_v34 }
 0x378   : > { %4314 = vst [vmem:[#allocation2] sm:$0xf] %v4313_v36 }
 0x37f   : > { %v4319_v51 = vld [vmem:[#allocation2] sm:$0xf] }
 0x380   : > { %v4339_v55 = vmul.f32 %v4337_v52, %v4319_v51 }
 0x382   : > { %v4359_v56 = vadd.f32 %v4357_v54, %v4339_v55 }
 0x384   : > { %4360 = vst [vmem:[%s6463_s18] sm:$0xf] %v4359_v56 }
 0x385 PF: > { %s20_s25 = sadd.s32 1, %s6161_s25   ;;  %s7214_s21 = sld [smem:[#allocation10_spill]] }
 0x386   : > { %p17_p9 = scmp.ge.s32.totalorder %s20_s25, 6   ;;  %s7215_s17 = sld [smem:[#allocation14_spill]] }
 0x387   : > { %s7216_s22 = sld [smem:[#allocation15_spill]]  ;;  %s7217_s6 = sld [smem:[#allocation11_spill]] }
 0x388   : > { %s7218_s1 = sld [smem:[#allocation12_spill]]  ;;  %s7219_s24 = sld [smem:[#allocation13_spill]] }
 0x389   : > { %s7220_s15 = smov %s6125_s16  ;;  %s7222_s18 = smov %s6137_s19 }
 0x38a   : > { %s7223_s19 = smov %s6141_s20  ;;  %19 = sbr.rel (!%p17_p9) target bundleno = 13 (0xd), region = 111 }
 0x38b   : > { %s7221_s16 = smov %s7214_s21  ;;  %s7225_s21 = smov %s6153_s23 }
 0x38d   : > { %s7224_s20 = smov %s7216_s22  ;;  %s7226_s22 = smov %s7217_s6 }
 0x38e   : > { %s7227_s23 = smov %s7218_s1 }
 0x391   :  { %4383 = vsyncpa [#allocation4], 1 }
 0x392   :  { %4385 = vsyncpa [#allocation4 + $0x1], 1 }
 0x393   :  { %4386 = vsyncpa [#allocation6], 1 }
 0x394   :  { %4388 = vsyncpa [#allocation6 + $0x1], 1 }

</bundles_post_ra>
